<compile_context>
chip_gen: v6e
topology: v6e:2x2x1
jax: 0.10.0
libtpu: 0.0.40
codegen_flags: <defaults>
</compile_context>

<pallas_src>
import jax
import jax.numpy as jnp
import numpy as np
from jax.experimental import pallas as pl
from jax.experimental.pallas import tpu as pltpu

# Small, module-consistent sizes.
BATCH = 2
SEQ = 8
VOCAB = 32
EMBED = 32        # embedding_dim
H_LSTM = 64       # hidden_lstm_dim
H_DIM = 32        # hidden_dim
NUM_LAYERS = 2

# 128-lane padded widths (keep every slice / store vreg-aligned & lane-dense).
H_PAD = 128       # per-gate / per-layer state width (>= H_LSTM, EMBED)
HD_PAD = 128      # padded MLP hidden width (>= H_DIM)
V_PAD = 128       # padded vocab width (>= VOCAB)

# Fused-gate column layout (8 blocks of H_PAD lanes): [i1 i2 f1 f2 g1 g2 o1 o2]
# Fused state lane layout (2 blocks of H_PAD lanes):  [layer1 | layer2]


# --------------------------------------------------------------------------- #
# Single fused kernel: wavefront 2-layer LSTM + MLP head.
# --------------------------------------------------------------------------- #
def _fused_lstm_kernel(x_ref, wx_ref, wr_ref, badd_ref, h0_ref, c0_ref,
                       w1_ref, b1_ref, w2_ref, b2_ref,
                       pred_ref, hn_ref, cn_ref, xadd_scr):
    T, B, HP = SEQ, BATCH, H_PAD
    f32, bf16 = jnp.float32, jnp.bfloat16

    b_add = badd_ref[...]                                   # (1, 8*HP) f32

    # Hoisted layer-1 input projection for ALL timesteps (off the serial
    # chain): columns already in fused gate order, layer-2 columns carry just
    # the layer-2 bias (W_X has zero columns there).  Stage time-major so the
    # per-step read inside the recurrence is a clean leading-index load.
    xw = jnp.dot(x_ref[...], wx_ref[...],
                 preferred_element_type=f32) + b_add        # (T*B, 8*HP) f32
    for t in range(T):                                      # one-time relayout
        xadd_scr[t] = xw[t * B:(t + 1) * B, :]

    h = h0_ref[...]                                         # (B, 2*HP) [h1|h2]
    c = c0_ref[...]                                         # (B, 2*HP) [c1|c2]
    ys = []                                                 # layer-2 outputs
    # Wavefront: step s runs layer-1 timestep s (s < T) and layer-2 timestep
    # s-1 (s >= 1) with ONE fused K=256 recurrent matmul.
    for s in range(T + 1):                                  # static unroll
        add = xadd_scr[s] if s < T else b_add               # (B|1, 8*HP)
        gates = jnp.dot(h.astype(bf16), wr_ref[...],
                        preferred_element_type=f32) + add   # (B, 8*HP)
        i_g = jax.nn.sigmoid(gates[:, 0 * HP:2 * HP])       # [i1 | i2]
        f_g = jax.nn.sigmoid(gates[:, 2 * HP:4 * HP])       # [f1 | f2]
        g_g = jnp.tanh(gates[:, 4 * HP:6 * HP])             # [g1 | g2]
        o_g = jax.nn.sigmoid(gates[:, 6 * HP:8 * HP])       # [o1 | o2]
        c_new = f_g * c + i_g * g_g
        h_new = o_g * jnp.tanh(c_new)
        if s == 0:            # layer-2 half not valid yet: commit layer-1 only
            c = jnp.concatenate([c_new[:, :HP], c[:, HP:]], axis=1)
            h = jnp.concatenate([h_new[:, :HP], h[:, HP:]], axis=1)
        elif s == T:          # layer-1 finished: commit layer-2 half only
            c = jnp.concatenate([c[:, :HP], c_new[:, HP:]], axis=1)
            h = jnp.concatenate([h[:, :HP], h_new[:, HP:]], axis=1)
        else:
            c, h = c_new, h_new
        if s >= 1:
            ys.append(h[:, HP:])                            # h2[s-1], (B, HP)

    hn_ref[0] = h[:, :HP]
    hn_ref[1] = h[:, HP:]
    cn_ref[0] = c[:, :HP]
    cn_ref[1] = c[:, HP:]

    # MLP head on time-major stacked layer-2 outputs (all 128-lane wide,
    # unmasked lane-dense store).
    y = jnp.concatenate(ys, axis=0)                         # (T*B, HP) f32
    h1m = jnp.maximum(
        jnp.dot(y.astype(bf16), w1_ref[...], preferred_element_type=f32)
        + b1_ref[...], 0.0)
    pred_ref[...] = (jnp.dot(h1m.astype(bf16), w2_ref[...],
                             preferred_element_type=f32) + b2_ref[...])


def _fused_forward(x, wx, wr, badd, h0p, c0p, w1, b1, w2, b2):
    TB = SEQ * BATCH
    return pl.pallas_call(
        _fused_lstm_kernel,
        out_shape=[
            jax.ShapeDtypeStruct((TB, V_PAD), jnp.float32),
            jax.ShapeDtypeStruct((NUM_LAYERS, BATCH, H_PAD), jnp.float32),
            jax.ShapeDtypeStruct((NUM_LAYERS, BATCH, H_PAD), jnp.float32),
        ],
        scratch_shapes=[pltpu.VMEM((SEQ, BATCH, 8 * H_PAD), jnp.float32)],
    )(x, wx, wr, badd, h0p, c0p, w1, b1, w2, b2)


# --------------------------------------------------------------------------- #
# One-time parameter preparation (hoisted out of the forward pass).
# --------------------------------------------------------------------------- #
def prepare_params(params):
    H, HP = H_LSTM, H_PAD
    assert NUM_LAYERS == 2, "fused wavefront kernel is specialized to 2 layers"

    def gate_blocks(w):            # (..., 4H) -> 4 x (..., H), torch [i,f,g,o]
        return [w[..., k * H:(k + 1) * H] for k in range(4)]

    wih1, wih2 = params["wih"]     # (E, 4H), (H, 4H)
    whh1, whh2 = params["whh"]     # (H, 4H), (H, 4H)
    b1l, b2l = params["b"]         # (1, 4H) each (already b_ih + b_hh)

    # W_X: (HP, 8HP). Layer-1 gate k -> columns [2k*HP, 2k*HP+H); layer-2
    # columns are zero (their input projection lives in W_R via h1).
    wx = jnp.zeros((HP, 8 * HP), jnp.float32)
    for k, blk in enumerate(gate_blocks(wih1)):
        wx = wx.at[:EMBED, 2 * k * HP:2 * k * HP + H].set(blk)

    # W_R: (2HP, 8HP). Rows [0:HP] multiply h1, rows [HP:2HP] multiply h2.
    #   h1 -> layer-1 gates via whh1, and -> layer-2 gates via wih2 (input)
    #   h2 -> layer-2 gates via whh2
    wr = jnp.zeros((2 * HP, 8 * HP), jnp.float32)
    for k, (r1, i2, r2) in enumerate(zip(gate_blocks(whh1),
                                         gate_blocks(wih2),
                                         gate_blocks(whh2))):
        c1 = 2 * k * HP
        c2 = (2 * k + 1) * HP
        wr = wr.at[:H, c1:c1 + H].set(r1)
        wr = wr.at[:H, c2:c2 + H].set(i2)
        wr = wr.at[HP:HP + H, c2:c2 + H].set(r2)

    # b_add: (1, 8HP). Layer-1 columns = b1, layer-2 columns = b2.
    badd = jnp.zeros((1, 8 * HP), jnp.float32)
    for k, (bb1, bb2) in enumerate(zip(gate_blocks(b1l), gate_blocks(b2l))):
        badd = badd.at[:, 2 * k * HP:2 * k * HP + H].set(bb1)
        badd = badd.at[:, (2 * k + 1) * HP:(2 * k + 1) * HP + H].set(bb2)

    return {
        "emb": jnp.pad(params["embedding"],
                       ((0, 0), (0, HP - EMBED))).astype(jnp.bfloat16),
        "wx": wx.astype(jnp.bfloat16),
        "wr": wr.astype(jnp.bfloat16),
        "badd": badd,
        "w1": jnp.pad(params["w1"],
                      ((0, HP - H), (0, HD_PAD - H_DIM))).astype(jnp.bfloat16),
        "b1": jnp.pad(params["b1"], ((0, 0), (0, HD_PAD - H_DIM))),
        "w2": jnp.pad(params["w2"],
                      ((0, HD_PAD - H_DIM), (0, V_PAD - VOCAB))).astype(jnp.bfloat16),
        "b2": jnp.pad(params["b2"], ((0, 0), (0, V_PAD - VOCAB))),
    }


# --------------------------------------------------------------------------- #
# Model forward (same semantics as the torch module's forward()).
# --------------------------------------------------------------------------- #
def lstm_model_forward(prepped, token_ids, hidden):
    h0_all, c0_all = hidden                          # (L, B, H), (L, B, H)
    B, T = token_ids.shape
    H, HP = H_LSTM, H_PAD

    # Embedding gather (glue), bf16, time-major flattened.
    emb = prepped["emb"][token_ids]                  # (B, T, HP) bf16
    x = jnp.transpose(emb, (1, 0, 2)).reshape(T * B, HP)

    # Pack per-layer states into lane-stacked [layer1 | layer2] f32 state.
    def pack_state(s):
        padded = jnp.pad(s, ((0, 0), (0, 0), (0, HP - H)))       # (L, B, HP)
        return jnp.concatenate([padded[l] for l in range(NUM_LAYERS)], axis=-1)

    h0p, c0p = pack_state(h0_all), pack_state(c0_all)

    pred_pad, hn_p, cn_p = _fused_forward(
        x, prepped["wx"], prepped["wr"], prepped["badd"], h0p, c0p,
        prepped["w1"], prepped["b1"], prepped["w2"], prepped["b2"])

    prediction = jnp.transpose(
        pred_pad[:, :VOCAB].reshape(T, B, VOCAB), (1, 0, 2))      # (B, T, V)
    return prediction, (hn_p[:, :, :H], cn_p[:, :, :H])


# --------------------------------------------------------------------------- #
# Pure-JAX reference (for correctness check).
# --------------------------------------------------------------------------- #
def _ref_lstm_layer(x_tbe, wih, whh, bias, h0, c0):
    H = h0.shape[-1]

    def step(carry, x_t):
        h, c = carry
        gates = x_t @ wih + h @ whh + bias[0]
        i = jax.nn.sigmoid(gates[:, :H])
        f = jax.nn.sigmoid(gates[:, H:2 * H])
        g = jnp.tanh(gates[:, 2 * H:3 * H])
        o = jax.nn.sigmoid(gates[:, 3 * H:])
        c = f * c + i * g
        h = o * jnp.tanh(c)
        return (h, c), h

    (hn, cn), out = jax.lax.scan(step, (h0, c0), x_tbe)
    return out, hn, cn


def ref_forward(params, token_ids, hidden):
    h0_all, c0_all = hidden
    x = jnp.transpose(params["embedding"][token_ids], (1, 0, 2))
    h_finals, c_finals = [], []
    for layer in range(NUM_LAYERS):
        x, hn, cn = _ref_lstm_layer(x, params["wih"][layer],
                                    params["whh"][layer], params["b"][layer],
                                    h0_all[layer], c0_all[layer])
        h_finals.append(hn)
        c_finals.append(cn)
    h1 = jnp.maximum(x @ params["w1"] + params["b1"][0], 0.0)
    pred = h1 @ params["w2"] + params["b2"][0]
    return jnp.transpose(pred, (1, 0, 2)), (jnp.stack(h_finals),
                                            jnp.stack(c_finals))


def init_params(key):
    keys = jax.random.split(key, 4 + 4 * NUM_LAYERS)
    k = 1.0 / np.sqrt(H_LSTM)
    params = {
        "embedding": jax.random.normal(keys[0], (VOCAB, EMBED), jnp.float32),
        "wih": [], "whh": [], "b": [],
    }
    for layer in range(NUM_LAYERS):
        in_dim = EMBED if layer == 0 else H_LSTM
        kw = keys[4 + 4 * layer: 8 + 4 * layer]
        params["wih"].append(
            jax.random.uniform(kw[0], (in_dim, 4 * H_LSTM), jnp.float32, -k, k))
        params["whh"].append(
            jax.random.uniform(kw[1], (H_LSTM, 4 * H_LSTM), jnp.float32, -k, k))
        b_ih = jax.random.uniform(kw[2], (1, 4 * H_LSTM), jnp.float32, -k, k)
        b_hh = jax.random.uniform(kw[3], (1, 4 * H_LSTM), jnp.float32, -k, k)
        params["b"].append(b_ih + b_hh)          # combined, same math as torch
    k1 = 1.0 / np.sqrt(H_LSTM)
    k2 = 1.0 / np.sqrt(H_DIM)
    params["w1"] = jax.random.uniform(keys[1], (H_LSTM, H_DIM), jnp.float32, -k1, k1)
    params["b1"] = jax.random.uniform(keys[2], (1, H_DIM), jnp.float32, -k1, k1)
    params["w2"] = jax.random.uniform(keys[3], (H_DIM, VOCAB), jnp.float32, -k2, k2)
    params["b2"] = jnp.zeros((1, VOCAB), jnp.float32)
    return params


if __name__ == "__main__":
    key = jax.random.PRNGKey(0)
    pkey, ikey = jax.random.split(key)
    params = init_params(pkey)
    prepped = jax.tree_util.tree_map(jax.block_until_ready,
                                     prepare_params(params))  # one-time prep

    token_ids = jax.random.randint(ikey, (BATCH, SEQ), 0, VOCAB, jnp.int32)
    hidden0 = (jnp.zeros((NUM_LAYERS, BATCH, H_LSTM), jnp.float32),
               jnp.zeros((NUM_LAYERS, BATCH, H_LSTM), jnp.float32))

    fwd = jax.jit(lstm_model_forward)
    pred, (hn, cn) = fwd(prepped, token_ids, hidden0)
    jax.block_until_ready((pred, hn, cn))

    assert pred.shape == (BATCH, SEQ, VOCAB)
    assert hn.shape == (NUM_LAYERS, BATCH, H_LSTM)
    assert cn.shape == (NUM_LAYERS, BATCH, H_LSTM)

    # Sanity-check against a pure-JAX f32 reference (loose tol: matmul
    # operands are bf16 on the MXU, accumulation in f32).
    rpred, (rhn, rcn) = ref_forward(params, token_ids, hidden0)
    np.testing.assert_allclose(np.asarray(pred), np.asarray(rpred),
                               rtol=3e-2, atol=3e-2)
    np.testing.assert_allclose(np.asarray(hn), np.asarray(rhn),
                               rtol=3e-2, atol=3e-2)
    np.testing.assert_allclose(np.asarray(cn), np.asarray(rcn),
                               rtol=3e-2, atol=3e-2)

    print("KERNEL_OK")
</pallas_src>

<mosaic_0001>
module attributes {stable_mosaic.version = 11 : i64} {
  func.func @_fused_lstm_kernel(%arg0: memref<16x128xbf16, #tpu.memory_space<vmem>>, %arg1: memref<128x1024xbf16, #tpu.memory_space<vmem>>, %arg2: memref<256x1024xbf16, #tpu.memory_space<vmem>>, %arg3: memref<1x1024xf32, #tpu.memory_space<vmem>>, %arg4: memref<2x256xf32, #tpu.memory_space<vmem>>, %arg5: memref<2x256xf32, #tpu.memory_space<vmem>>, %arg6: memref<128x128xbf16, #tpu.memory_space<vmem>>, %arg7: memref<1x128xf32, #tpu.memory_space<vmem>>, %arg8: memref<128x128xbf16, #tpu.memory_space<vmem>>, %arg9: memref<1x128xf32, #tpu.memory_space<vmem>>, %arg10: memref<16x128xf32, #tpu.memory_space<vmem>>, %arg11: memref<2x2x128xf32, #tpu.memory_space<vmem>>, %arg12: memref<2x2x128xf32, #tpu.memory_space<vmem>>, %arg13: memref<8x2x1024xf32, #tpu.memory_space<vmem>>) attributes {dimension_semantics = [], scalar_prefetch = 0 : i64, scratch_operands = 1 : i64, tpu.core_type = #tpu.core_type<tc>} {
    %c0 = arith.constant 0 : index
    %c0_0 = arith.constant 0 : index
    %0 = vector.load %arg3[%c0, %c0_0] : memref<1x1024xf32, #tpu.memory_space<vmem>>, vector<1x1024xf32>
    %c0_1 = arith.constant 0 : index
    %c0_2 = arith.constant 0 : index
    %1 = vector.load %arg0[%c0_1, %c0_2] : memref<16x128xbf16, #tpu.memory_space<vmem>>, vector<16x128xbf16>
    %c0_3 = arith.constant 0 : index
    %c0_4 = arith.constant 0 : index
    %2 = vector.load %arg1[%c0_3, %c0_4] : memref<128x1024xbf16, #tpu.memory_space<vmem>>, vector<128x1024xbf16>
    %cst = arith.constant dense<0.000000e+00> : vector<16x1024xf32>
    %3 = tpu.matmul %1, %2, %cst {dimension_numbers = #tpu.dot_dimension_numbers<[1], [0], [0], [1], [0, 0, 1, 1], [], []>} : vector<16x128xbf16>, vector<128x1024xbf16>, vector<16x1024xf32> -> vector<16x1024xf32>
    %4 = vector.broadcast %0 : vector<1x1024xf32> to vector<16x1024xf32>
    %5 = arith.addf %3, %4 : vector<16x1024xf32>
    %6 = vector.extract_strided_slice %5 {offsets = [0, 0], sizes = [2, 1024], strides = [1, 1]} : vector<16x1024xf32> to vector<2x1024xf32>
    %c0_5 = arith.constant 0 : index
    %c0_6 = arith.constant 0 : index
    %c0_7 = arith.constant 0 : index
    %7 = vector.load %arg13[%c0_5, %c0_6, %c0_7] : memref<8x2x1024xf32, #tpu.memory_space<vmem>>, vector<1x2x1024xf32>
    %8 = vector.shape_cast %7 : vector<1x2x1024xf32> to vector<2x1024xf32>
    %9 = vector.shape_cast %6 : vector<2x1024xf32> to vector<1x2x1024xf32>
    tpu.vector_store %arg13[%c0_5, %c0_6, %c0_7], %9 {strides = array<i32>} : memref<8x2x1024xf32, #tpu.memory_space<vmem>>, vector<1x2x1024xf32>,
    %10 = vector.extract_strided_slice %5 {offsets = [2, 0], sizes = [2, 1024], strides = [1, 1]} : vector<16x1024xf32> to vector<2x1024xf32>
    %c1 = arith.constant 1 : index
    %c0_8 = arith.constant 0 : index
    %c0_9 = arith.constant 0 : index
    %11 = vector.load %arg13[%c1, %c0_8, %c0_9] : memref<8x2x1024xf32, #tpu.memory_space<vmem>>, vector<1x2x1024xf32>
    %12 = vector.shape_cast %11 : vector<1x2x1024xf32> to vector<2x1024xf32>
    %13 = vector.shape_cast %10 : vector<2x1024xf32> to vector<1x2x1024xf32>
    tpu.vector_store %arg13[%c1, %c0_8, %c0_9], %13 {strides = array<i32>} : memref<8x2x1024xf32, #tpu.memory_space<vmem>>, vector<1x2x1024xf32>,
    %14 = vector.extract_strided_slice %5 {offsets = [4, 0], sizes = [2, 1024], strides = [1, 1]} : vector<16x1024xf32> to vector<2x1024xf32>
    %c2 = arith.constant 2 : index
    %c0_10 = arith.constant 0 : index
    %c0_11 = arith.constant 0 : index
    %15 = vector.load %arg13[%c2, %c0_10, %c0_11] : memref<8x2x1024xf32, #tpu.memory_space<vmem>>, vector<1x2x1024xf32>
    %16 = vector.shape_cast %15 : vector<1x2x1024xf32> to vector<2x1024xf32>
    %17 = vector.shape_cast %14 : vector<2x1024xf32> to vector<1x2x1024xf32>
    tpu.vector_store %arg13[%c2, %c0_10, %c0_11], %17 {strides = array<i32>} : memref<8x2x1024xf32, #tpu.memory_space<vmem>>, vector<1x2x1024xf32>,
    %18 = vector.extract_strided_slice %5 {offsets = [6, 0], sizes = [2, 1024], strides = [1, 1]} : vector<16x1024xf32> to vector<2x1024xf32>
    %c3 = arith.constant 3 : index
    %c0_12 = arith.constant 0 : index
    %c0_13 = arith.constant 0 : index
    %19 = vector.load %arg13[%c3, %c0_12, %c0_13] : memref<8x2x1024xf32, #tpu.memory_space<vmem>>, vector<1x2x1024xf32>
    %20 = vector.shape_cast %19 : vector<1x2x1024xf32> to vector<2x1024xf32>
    %21 = vector.shape_cast %18 : vector<2x1024xf32> to vector<1x2x1024xf32>
    tpu.vector_store %arg13[%c3, %c0_12, %c0_13], %21 {strides = array<i32>} : memref<8x2x1024xf32, #tpu.memory_space<vmem>>, vector<1x2x1024xf32>,
    %22 = vector.extract_strided_slice %5 {offsets = [8, 0], sizes = [2, 1024], strides = [1, 1]} : vector<16x1024xf32> to vector<2x1024xf32>
    %c4 = arith.constant 4 : index
    %c0_14 = arith.constant 0 : index
    %c0_15 = arith.constant 0 : index
    %23 = vector.load %arg13[%c4, %c0_14, %c0_15] : memref<8x2x1024xf32, #tpu.memory_space<vmem>>, vector<1x2x1024xf32>
    %24 = vector.shape_cast %23 : vector<1x2x1024xf32> to vector<2x1024xf32>
    %25 = vector.shape_cast %22 : vector<2x1024xf32> to vector<1x2x1024xf32>
    tpu.vector_store %arg13[%c4, %c0_14, %c0_15], %25 {strides = array<i32>} : memref<8x2x1024xf32, #tpu.memory_space<vmem>>, vector<1x2x1024xf32>,
    %26 = vector.extract_strided_slice %5 {offsets = [10, 0], sizes = [2, 1024], strides = [1, 1]} : vector<16x1024xf32> to vector<2x1024xf32>
    %c5 = arith.constant 5 : index
    %c0_16 = arith.constant 0 : index
    %c0_17 = arith.constant 0 : index
    %27 = vector.load %arg13[%c5, %c0_16, %c0_17] : memref<8x2x1024xf32, #tpu.memory_space<vmem>>, vector<1x2x1024xf32>
    %28 = vector.shape_cast %27 : vector<1x2x1024xf32> to vector<2x1024xf32>
    %29 = vector.shape_cast %26 : vector<2x1024xf32> to vector<1x2x1024xf32>
    tpu.vector_store %arg13[%c5, %c0_16, %c0_17], %29 {strides = array<i32>} : memref<8x2x1024xf32, #tpu.memory_space<vmem>>, vector<1x2x1024xf32>,
    %30 = vector.extract_strided_slice %5 {offsets = [12, 0], sizes = [2, 1024], strides = [1, 1]} : vector<16x1024xf32> to vector<2x1024xf32>
    %c6 = arith.constant 6 : index
    %c0_18 = arith.constant 0 : index
    %c0_19 = arith.constant 0 : index
    %31 = vector.load %arg13[%c6, %c0_18, %c0_19] : memref<8x2x1024xf32, #tpu.memory_space<vmem>>, vector<1x2x1024xf32>
    %32 = vector.shape_cast %31 : vector<1x2x1024xf32> to vector<2x1024xf32>
    %33 = vector.shape_cast %30 : vector<2x1024xf32> to vector<1x2x1024xf32>
    tpu.vector_store %arg13[%c6, %c0_18, %c0_19], %33 {strides = array<i32>} : memref<8x2x1024xf32, #tpu.memory_space<vmem>>, vector<1x2x1024xf32>,
    %34 = vector.extract_strided_slice %5 {offsets = [14, 0], sizes = [2, 1024], strides = [1, 1]} : vector<16x1024xf32> to vector<2x1024xf32>
    %c7 = arith.constant 7 : index
    %c0_20 = arith.constant 0 : index
    %c0_21 = arith.constant 0 : index
    %35 = vector.load %arg13[%c7, %c0_20, %c0_21] : memref<8x2x1024xf32, #tpu.memory_space<vmem>>, vector<1x2x1024xf32>
    %36 = vector.shape_cast %35 : vector<1x2x1024xf32> to vector<2x1024xf32>
    %37 = vector.shape_cast %34 : vector<2x1024xf32> to vector<1x2x1024xf32>
    tpu.vector_store %arg13[%c7, %c0_20, %c0_21], %37 {strides = array<i32>} : memref<8x2x1024xf32, #tpu.memory_space<vmem>>, vector<1x2x1024xf32>,
    %c0_22 = arith.constant 0 : index
    %c0_23 = arith.constant 0 : index
    %38 = vector.load %arg4[%c0_22, %c0_23] : memref<2x256xf32, #tpu.memory_space<vmem>>, vector<2x256xf32>
    %c0_24 = arith.constant 0 : index
    %c0_25 = arith.constant 0 : index
    %39 = vector.load %arg5[%c0_24, %c0_25] : memref<2x256xf32, #tpu.memory_space<vmem>>, vector<2x256xf32>
    %c0_26 = arith.constant 0 : index
    %c0_27 = arith.constant 0 : index
    %c0_28 = arith.constant 0 : index
    %40 = vector.load %arg13[%c0_26, %c0_27, %c0_28] : memref<8x2x1024xf32, #tpu.memory_space<vmem>>, vector<1x2x1024xf32>
    %41 = vector.shape_cast %40 : vector<1x2x1024xf32> to vector<2x1024xf32>
    %42 = arith.truncf %38 : vector<2x256xf32> to vector<2x256xbf16>
    %c0_29 = arith.constant 0 : index
    %c0_30 = arith.constant 0 : index
    %43 = vector.load %arg2[%c0_29, %c0_30] : memref<256x1024xbf16, #tpu.memory_space<vmem>>, vector<256x1024xbf16>
    %cst_31 = arith.constant dense<0.000000e+00> : vector<2x1024xf32>
    %44 = tpu.matmul %42, %43, %cst_31 {dimension_numbers = #tpu.dot_dimension_numbers<[1], [0], [0], [1], [0, 0, 1, 1], [], []>} : vector<2x256xbf16>, vector<256x1024xbf16>, vector<2x1024xf32> -> vector<2x1024xf32>
    %45 = arith.addf %44, %41 : vector<2x1024xf32>
    %46 = vector.extract_strided_slice %45 {offsets = [0, 0], sizes = [2, 256], strides = [1, 1]} : vector<2x1024xf32> to vector<2x256xf32>
    %47 = arith.negf %46 : vector<2x256xf32>
    %48 = math.exp %47 : vector<2x256xf32>
    %cst_32 = arith.constant 1.000000e+00 : f32
    %49 = vector.broadcast %cst_32 : f32 to vector<2x256xf32>
    %50 = arith.addf %49, %48 : vector<2x256xf32>
    %51 = arith.divf %49, %50 : vector<2x256xf32>
    %52 = vector.extract_strided_slice %45 {offsets = [0, 256], sizes = [2, 256], strides = [1, 1]} : vector<2x1024xf32> to vector<2x256xf32>
    %53 = arith.negf %52 : vector<2x256xf32>
    %54 = math.exp %53 : vector<2x256xf32>
    %cst_33 = arith.constant 1.000000e+00 : f32
    %55 = vector.broadcast %cst_33 : f32 to vector<2x256xf32>
    %56 = arith.addf %55, %54 : vector<2x256xf32>
    %57 = arith.divf %55, %56 : vector<2x256xf32>
    %58 = vector.extract_strided_slice %45 {offsets = [0, 512], sizes = [2, 256], strides = [1, 1]} : vector<2x1024xf32> to vector<2x256xf32>
    %59 = math.tanh %58 : vector<2x256xf32>
    %60 = vector.extract_strided_slice %45 {offsets = [0, 768], sizes = [2, 256], strides = [1, 1]} : vector<2x1024xf32> to vector<2x256xf32>
    %61 = arith.negf %60 : vector<2x256xf32>
    %62 = math.exp %61 : vector<2x256xf32>
    %cst_34 = arith.constant 1.000000e+00 : f32
    %63 = vector.broadcast %cst_34 : f32 to vector<2x256xf32>
    %64 = arith.addf %63, %62 : vector<2x256xf32>
    %65 = arith.divf %63, %64 : vector<2x256xf32>
    %66 = arith.mulf %57, %39 : vector<2x256xf32>
    %67 = arith.mulf %51, %59 : vector<2x256xf32>
    %68 = arith.addf %66, %67 : vector<2x256xf32>
    %69 = math.tanh %68 : vector<2x256xf32>
    %70 = arith.mulf %65, %69 : vector<2x256xf32>
    %71 = vector.extract_strided_slice %68 {offsets = [0, 0], sizes = [2, 128], strides = [1, 1]} : vector<2x256xf32> to vector<2x128xf32>
    %72 = vector.extract_strided_slice %39 {offsets = [0, 128], sizes = [2, 128], strides = [1, 1]} : vector<2x256xf32> to vector<2x128xf32>
    %73 = tpu.concatenate %71, %72 in 1 : vector<2x128xf32>, vector<2x128xf32> -> vector<2x256xf32>
    %74 = vector.extract_strided_slice %70 {offsets = [0, 0], sizes = [2, 128], strides = [1, 1]} : vector<2x256xf32> to vector<2x128xf32>
    %75 = vector.extract_strided_slice %38 {offsets = [0, 128], sizes = [2, 128], strides = [1, 1]} : vector<2x256xf32> to vector<2x128xf32>
    %76 = tpu.concatenate %74, %75 in 1 : vector<2x128xf32>, vector<2x128xf32> -> vector<2x256xf32>
    %c1_35 = arith.constant 1 : index
    %c0_36 = arith.constant 0 : index
    %c0_37 = arith.constant 0 : index
    %77 = vector.load %arg13[%c1_35, %c0_36, %c0_37] : memref<8x2x1024xf32, #tpu.memory_space<vmem>>, vector<1x2x1024xf32>
    %78 = vector.shape_cast %77 : vector<1x2x1024xf32> to vector<2x1024xf32>
    %79 = arith.truncf %76 : vector<2x256xf32> to vector<2x256xbf16>
    %c0_38 = arith.constant 0 : index
    %c0_39 = arith.constant 0 : index
    %80 = vector.load %arg2[%c0_38, %c0_39] : memref<256x1024xbf16, #tpu.memory_space<vmem>>, vector<256x1024xbf16>
    %cst_40 = arith.constant dense<0.000000e+00> : vector<2x1024xf32>
    %81 = tpu.matmul %79, %80, %cst_40 {dimension_numbers = #tpu.dot_dimension_numbers<[1], [0], [0], [1], [0, 0, 1, 1], [], []>} : vector<2x256xbf16>, vector<256x1024xbf16>, vector<2x1024xf32> -> vector<2x1024xf32>
    %82 = arith.addf %81, %78 : vector<2x1024xf32>
    %83 = vector.extract_strided_slice %82 {offsets = [0, 0], sizes = [2, 256], strides = [1, 1]} : vector<2x1024xf32> to vector<2x256xf32>
    %84 = arith.negf %83 : vector<2x256xf32>
    %85 = math.exp %84 : vector<2x256xf32>
    %cst_41 = arith.constant 1.000000e+00 : f32
    %86 = vector.broadcast %cst_41 : f32 to vector<2x256xf32>
    %87 = arith.addf %86, %85 : vector<2x256xf32>
    %88 = arith.divf %86, %87 : vector<2x256xf32>
    %89 = vector.extract_strided_slice %82 {offsets = [0, 256], sizes = [2, 256], strides = [1, 1]} : vector<2x1024xf32> to vector<2x256xf32>
    %90 = arith.negf %89 : vector<2x256xf32>
    %91 = math.exp %90 : vector<2x256xf32>
    %cst_42 = arith.constant 1.000000e+00 : f32
    %92 = vector.broadcast %cst_42 : f32 to vector<2x256xf32>
    %93 = arith.addf %92, %91 : vector<2x256xf32>
    %94 = arith.divf %92, %93 : vector<2x256xf32>
    %95 = vector.extract_strided_slice %82 {offsets = [0, 512], sizes = [2, 256], strides = [1, 1]} : vector<2x1024xf32> to vector<2x256xf32>
    %96 = math.tanh %95 : vector<2x256xf32>
    %97 = vector.extract_strided_slice %82 {offsets = [0, 768], sizes = [2, 256], strides = [1, 1]} : vector<2x1024xf32> to vector<2x256xf32>
    %98 = arith.negf %97 : vector<2x256xf32>
    %99 = math.exp %98 : vector<2x256xf32>
    %cst_43 = arith.constant 1.000000e+00 : f32
    %100 = vector.broadcast %cst_43 : f32 to vector<2x256xf32>
    %101 = arith.addf %100, %99 : vector<2x256xf32>
    %102 = arith.divf %100, %101 : vector<2x256xf32>
    %103 = arith.mulf %94, %73 : vector<2x256xf32>
    %104 = arith.mulf %88, %96 : vector<2x256xf32>
    %105 = arith.addf %103, %104 : vector<2x256xf32>
    %106 = math.tanh %105 : vector<2x256xf32>
    %107 = arith.mulf %102, %106 : vector<2x256xf32>
    %108 = vector.extract_strided_slice %107 {offsets = [0, 128], sizes = [2, 128], strides = [1, 1]} : vector<2x256xf32> to vector<2x128xf32>
    %c2_44 = arith.constant 2 : index
    %c0_45 = arith.constant 0 : index
    %c0_46 = arith.constant 0 : index
    %109 = vector.load %arg13[%c2_44, %c0_45, %c0_46] : memref<8x2x1024xf32, #tpu.memory_space<vmem>>, vector<1x2x1024xf32>
    %110 = vector.shape_cast %109 : vector<1x2x1024xf32> to vector<2x1024xf32>
    %111 = arith.truncf %107 : vector<2x256xf32> to vector<2x256xbf16>
    %c0_47 = arith.constant 0 : index
    %c0_48 = arith.constant 0 : index
    %112 = vector.load %arg2[%c0_47, %c0_48] : memref<256x1024xbf16, #tpu.memory_space<vmem>>, vector<256x1024xbf16>
    %cst_49 = arith.constant dense<0.000000e+00> : vector<2x1024xf32>
    %113 = tpu.matmul %111, %112, %cst_49 {dimension_numbers = #tpu.dot_dimension_numbers<[1], [0], [0], [1], [0, 0, 1, 1], [], []>} : vector<2x256xbf16>, vector<256x1024xbf16>, vector<2x1024xf32> -> vector<2x1024xf32>
    %114 = arith.addf %113, %110 : vector<2x1024xf32>
    %115 = vector.extract_strided_slice %114 {offsets = [0, 0], sizes = [2, 256], strides = [1, 1]} : vector<2x1024xf32> to vector<2x256xf32>
    %116 = arith.negf %115 : vector<2x256xf32>
    %117 = math.exp %116 : vector<2x256xf32>
    %cst_50 = arith.constant 1.000000e+00 : f32
    %118 = vector.broadcast %cst_50 : f32 to vector<2x256xf32>
    %119 = arith.addf %118, %117 : vector<2x256xf32>
    %120 = arith.divf %118, %119 : vector<2x256xf32>
    %121 = vector.extract_strided_slice %114 {offsets = [0, 256], sizes = [2, 256], strides = [1, 1]} : vector<2x1024xf32> to vector<2x256xf32>
    %122 = arith.negf %121 : vector<2x256xf32>
    %123 = math.exp %122 : vector<2x256xf32>
    %cst_51 = arith.constant 1.000000e+00 : f32
    %124 = vector.broadcast %cst_51 : f32 to vector<2x256xf32>
    %125 = arith.addf %124, %123 : vector<2x256xf32>
    %126 = arith.divf %124, %125 : vector<2x256xf32>
    %127 = vector.extract_strided_slice %114 {offsets = [0, 512], sizes = [2, 256], strides = [1, 1]} : vector<2x1024xf32> to vector<2x256xf32>
    %128 = math.tanh %127 : vector<2x256xf32>
    %129 = vector.extract_strided_slice %114 {offsets = [0, 768], sizes = [2, 256], strides = [1, 1]} : vector<2x1024xf32> to vector<2x256xf32>
    %130 = arith.negf %129 : vector<2x256xf32>
    %131 = math.exp %130 : vector<2x256xf32>
    %cst_52 = arith.constant 1.000000e+00 : f32
    %132 = vector.broadcast %cst_52 : f32 to vector<2x256xf32>
    %133 = arith.addf %132, %131 : vector<2x256xf32>
    %134 = arith.divf %132, %133 : vector<2x256xf32>
    %135 = arith.mulf %126, %105 : vector<2x256xf32>
    %136 = arith.mulf %120, %128 : vector<2x256xf32>
    %137 = arith.addf %135, %136 : vector<2x256xf32>
    %138 = math.tanh %137 : vector<2x256xf32>
    %139 = arith.mulf %134, %138 : vector<2x256xf32>
    %140 = vector.extract_strided_slice %139 {offsets = [0, 128], sizes = [2, 128], strides = [1, 1]} : vector<2x256xf32> to vector<2x128xf32>
    %c3_53 = arith.constant 3 : index
    %c0_54 = arith.constant 0 : index
    %c0_55 = arith.constant 0 : index
    %141 = vector.load %arg13[%c3_53, %c0_54, %c0_55] : memref<8x2x1024xf32, #tpu.memory_space<vmem>>, vector<1x2x1024xf32>
    %142 = vector.shape_cast %141 : vector<1x2x1024xf32> to vector<2x1024xf32>
    %143 = arith.truncf %139 : vector<2x256xf32> to vector<2x256xbf16>
    %c0_56 = arith.constant 0 : index
    %c0_57 = arith.constant 0 : index
    %144 = vector.load %arg2[%c0_56, %c0_57] : memref<256x1024xbf16, #tpu.memory_space<vmem>>, vector<256x1024xbf16>
    %cst_58 = arith.constant dense<0.000000e+00> : vector<2x1024xf32>
    %145 = tpu.matmul %143, %144, %cst_58 {dimension_numbers = #tpu.dot_dimension_numbers<[1], [0], [0], [1], [0, 0, 1, 1], [], []>} : vector<2x256xbf16>, vector<256x1024xbf16>, vector<2x1024xf32> -> vector<2x1024xf32>
    %146 = arith.addf %145, %142 : vector<2x1024xf32>
    %147 = vector.extract_strided_slice %146 {offsets = [0, 0], sizes = [2, 256], strides = [1, 1]} : vector<2x1024xf32> to vector<2x256xf32>
    %148 = arith.negf %147 : vector<2x256xf32>
    %149 = math.exp %148 : vector<2x256xf32>
    %cst_59 = arith.constant 1.000000e+00 : f32
    %150 = vector.broadcast %cst_59 : f32 to vector<2x256xf32>
    %151 = arith.addf %150, %149 : vector<2x256xf32>
    %152 = arith.divf %150, %151 : vector<2x256xf32>
    %153 = vector.extract_strided_slice %146 {offsets = [0, 256], sizes = [2, 256], strides = [1, 1]} : vector<2x1024xf32> to vector<2x256xf32>
    %154 = arith.negf %153 : vector<2x256xf32>
    %155 = math.exp %154 : vector<2x256xf32>
    %cst_60 = arith.constant 1.000000e+00 : f32
    %156 = vector.broadcast %cst_60 : f32 to vector<2x256xf32>
    %157 = arith.addf %156, %155 : vector<2x256xf32>
    %158 = arith.divf %156, %157 : vector<2x256xf32>
    %159 = vector.extract_strided_slice %146 {offsets = [0, 512], sizes = [2, 256], strides = [1, 1]} : vector<2x1024xf32> to vector<2x256xf32>
    %160 = math.tanh %159 : vector<2x256xf32>
    %161 = vector.extract_strided_slice %146 {offsets = [0, 768], sizes = [2, 256], strides = [1, 1]} : vector<2x1024xf32> to vector<2x256xf32>
    %162 = arith.negf %161 : vector<2x256xf32>
    %163 = math.exp %162 : vector<2x256xf32>
    %cst_61 = arith.constant 1.000000e+00 : f32
    %164 = vector.broadcast %cst_61 : f32 to vector<2x256xf32>
    %165 = arith.addf %164, %163 : vector<2x256xf32>
    %166 = arith.divf %164, %165 : vector<2x256xf32>
    %167 = arith.mulf %158, %137 : vector<2x256xf32>
    %168 = arith.mulf %152, %160 : vector<2x256xf32>
    %169 = arith.addf %167, %168 : vector<2x256xf32>
    %170 = math.tanh %169 : vector<2x256xf32>
    %171 = arith.mulf %166, %170 : vector<2x256xf32>
    %172 = vector.extract_strided_slice %171 {offsets = [0, 128], sizes = [2, 128], strides = [1, 1]} : vector<2x256xf32> to vector<2x128xf32>
    %c4_62 = arith.constant 4 : index
    %c0_63 = arith.constant 0 : index
    %c0_64 = arith.constant 0 : index
    %173 = vector.load %arg13[%c4_62, %c0_63, %c0_64] : memref<8x2x1024xf32, #tpu.memory_space<vmem>>, vector<1x2x1024xf32>
    %174 = vector.shape_cast %173 : vector<1x2x1024xf32> to vector<2x1024xf32>
    %175 = arith.truncf %171 : vector<2x256xf32> to vector<2x256xbf16>
    %c0_65 = arith.constant 0 : index
    %c0_66 = arith.constant 0 : index
    %176 = vector.load %arg2[%c0_65, %c0_66] : memref<256x1024xbf16, #tpu.memory_space<vmem>>, vector<256x1024xbf16>
    %cst_67 = arith.constant dense<0.000000e+00> : vector<2x1024xf32>
    %177 = tpu.matmul %175, %176, %cst_67 {dimension_numbers = #tpu.dot_dimension_numbers<[1], [0], [0], [1], [0, 0, 1, 1], [], []>} : vector<2x256xbf16>, vector<256x1024xbf16>, vector<2x1024xf32> -> vector<2x1024xf32>
    %178 = arith.addf %177, %174 : vector<2x1024xf32>
    %179 = vector.extract_strided_slice %178 {offsets = [0, 0], sizes = [2, 256], strides = [1, 1]} : vector<2x1024xf32> to vector<2x256xf32>
    %180 = arith.negf %179 : vector<2x256xf32>
    %181 = math.exp %180 : vector<2x256xf32>
    %cst_68 = arith.constant 1.000000e+00 : f32
    %182 = vector.broadcast %cst_68 : f32 to vector<2x256xf32>
    %183 = arith.addf %182, %181 : vector<2x256xf32>
    %184 = arith.divf %182, %183 : vector<2x256xf32>
    %185 = vector.extract_strided_slice %178 {offsets = [0, 256], sizes = [2, 256], strides = [1, 1]} : vector<2x1024xf32> to vector<2x256xf32>
    %186 = arith.negf %185 : vector<2x256xf32>
    %187 = math.exp %186 : vector<2x256xf32>
    %cst_69 = arith.constant 1.000000e+00 : f32
    %188 = vector.broadcast %cst_69 : f32 to vector<2x256xf32>
    %189 = arith.addf %188, %187 : vector<2x256xf32>
    %190 = arith.divf %188, %189 : vector<2x256xf32>
    %191 = vector.extract_strided_slice %178 {offsets = [0, 512], sizes = [2, 256], strides = [1, 1]} : vector<2x1024xf32> to vector<2x256xf32>
    %192 = math.tanh %191 : vector<2x256xf32>
    %193 = vector.extract_strided_slice %178 {offsets = [0, 768], sizes = [2, 256], strides = [1, 1]} : vector<2x1024xf32> to vector<2x256xf32>
    %194 = arith.negf %193 : vector<2x256xf32>
    %195 = math.exp %194 : vector<2x256xf32>
    %cst_70 = arith.constant 1.000000e+00 : f32
    %196 = vector.broadcast %cst_70 : f32 to vector<2x256xf32>
    %197 = arith.addf %196, %195 : vector<2x256xf32>
    %198 = arith.divf %196, %197 : vector<2x256xf32>
    %199 = arith.mulf %190, %169 : vector<2x256xf32>
    %200 = arith.mulf %184, %192 : vector<2x256xf32>
    %201 = arith.addf %199, %200 : vector<2x256xf32>
    %202 = math.tanh %201 : vector<2x256xf32>
    %203 = arith.mulf %198, %202 : vector<2x256xf32>
    %204 = vector.extract_strided_slice %203 {offsets = [0, 128], sizes = [2, 128], strides = [1, 1]} : vector<2x256xf32> to vector<2x128xf32>
    %c5_71 = arith.constant 5 : index
    %c0_72 = arith.constant 0 : index
    %c0_73 = arith.constant 0 : index
    %205 = vector.load %arg13[%c5_71, %c0_72, %c0_73] : memref<8x2x1024xf32, #tpu.memory_space<vmem>>, vector<1x2x1024xf32>
    %206 = vector.shape_cast %205 : vector<1x2x1024xf32> to vector<2x1024xf32>
    %207 = arith.truncf %203 : vector<2x256xf32> to vector<2x256xbf16>
    %c0_74 = arith.constant 0 : index
    %c0_75 = arith.constant 0 : index
    %208 = vector.load %arg2[%c0_74, %c0_75] : memref<256x1024xbf16, #tpu.memory_space<vmem>>, vector<256x1024xbf16>
    %cst_76 = arith.constant dense<0.000000e+00> : vector<2x1024xf32>
    %209 = tpu.matmul %207, %208, %cst_76 {dimension_numbers = #tpu.dot_dimension_numbers<[1], [0], [0], [1], [0, 0, 1, 1], [], []>} : vector<2x256xbf16>, vector<256x1024xbf16>, vector<2x1024xf32> -> vector<2x1024xf32>
    %210 = arith.addf %209, %206 : vector<2x1024xf32>
    %211 = vector.extract_strided_slice %210 {offsets = [0, 0], sizes = [2, 256], strides = [1, 1]} : vector<2x1024xf32> to vector<2x256xf32>
    %212 = arith.negf %211 : vector<2x256xf32>
    %213 = math.exp %212 : vector<2x256xf32>
    %cst_77 = arith.constant 1.000000e+00 : f32
    %214 = vector.broadcast %cst_77 : f32 to vector<2x256xf32>
    %215 = arith.addf %214, %213 : vector<2x256xf32>
    %216 = arith.divf %214, %215 : vector<2x256xf32>
    %217 = vector.extract_strided_slice %210 {offsets = [0, 256], sizes = [2, 256], strides = [1, 1]} : vector<2x1024xf32> to vector<2x256xf32>
    %218 = arith.negf %217 : vector<2x256xf32>
    %219 = math.exp %218 : vector<2x256xf32>
    %cst_78 = arith.constant 1.000000e+00 : f32
    %220 = vector.broadcast %cst_78 : f32 to vector<2x256xf32>
    %221 = arith.addf %220, %219 : vector<2x256xf32>
    %222 = arith.divf %220, %221 : vector<2x256xf32>
    %223 = vector.extract_strided_slice %210 {offsets = [0, 512], sizes = [2, 256], strides = [1, 1]} : vector<2x1024xf32> to vector<2x256xf32>
    %224 = math.tanh %223 : vector<2x256xf32>
    %225 = vector.extract_strided_slice %210 {offsets = [0, 768], sizes = [2, 256], strides = [1, 1]} : vector<2x1024xf32> to vector<2x256xf32>
    %226 = arith.negf %225 : vector<2x256xf32>
    %227 = math.exp %226 : vector<2x256xf32>
    %cst_79 = arith.constant 1.000000e+00 : f32
    %228 = vector.broadcast %cst_79 : f32 to vector<2x256xf32>
    %229 = arith.addf %228, %227 : vector<2x256xf32>
    %230 = arith.divf %228, %229 : vector<2x256xf32>
    %231 = arith.mulf %222, %201 : vector<2x256xf32>
    %232 = arith.mulf %216, %224 : vector<2x256xf32>
    %233 = arith.addf %231, %232 : vector<2x256xf32>
    %234 = math.tanh %233 : vector<2x256xf32>
    %235 = arith.mulf %230, %234 : vector<2x256xf32>
    %236 = vector.extract_strided_slice %235 {offsets = [0, 128], sizes = [2, 128], strides = [1, 1]} : vector<2x256xf32> to vector<2x128xf32>
    %c6_80 = arith.constant 6 : index
    %c0_81 = arith.constant 0 : index
    %c0_82 = arith.constant 0 : index
    %237 = vector.load %arg13[%c6_80, %c0_81, %c0_82] : memref<8x2x1024xf32, #tpu.memory_space<vmem>>, vector<1x2x1024xf32>
    %238 = vector.shape_cast %237 : vector<1x2x1024xf32> to vector<2x1024xf32>
    %239 = arith.truncf %235 : vector<2x256xf32> to vector<2x256xbf16>
    %c0_83 = arith.constant 0 : index
    %c0_84 = arith.constant 0 : index
    %240 = vector.load %arg2[%c0_83, %c0_84] : memref<256x1024xbf16, #tpu.memory_space<vmem>>, vector<256x1024xbf16>
    %cst_85 = arith.constant dense<0.000000e+00> : vector<2x1024xf32>
    %241 = tpu.matmul %239, %240, %cst_85 {dimension_numbers = #tpu.dot_dimension_numbers<[1], [0], [0], [1], [0, 0, 1, 1], [], []>} : vector<2x256xbf16>, vector<256x1024xbf16>, vector<2x1024xf32> -> vector<2x1024xf32>
    %242 = arith.addf %241, %238 : vector<2x1024xf32>
    %243 = vector.extract_strided_slice %242 {offsets = [0, 0], sizes = [2, 256], strides = [1, 1]} : vector<2x1024xf32> to vector<2x256xf32>
    %244 = arith.negf %243 : vector<2x256xf32>
    %245 = math.exp %244 : vector<2x256xf32>
    %cst_86 = arith.constant 1.000000e+00 : f32
    %246 = vector.broadcast %cst_86 : f32 to vector<2x256xf32>
    %247 = arith.addf %246, %245 : vector<2x256xf32>
    %248 = arith.divf %246, %247 : vector<2x256xf32>
    %249 = vector.extract_strided_slice %242 {offsets = [0, 256], sizes = [2, 256], strides = [1, 1]} : vector<2x1024xf32> to vector<2x256xf32>
    %250 = arith.negf %249 : vector<2x256xf32>
    %251 = math.exp %250 : vector<2x256xf32>
    %cst_87 = arith.constant 1.000000e+00 : f32
    %252 = vector.broadcast %cst_87 : f32 to vector<2x256xf32>
    %253 = arith.addf %252, %251 : vector<2x256xf32>
    %254 = arith.divf %252, %253 : vector<2x256xf32>
    %255 = vector.extract_strided_slice %242 {offsets = [0, 512], sizes = [2, 256], strides = [1, 1]} : vector<2x1024xf32> to vector<2x256xf32>
    %256 = math.tanh %255 : vector<2x256xf32>
    %257 = vector.extract_strided_slice %242 {offsets = [0, 768], sizes = [2, 256], strides = [1, 1]} : vector<2x1024xf32> to vector<2x256xf32>
    %258 = arith.negf %257 : vector<2x256xf32>
    %259 = math.exp %258 : vector<2x256xf32>
    %cst_88 = arith.constant 1.000000e+00 : f32
    %260 = vector.broadcast %cst_88 : f32 to vector<2x256xf32>
    %261 = arith.addf %260, %259 : vector<2x256xf32>
    %262 = arith.divf %260, %261 : vector<2x256xf32>
    %263 = arith.mulf %254, %233 : vector<2x256xf32>
    %264 = arith.mulf %248, %256 : vector<2x256xf32>
    %265 = arith.addf %263, %264 : vector<2x256xf32>
    %266 = math.tanh %265 : vector<2x256xf32>
    %267 = arith.mulf %262, %266 : vector<2x256xf32>
    %268 = vector.extract_strided_slice %267 {offsets = [0, 128], sizes = [2, 128], strides = [1, 1]} : vector<2x256xf32> to vector<2x128xf32>
    %c7_89 = arith.constant 7 : index
    %c0_90 = arith.constant 0 : index
    %c0_91 = arith.constant 0 : index
    %269 = vector.load %arg13[%c7_89, %c0_90, %c0_91] : memref<8x2x1024xf32, #tpu.memory_space<vmem>>, vector<1x2x1024xf32>
    %270 = vector.shape_cast %269 : vector<1x2x1024xf32> to vector<2x1024xf32>
    %271 = arith.truncf %267 : vector<2x256xf32> to vector<2x256xbf16>
    %c0_92 = arith.constant 0 : index
    %c0_93 = arith.constant 0 : index
    %272 = vector.load %arg2[%c0_92, %c0_93] : memref<256x1024xbf16, #tpu.memory_space<vmem>>, vector<256x1024xbf16>
    %cst_94 = arith.constant dense<0.000000e+00> : vector<2x1024xf32>
    %273 = tpu.matmul %271, %272, %cst_94 {dimension_numbers = #tpu.dot_dimension_numbers<[1], [0], [0], [1], [0, 0, 1, 1], [], []>} : vector<2x256xbf16>, vector<256x1024xbf16>, vector<2x1024xf32> -> vector<2x1024xf32>
    %274 = arith.addf %273, %270 : vector<2x1024xf32>
    %275 = vector.extract_strided_slice %274 {offsets = [0, 0], sizes = [2, 256], strides = [1, 1]} : vector<2x1024xf32> to vector<2x256xf32>
    %276 = arith.negf %275 : vector<2x256xf32>
    %277 = math.exp %276 : vector<2x256xf32>
    %cst_95 = arith.constant 1.000000e+00 : f32
    %278 = vector.broadcast %cst_95 : f32 to vector<2x256xf32>
    %279 = arith.addf %278, %277 : vector<2x256xf32>
    %280 = arith.divf %278, %279 : vector<2x256xf32>
    %281 = vector.extract_strided_slice %274 {offsets = [0, 256], sizes = [2, 256], strides = [1, 1]} : vector<2x1024xf32> to vector<2x256xf32>
    %282 = arith.negf %281 : vector<2x256xf32>
    %283 = math.exp %282 : vector<2x256xf32>
    %cst_96 = arith.constant 1.000000e+00 : f32
    %284 = vector.broadcast %cst_96 : f32 to vector<2x256xf32>
    %285 = arith.addf %284, %283 : vector<2x256xf32>
    %286 = arith.divf %284, %285 : vector<2x256xf32>
    %287 = vector.extract_strided_slice %274 {offsets = [0, 512], sizes = [2, 256], strides = [1, 1]} : vector<2x1024xf32> to vector<2x256xf32>
    %288 = math.tanh %287 : vector<2x256xf32>
    %289 = vector.extract_strided_slice %274 {offsets = [0, 768], sizes = [2, 256], strides = [1, 1]} : vector<2x1024xf32> to vector<2x256xf32>
    %290 = arith.negf %289 : vector<2x256xf32>
    %291 = math.exp %290 : vector<2x256xf32>
    %cst_97 = arith.constant 1.000000e+00 : f32
    %292 = vector.broadcast %cst_97 : f32 to vector<2x256xf32>
    %293 = arith.addf %292, %291 : vector<2x256xf32>
    %294 = arith.divf %292, %293 : vector<2x256xf32>
    %295 = arith.mulf %286, %265 : vector<2x256xf32>
    %296 = arith.mulf %280, %288 : vector<2x256xf32>
    %297 = arith.addf %295, %296 : vector<2x256xf32>
    %298 = math.tanh %297 : vector<2x256xf32>
    %299 = arith.mulf %294, %298 : vector<2x256xf32>
    %300 = vector.extract_strided_slice %299 {offsets = [0, 128], sizes = [2, 128], strides = [1, 1]} : vector<2x256xf32> to vector<2x128xf32>
    %301 = arith.truncf %299 : vector<2x256xf32> to vector<2x256xbf16>
    %c0_98 = arith.constant 0 : index
    %c0_99 = arith.constant 0 : index
    %302 = vector.load %arg2[%c0_98, %c0_99] : memref<256x1024xbf16, #tpu.memory_space<vmem>>, vector<256x1024xbf16>
    %cst_100 = arith.constant dense<0.000000e+00> : vector<2x1024xf32>
    %303 = tpu.matmul %301, %302, %cst_100 {dimension_numbers = #tpu.dot_dimension_numbers<[1], [0], [0], [1], [0, 0, 1, 1], [], []>} : vector<2x256xbf16>, vector<256x1024xbf16>, vector<2x1024xf32> -> vector<2x1024xf32>
    %304 = vector.broadcast %0 : vector<1x1024xf32> to vector<2x1024xf32>
    %305 = arith.addf %303, %304 : vector<2x1024xf32>
    %306 = vector.extract_strided_slice %305 {offsets = [0, 0], sizes = [2, 256], strides = [1, 1]} : vector<2x1024xf32> to vector<2x256xf32>
    %307 = arith.negf %306 : vector<2x256xf32>
    %308 = math.exp %307 : vector<2x256xf32>
    %cst_101 = arith.constant 1.000000e+00 : f32
    %309 = vector.broadcast %cst_101 : f32 to vector<2x256xf32>
    %310 = arith.addf %309, %308 : vector<2x256xf32>
    %311 = arith.divf %309, %310 : vector<2x256xf32>
    %312 = vector.extract_strided_slice %305 {offsets = [0, 256], sizes = [2, 256], strides = [1, 1]} : vector<2x1024xf32> to vector<2x256xf32>
    %313 = arith.negf %312 : vector<2x256xf32>
    %314 = math.exp %313 : vector<2x256xf32>
    %cst_102 = arith.constant 1.000000e+00 : f32
    %315 = vector.broadcast %cst_102 : f32 to vector<2x256xf32>
    %316 = arith.addf %315, %314 : vector<2x256xf32>
    %317 = arith.divf %315, %316 : vector<2x256xf32>
    %318 = vector.extract_strided_slice %305 {offsets = [0, 512], sizes = [2, 256], strides = [1, 1]} : vector<2x1024xf32> to vector<2x256xf32>
    %319 = math.tanh %318 : vector<2x256xf32>
    %320 = vector.extract_strided_slice %305 {offsets = [0, 768], sizes = [2, 256], strides = [1, 1]} : vector<2x1024xf32> to vector<2x256xf32>
    %321 = arith.negf %320 : vector<2x256xf32>
    %322 = math.exp %321 : vector<2x256xf32>
    %cst_103 = arith.constant 1.000000e+00 : f32
    %323 = vector.broadcast %cst_103 : f32 to vector<2x256xf32>
    %324 = arith.addf %323, %322 : vector<2x256xf32>
    %325 = arith.divf %323, %324 : vector<2x256xf32>
    %326 = arith.mulf %317, %297 : vector<2x256xf32>
    %327 = arith.mulf %311, %319 : vector<2x256xf32>
    %328 = arith.addf %326, %327 : vector<2x256xf32>
    %329 = math.tanh %328 : vector<2x256xf32>
    %330 = arith.mulf %325, %329 : vector<2x256xf32>
    %331 = vector.extract_strided_slice %297 {offsets = [0, 0], sizes = [2, 128], strides = [1, 1]} : vector<2x256xf32> to vector<2x128xf32>
    %332 = vector.extract_strided_slice %328 {offsets = [0, 128], sizes = [2, 128], strides = [1, 1]} : vector<2x256xf32> to vector<2x128xf32>
    %333 = tpu.concatenate %331, %332 in 1 : vector<2x128xf32>, vector<2x128xf32> -> vector<2x256xf32>
    %334 = vector.extract_strided_slice %299 {offsets = [0, 0], sizes = [2, 128], strides = [1, 1]} : vector<2x256xf32> to vector<2x128xf32>
    %335 = vector.extract_strided_slice %330 {offsets = [0, 128], sizes = [2, 128], strides = [1, 1]} : vector<2x256xf32> to vector<2x128xf32>
    %336 = tpu.concatenate %334, %335 in 1 : vector<2x128xf32>, vector<2x128xf32> -> vector<2x256xf32>
    %337 = vector.extract_strided_slice %336 {offsets = [0, 128], sizes = [2, 128], strides = [1, 1]} : vector<2x256xf32> to vector<2x128xf32>
    %338 = vector.extract_strided_slice %336 {offsets = [0, 0], sizes = [2, 128], strides = [1, 1]} : vector<2x256xf32> to vector<2x128xf32>
    %c0_104 = arith.constant 0 : index
    %c0_105 = arith.constant 0 : index
    %c0_106 = arith.constant 0 : index
    %339 = vector.load %arg11[%c0_104, %c0_105, %c0_106] : memref<2x2x128xf32, #tpu.memory_space<vmem>>, vector<1x2x128xf32>
    %340 = vector.shape_cast %339 : vector<1x2x128xf32> to vector<2x128xf32>
    %341 = vector.shape_cast %338 : vector<2x128xf32> to vector<1x2x128xf32>
    tpu.vector_store %arg11[%c0_104, %c0_105, %c0_106], %341 {strides = array<i32>} : memref<2x2x128xf32, #tpu.memory_space<vmem>>, vector<1x2x128xf32>,
    %342 = vector.extract_strided_slice %336 {offsets = [0, 128], sizes = [2, 128], strides = [1, 1]} : vector<2x256xf32> to vector<2x128xf32>
    %c1_107 = arith.constant 1 : index
    %c0_108 = arith.constant 0 : index
    %c0_109 = arith.constant 0 : index
    %343 = vector.load %arg11[%c1_107, %c0_108, %c0_109] : memref<2x2x128xf32, #tpu.memory_space<vmem>>, vector<1x2x128xf32>
    %344 = vector.shape_cast %343 : vector<1x2x128xf32> to vector<2x128xf32>
    %345 = vector.shape_cast %342 : vector<2x128xf32> to vector<1x2x128xf32>
    tpu.vector_store %arg11[%c1_107, %c0_108, %c0_109], %345 {strides = array<i32>} : memref<2x2x128xf32, #tpu.memory_space<vmem>>, vector<1x2x128xf32>,
    %346 = vector.extract_strided_slice %333 {offsets = [0, 0], sizes = [2, 128], strides = [1, 1]} : vector<2x256xf32> to vector<2x128xf32>
    %c0_110 = arith.constant 0 : index
    %c0_111 = arith.constant 0 : index
    %c0_112 = arith.constant 0 : index
    %347 = vector.load %arg12[%c0_110, %c0_111, %c0_112] : memref<2x2x128xf32, #tpu.memory_space<vmem>>, vector<1x2x128xf32>
    %348 = vector.shape_cast %347 : vector<1x2x128xf32> to vector<2x128xf32>
    %349 = vector.shape_cast %346 : vector<2x128xf32> to vector<1x2x128xf32>
    tpu.vector_store %arg12[%c0_110, %c0_111, %c0_112], %349 {strides = array<i32>} : memref<2x2x128xf32, #tpu.memory_space<vmem>>, vector<1x2x128xf32>,
    %350 = vector.extract_strided_slice %333 {offsets = [0, 128], sizes = [2, 128], strides = [1, 1]} : vector<2x256xf32> to vector<2x128xf32>
    %c1_113 = arith.constant 1 : index
    %c0_114 = arith.constant 0 : index
    %c0_115 = arith.constant 0 : index
    %351 = vector.load %arg12[%c1_113, %c0_114, %c0_115] : memref<2x2x128xf32, #tpu.memory_space<vmem>>, vector<1x2x128xf32>
    %352 = vector.shape_cast %351 : vector<1x2x128xf32> to vector<2x128xf32>
    %353 = vector.shape_cast %350 : vector<2x128xf32> to vector<1x2x128xf32>
    tpu.vector_store %arg12[%c1_113, %c0_114, %c0_115], %353 {strides = array<i32>} : memref<2x2x128xf32, #tpu.memory_space<vmem>>, vector<1x2x128xf32>,
    %354 = tpu.concatenate %108, %140, %172, %204, %236, %268, %300, %337 in 0 : vector<2x128xf32>, vector<2x128xf32>, vector<2x128xf32>, vector<2x128xf32>, vector<2x128xf32>, vector<2x128xf32>, vector<2x128xf32>, vector<2x128xf32> -> vector<16x128xf32>
    %355 = arith.truncf %354 : vector<16x128xf32> to vector<16x128xbf16>
    %c0_116 = arith.constant 0 : index
    %c0_117 = arith.constant 0 : index
    %356 = vector.load %arg6[%c0_116, %c0_117] : memref<128x128xbf16, #tpu.memory_space<vmem>>, vector<128x128xbf16>
    %cst_118 = arith.constant dense<0.000000e+00> : vector<16x128xf32>
    %357 = tpu.matmul %355, %356, %cst_118 {dimension_numbers = #tpu.dot_dimension_numbers<[1], [0], [0], [1], [0, 0, 1, 1], [], []>} : vector<16x128xbf16>, vector<128x128xbf16>, vector<16x128xf32> -> vector<16x128xf32>
    %c0_119 = arith.constant 0 : index
    %c0_120 = arith.constant 0 : index
    %358 = vector.load %arg7[%c0_119, %c0_120] : memref<1x128xf32, #tpu.memory_space<vmem>>, vector<1x128xf32>
    %359 = vector.broadcast %358 : vector<1x128xf32> to vector<16x128xf32>
    %360 = arith.addf %357, %359 : vector<16x128xf32>
    %cst_121 = arith.constant 0.000000e+00 : f32
    %361 = vector.broadcast %cst_121 : f32 to vector<16x128xf32>
    %362 = arith.maximumf %360, %361 : vector<16x128xf32>
    %363 = arith.truncf %362 : vector<16x128xf32> to vector<16x128xbf16>
    %c0_122 = arith.constant 0 : index
    %c0_123 = arith.constant 0 : index
    %364 = vector.load %arg8[%c0_122, %c0_123] : memref<128x128xbf16, #tpu.memory_space<vmem>>, vector<128x128xbf16>
    %cst_124 = arith.constant dense<0.000000e+00> : vector<16x128xf32>
    %365 = tpu.matmul %363, %364, %cst_124 {dimension_numbers = #tpu.dot_dimension_numbers<[1], [0], [0], [1], [0, 0, 1, 1], [], []>} : vector<16x128xbf16>, vector<128x128xbf16>, vector<16x128xf32> -> vector<16x128xf32>
    %c0_125 = arith.constant 0 : index
    %c0_126 = arith.constant 0 : index
    %366 = vector.load %arg9[%c0_125, %c0_126] : memref<1x128xf32, #tpu.memory_space<vmem>>, vector<1x128xf32>
    %367 = vector.broadcast %366 : vector<1x128xf32> to vector<16x128xf32>
    %368 = arith.addf %365, %367 : vector<16x128xf32>
    %c0_127 = arith.constant 0 : index
    %c0_128 = arith.constant 0 : index
    %369 = vector.load %arg10[%c0_127, %c0_128] : memref<16x128xf32, #tpu.memory_space<vmem>>, vector<16x128xf32>
    tpu.vector_store %arg10[%c0_127, %c0_128], %368 {strides = array<i32>} : memref<16x128xf32, #tpu.memory_space<vmem>>, vector<16x128xf32>,
    return
  }
}

</mosaic_0001>

<bundles_post_ra>
// kernel: lstm_model_forward.1
= control target key start
LH: loop header
LB: loop body
LE: loop exit
PB: predicated region body
PF: predicated region fallthrough
CT: control target
= control target key end

     0   :  { %18 = vsyncpa [#allocation4], 0  ;;  %s6926_s0 = inlined_call_operand.vmem [shape: bf16[16,128], index: 0, kind: input, shape index: {}]   ;;  %s6927_s1 = inlined_call_operand.hbm [shape: bf16[128,1024], index: 1, kind: input, shape index: {}]   ;;  %s6928_s2 = inlined_call_operand.hbm [shape: bf16[256,1024], index: 2, kind: input, shape index: {}]   ;;  %s6929_s3 = inlined_call_operand.vmem [shape: f32[1,1024], index: 3, kind: input, shape index: {}]   ;;  %s6930_s4 = inlined_call_operand.vmem [shape: f32[2,256], index: 4, kind: input, shape index: {}]   ;;  %s6931_s5 = inlined_call_operand.vmem [shape: f32[2,256], index: 5, kind: input, shape index: {}]   ;;  %s6932_s6 = inlined_call_operand.vmem [shape: bf16[128,128], index: 6, kind: input, shape index: {}]   ;;  %s6933_s7 = inlined_call_operand.vmem [shape: f32[1,128], index: 7, kind: input, shape index: {}]   ;;  %s6934_s8 = inlined_call_operand.vmem [shape: bf16[128,128], index: 8, kind: input, shape index: {}]   ;;  %s6935_s9 = inlined_call_operand.vmem [shape: f32[1,128], index: 9, kind: input, shape index: {}]   ;;  %s6936_s10 = inlined_call_operand.vmem [shape: f32[16,128], index: 10, kind: output, shape index: {0}]   ;;  %s6937_s11 = inlined_call_operand.hbm [shape: f32[2,2,128], index: 11, kind: output, shape index: {1}]   ;;  %s6938_s12 = inlined_call_operand.hbm [shape: f32[2,2,128], index: 12, kind: output, shape index: {2}]  }
   0x1   :  { %19 = vsyncpa [#allocation7], 0 }
   0x2   :  { %20 = vsyncpa [#allocation5], 0 }
   0x3   :  { %21 = vsyncpa [#allocation10], 0  ;;  %s4903_s21 = smov [#allocation3]  }
   0x4   :  { %s29_s22 = sshll.u32 %s4903_s21, 4  ;;  %s30_s22 = int_to_ptr.vmem [resolvable:$true] %s29_s22 }
   0x5   :  { %s4823_s23 = scalar_lea.vmem %s30_s22, 8192  ;;  %p4828_p1 = scmp.lt.s32.totalorder %s30_s22, %s30_s22 }
   0x6   :  { %p4824_p0 = scmp.ne.s32.totalorder %s30_s22, %s4823_s23  ;;  %p4829_p2 = scmp.lt.s32.totalorder %s4823_s23, %s4823_s23 }
   0x8   :  { %p4830_p3 = por %p4829_p2, %p4828_p1 }
   0xa   :  { %p4831_p4 = pnand %p4830_p3, %p4824_p0 }
   0xc   :  { %4834 = shalt.err (!%p4831_p4)
}
   0xd   :  { %s4904_s24 = smov 512   ;;  %s4905_s25 = smov 32  }
   0xe   :  { %35 = dma.hbm_to_vmem [thread:$0]  %s6927_s1, 8192, %s30_s22, [#allocation4], %s4904_s24, %s4904_s24, %s4905_s25  }
   0xf   :  { %s4906_s28 = smov [#allocation6]  }
  0x10   :  { %s41_s29 = sshll.u32 %s4906_s28, 4  ;;  %s42_s29 = int_to_ptr.vmem [resolvable:$true] %s41_s29 }
  0x11   :  { %s4843_s30 = scalar_lea.vmem %s42_s29, 16384  ;;  %p4848_p6 = scmp.lt.s32.totalorder %s42_s29, %s42_s29 }
  0x12   :  { %p4844_p5 = scmp.ne.s32.totalorder %s42_s29, %s4843_s30  ;;  %p4849_p7 = scmp.lt.s32.totalorder %s4843_s30, %s4843_s30 }
  0x14   :  { %p4850_p8 = por %p4849_p7, %p4848_p6 }
  0x16   :  { %p4851_p9 = pnand %p4850_p8, %p4844_p5 }
  0x18   :  { %4854 = shalt.err (!%p4851_p9)
}
  0x19   :  { %47 = dma.hbm_to_vmem [thread:$0]  %s6928_s2, 16384, %s42_s29, [#allocation7], %s4904_s24, %s4904_s24, %s4905_s25  }
  0x1a   :  { %4895 = dma.done.wait [#allocation4], 8192  }
  0x1b   :  { %4896 = vsyncadd [#allocation4], 4294959104 }
  0x1c   :  { %4897 = dma.done.wait [#allocation7], 16384  }
  0x1d   :  { %4898 = vsyncadd [#allocation7], 4294950912  ;;  %v4907_v0 = vmov 0   ;;  %v128_v1 = vld [vmem:[#allocation3 + $0x1c0] sm:$0xff]  ;;  %v129_v3 = vld [vmem:[#allocation3 + $0x1c8] sm:$0xff]  ;;  %vm3919_vm0 = vcmask 1041408  }
  0x1e   :  { %535 = vmatprep.mubr.bf16.mxu0 %v4907_v0  ;;  %578 = vmatprep.mubr.bf16.mxu1 %v4907_v0  ;;  %v132_v2 = vld [vmem:[#allocation3 + $0x1e0] sm:$0xff]  ;;  %v133_v5 = vld [vmem:[#allocation3 + $0x1e8] sm:$0xff]  ;;  %v130_v63 = vld [vmem:[#allocation3 + $0x1d0] sm:$0xff]  ;;  %vm3921_vm1 = vcmask 1043456   ;;  %vm3923_vm2 = vcmask 1045504   ;;  %vm4910_vm3 = vmmov 0  }
  0x1f   :  { %v4254_v4 = vcombine.high %v128_v1, %v132_v2  ;;  %v4253_v6 = vcombine.low %v128_v1, %v132_v2  ;;  %v120_v7 = vld [vmem:[#allocation3 + $0x180] sm:$0xff]  ;;  %v4256_v9 = vcombine.high %v129_v3, %v133_v5  ;;  %v4255_v10 = vcombine.low %v129_v3, %v133_v5  ;;  %v121_v12 = vld [vmem:[#allocation3 + $0x188] sm:$0xff]  ;;  %v134_v1 = vld [vmem:[#allocation3 + $0x1f0] sm:$0xff]  ;;  %s4911_s28 = smov [#allocation8]   ;;  %s4912_s30 = smov [#allocation9]  }
  0x20   :  { %v124_v8 = vld [vmem:[#allocation3 + $0x1a0] sm:$0xff]  ;;  %v125_v13 = vld [vmem:[#allocation3 + $0x1a8] sm:$0xff]  ;;  %v131_v2 = vld [vmem:[#allocation3 + $0x1d8] sm:$0xff]  ;;  %s4165_s29 = sshll.u32 %s4911_s28, 4  ;;  %s4177_s13 = sshll.u32 %s4912_s30, 4  ;;  %s4166_s29 = int_to_ptr.vmem [resolvable:$true] %s4165_s29  ;;  %s4178_s13 = int_to_ptr.vmem [resolvable:$true] %s4177_s13 }
  0x21   :  { %v4246_v11 = vcombine.high %v120_v7, %v124_v8  ;;  %v112_v14 = vld [vmem:[#allocation3 + $0x140] sm:$0xff]  ;;  %503 = vmatprep.subr.bf16.mxu0 %v4254_v4  ;;  %v4248_v15 = vcombine.high %v121_v12, %v125_v13  ;;  %v113_v17 = vld [vmem:[#allocation3 + $0x148] sm:$0xff]  ;;  %546 = vmatprep.subr.bf16.mxu1 %v4256_v9  ;;  %v4245_v19 = vcombine.low %v120_v7, %v124_v8  ;;  %v135_v3 = vld [vmem:[#allocation3 + $0x1f8] sm:$0xff]  ;;  %p4860_p11 = scmp.lt.s32.totalorder %s4166_s29, %s4166_s29 }
  0x22   :  { %v116_v16 = vld [vmem:[#allocation3 + $0x160] sm:$0xff]  ;;  %v117_v18 = vld [vmem:[#allocation3 + $0x168] sm:$0xff]  ;;  %504 = vmatpush1.bf16.msra.mxu0 %v4253_v6  ;;  %547 = vmatpush1.bf16.msra.mxu1 %v4255_v10  ;;  %v4247_v20 = vcombine.low %v121_v12, %v125_v13  ;;  %v4258_v6 = vcombine.high %v130_v63, %v134_v1  ;;  %v4260_v7 = vcombine.high %v131_v2, %v135_v3  ;;  %v122_v8 = vld [vmem:[#allocation3 + $0x190] sm:$0xff] }
  0x23   :  { %505 = vmatprep.subr.bf16.mxu0 %v4246_v11  ;;  %v4238_v21 = vcombine.high %v112_v14, %v116_v16  ;;  %548 = vmatprep.subr.bf16.mxu1 %v4248_v15  ;;  %v4240_v22 = vcombine.high %v113_v17, %v117_v18  ;;  %v104_v23 = vld [vmem:[#allocation3 + $0x100] sm:$0xff]  ;;  %v105_v25 = vld [vmem:[#allocation3 + $0x108] sm:$0xff]  ;;  %v4237_v27 = vcombine.low %v112_v14, %v116_v16  ;;  %v126_v9 = vld [vmem:[#allocation3 + $0x1b0] sm:$0xff] }
  0x24   :  { %v108_v24 = vld [vmem:[#allocation3 + $0x120] sm:$0xff]  ;;  %v109_v26 = vld [vmem:[#allocation3 + $0x128] sm:$0xff]  ;;  %v4239_v28 = vcombine.low %v113_v17, %v117_v18  ;;  %v123_v11 = vld [vmem:[#allocation3 + $0x198] sm:$0xff]  ;;  %v4257_v13 = vcombine.low %v130_v63, %v134_v1  ;;  %v4259_v14 = vcombine.low %v131_v2, %v135_v3  ;;  %v4250_v15 = vcombine.high %v122_v8, %v126_v9 }
  0x25   :  { %v4230_v29 = vcombine.high %v104_v23, %v108_v24  ;;  %v4232_v30 = vcombine.high %v105_v25, %v109_v26  ;;  %v96_v31 = vld [vmem:[#allocation3 + $0xc0] sm:$0xff]  ;;  %v97_v33 = vld [vmem:[#allocation3 + $0xc8] sm:$0xff]  ;;  %v4229_v35 = vcombine.low %v104_v23, %v108_v24  ;;  %v4231_v36 = vcombine.low %v105_v25, %v109_v26  ;;  %v127_v12 = vld [vmem:[#allocation3 + $0x1b8] sm:$0xff] }
  0x26   :  { %506 = vmatpush1.bf16.msra.mxu0 %v4245_v19  ;;  %549 = vmatpush1.bf16.msra.mxu1 %v4247_v20  ;;  %v100_v32 = vld [vmem:[#allocation3 + $0xe0] sm:$0xff]  ;;  %v101_v34 = vld [vmem:[#allocation3 + $0xe8] sm:$0xff]  ;;  %v4252_v16 = vcombine.high %v123_v11, %v127_v12  ;;  %v114_v17 = vld [vmem:[#allocation3 + $0x150] sm:$0xff] }
  0x27   :  { %507 = vmatprep.subr.bf16.mxu0 %v4238_v21  ;;  %550 = vmatprep.subr.bf16.mxu1 %v4240_v22  ;;  %v4222_v37 = vcombine.high %v96_v31, %v100_v32  ;;  %v4224_v38 = vcombine.high %v97_v33, %v101_v34  ;;  %v88_v39 = vld [vmem:[#allocation3 + $0x80] sm:$0xff]  ;;  %v89_v41 = vld [vmem:[#allocation3 + $0x88] sm:$0xff]  ;;  %v4221_v43 = vcombine.low %v96_v31, %v100_v32  ;;  %v118_v18 = vld [vmem:[#allocation3 + $0x170] sm:$0xff] }
  0x28   :  { %v92_v40 = vld [vmem:[#allocation3 + $0xa0] sm:$0xff]  ;;  %v93_v42 = vld [vmem:[#allocation3 + $0xa8] sm:$0xff]  ;;  %v4223_v44 = vcombine.low %v97_v33, %v101_v34  ;;  %v115_v19 = vld [vmem:[#allocation3 + $0x158] sm:$0xff]  ;;  %v4249_v21 = vcombine.low %v122_v8, %v126_v9  ;;  %v4251_v22 = vcombine.low %v123_v11, %v127_v12  ;;  %v4242_v23 = vcombine.high %v114_v17, %v118_v18 }
  0x29   :  { %v4214_v45 = vcombine.high %v88_v39, %v92_v40  ;;  %v4216_v46 = vcombine.high %v89_v41, %v93_v42  ;;  %v80_v47 = vld [vmem:[#allocation3 + $0x40] sm:$0xff]  ;;  %v81_v49 = vld [vmem:[#allocation3 + $0x48] sm:$0xff]  ;;  %v4213_v51 = vcombine.low %v88_v39, %v92_v40  ;;  %v4215_v52 = vcombine.low %v89_v41, %v93_v42  ;;  %v119_v20 = vld [vmem:[#allocation3 + $0x178] sm:$0xff] }
  0x2a   :  { %508 = vmatpush1.bf16.msra.mxu0 %v4237_v27  ;;  %551 = vmatpush1.bf16.msra.mxu1 %v4239_v28  ;;  %v84_v48 = vld [vmem:[#allocation3 + $0x60] sm:$0xff]  ;;  %v85_v50 = vld [vmem:[#allocation3 + $0x68] sm:$0xff]  ;;  %v4244_v24 = vcombine.high %v115_v19, %v119_v20  ;;  %v106_v25 = vld [vmem:[#allocation3 + $0x110] sm:$0xff] }
  0x2b   :  { %509 = vmatprep.subr.bf16.mxu0 %v4230_v29  ;;  %552 = vmatprep.subr.bf16.mxu1 %v4232_v30  ;;  %v4206_v53 = vcombine.high %v80_v47, %v84_v48  ;;  %v4208_v54 = vcombine.high %v81_v49, %v85_v50  ;;  %v72_v55 = vld [vmem:[#allocation3] sm:$0xff]  ;;  %v73_v57 = vld [vmem:[#allocation3 + $0x8] sm:$0xff]  ;;  %v4205_v59 = vcombine.low %v80_v47, %v84_v48  ;;  %v110_v26 = vld [vmem:[#allocation3 + $0x130] sm:$0xff] }
  0x2c   :  { %v76_v56 = vld [vmem:[#allocation3 + $0x20] sm:$0xff]  ;;  %v77_v58 = vld [vmem:[#allocation3 + $0x28] sm:$0xff]  ;;  %v4207_v60 = vcombine.low %v81_v49, %v85_v50  ;;  %v107_v27 = vld [vmem:[#allocation3 + $0x118] sm:$0xff]  ;;  %v4241_v29 = vcombine.low %v114_v17, %v118_v18  ;;  %v4243_v30 = vcombine.low %v115_v19, %v119_v20  ;;  %v4234_v31 = vcombine.high %v106_v25, %v110_v26 }
  0x2d   :  { %v4198_v61 = vcombine.high %v72_v55, %v76_v56  ;;  %v4200_v62 = vcombine.high %v73_v57, %v77_v58  ;;  %v4197_v4 = vcombine.low %v72_v55, %v76_v56  ;;  %v4199_v5 = vcombine.low %v73_v57, %v77_v58  ;;  %v4992_v10 = vld [vmem:[%s6926_s0] sm:$0xff]   ;;  %v111_v28 = vld [vmem:[#allocation3 + $0x138] sm:$0xff]  ;;  %v98_v33 = vld [vmem:[#allocation3 + $0xd0] sm:$0xff] }
  0x2e   :  { %510 = vmatpush1.bf16.msra.mxu0 %v4229_v35  ;;  %553 = vmatpush1.bf16.msra.mxu1 %v4231_v36  ;;  %v4236_v32 = vcombine.high %v107_v27, %v111_v28  ;;  %v102_v34 = vld [vmem:[#allocation3 + $0xf0] sm:$0xff]  ;;  %v99_v35 = vld [vmem:[#allocation3 + $0xd8] sm:$0xff]  ;;  %v947_v1 = vld [vmem:[#allocation6 + $0x1c0] sm:$0xff] }
  0x2f   :  { %511 = vmatprep.subr.bf16.mxu0 %v4222_v37  ;;  %554 = vmatprep.subr.bf16.mxu1 %v4224_v38  ;;  %v103_v36 = vld [vmem:[#allocation3 + $0xf8] sm:$0xff]  ;;  %v4233_v37 = vcombine.low %v106_v25, %v110_v26  ;;  %v4235_v38 = vcombine.low %v107_v27, %v111_v28  ;;  %v4226_v39 = vcombine.high %v98_v33, %v102_v34  ;;  %v90_v40 = vld [vmem:[#allocation3 + $0x90] sm:$0xff]  ;;  %v951_v2 = vld [vmem:[#allocation6 + $0x1e0] sm:$0xff] }
  0x30   :  { %v94_v41 = vld [vmem:[#allocation3 + $0xb0] sm:$0xff]  ;;  %v91_v42 = vld [vmem:[#allocation3 + $0x98] sm:$0xff]  ;;  %v948_v3 = vld [vmem:[#allocation6 + $0x1c8] sm:$0xff]  ;;  %v5003_v8 = vcombine.high %v947_v1, %v951_v2 }
  0x31   :  { %v82_v48 = vld [vmem:[#allocation3 + $0x50] sm:$0xff]  ;;  %v83_v50 = vld [vmem:[#allocation3 + $0x58] sm:$0xff]  ;;  %v939_v11 = vld [vmem:[#allocation6 + $0x180] sm:$0xff] }
  0x32   :  { %512 = vmatpush1.bf16.msra.mxu0 %v4221_v43  ;;  %555 = vmatpush1.bf16.msra.mxu1 %v4223_v44  ;;  %v95_v43 = vld [vmem:[#allocation3 + $0xb8] sm:$0xff]  ;;  %v4225_v44 = vcombine.low %v98_v33, %v102_v34  ;;  %v86_v49 = vld [vmem:[#allocation3 + $0x70] sm:$0xff]  ;;  %7237 = vst [vmem:[#allocation15_spill] sm:$0xff] %v5003_v8  ;;  %v943_v12 = vld [vmem:[#allocation6 + $0x1a0] sm:$0xff] }
  0x33   :  { %513 = vmatprep.subr.bf16.mxu0 %v4214_v45  ;;  %556 = vmatprep.subr.bf16.mxu1 %v4216_v46  ;;  %v4227_v45 = vcombine.low %v99_v35, %v103_v36  ;;  %v4218_v46 = vcombine.high %v90_v40, %v94_v41  ;;  %v4220_v47 = vcombine.high %v91_v42, %v95_v43  ;;  %v74_v56 = vld [vmem:[#allocation3 + $0x10] sm:$0xff]  ;;  %v75_v58 = vld [vmem:[#allocation3 + $0x18] sm:$0xff]  ;;  %v931_v17 = vld [vmem:[#allocation6 + $0x140] sm:$0xff] }
  0x34   :  { %v78_v57 = vld [vmem:[#allocation3 + $0x30] sm:$0xff]  ;;  %v935_v18 = vld [vmem:[#allocation6 + $0x160] sm:$0xff]  ;;  %v5014_v20 = vcombine.high %v939_v11, %v943_v12  ;;  %v5024_v25 = vcombine.low %v939_v11, %v943_v12  ;;  %v1016_v11 = vld [vmem:[#allocation6 + $0x3e8] sm:$0xff] }
  0x35   :  { %v923_v26 = vld [vmem:[#allocation6 + $0x100] sm:$0xff] }
  0x36   :  { %514 = vmatpush1.bf16.msra.mxu0 %v4213_v51  ;;  %557 = vmatpush1.bf16.msra.mxu1 %v4215_v52  ;;  %v87_v51 = vld [vmem:[#allocation3 + $0x78] sm:$0xff]  ;;  %v4217_v52 = vcombine.low %v90_v40, %v94_v41  ;;  %7241 = vst [vmem:[#allocation19_spill] sm:$0xff] %v5014_v20  ;;  %7243 = vst [vmem:[#allocation21_spill] sm:$0xff] %v5024_v25  ;;  %v927_v27 = vld [vmem:[#allocation6 + $0x120] sm:$0xff] }
  0x37   :  { %515 = vmatprep.subr.bf16.mxu0 %v4206_v53  ;;  %558 = vmatprep.subr.bf16.mxu1 %v4208_v54  ;;  %v4219_v53 = vcombine.low %v91_v42, %v95_v43  ;;  %v4210_v54 = vcombine.high %v82_v48, %v86_v49  ;;  %v4212_v55 = vcombine.high %v83_v50, %v87_v51  ;;  %v915_v33 = vld [vmem:[#allocation6 + $0xc0] sm:$0xff] }
  0x38   :  { %v919_v34 = vld [vmem:[#allocation6 + $0xe0] sm:$0xff] }
  0x39   :  { %v5056_v41 = vcombine.high %v915_v33, %v919_v34  ;;  %v907_v43 = vld [vmem:[#allocation6 + $0x80] sm:$0xff] }
  0x3a   :  { %516 = vmatpush1.bf16.msra.mxu0 %v4205_v59  ;;  %559 = vmatpush1.bf16.msra.mxu1 %v4207_v60  ;;  %v79_v59 = vld [vmem:[#allocation3 + $0x38] sm:$0xff]  ;;  %v4209_v60 = vcombine.low %v82_v48, %v86_v49 }
  0x3b   :  { %517 = vmatprep.subr.bf16.mxu0 %v4198_v61  ;;  %560 = vmatprep.subr.bf16.mxu1 %v4200_v62  ;;  %v4211_v61 = vcombine.low %v83_v50, %v87_v51  ;;  %v4202_v62 = vcombine.high %v74_v56, %v78_v57  ;;  %v4204_v63 = vcombine.high %v75_v58, %v79_v59  ;;  %v899_v51 = vld [vmem:[#allocation6 + $0x40] sm:$0xff] }
  0x3c   :  { %7253 = vst [vmem:[#allocation31_spill] sm:$0xff] %v5056_v41 }
  0x3e   :  { %518 = vmatpush1.bf16.msra.mxu0 %v4197_v4  ;;  %561 = vmatpush1.bf16.msra.mxu1 %v4199_v5  ;;  %v952_v4 = vld [vmem:[#allocation6 + $0x1e8] sm:$0xff]  ;;  %v5001_v5 = vld.sshfl [vmem:[%s6930_s4] sm:$0x33 pattern:$0x76325410] }
  0x3f   :  { %589 = vmatprep.subr.bf16.mxu0 %v4258_v6  ;;  %632 = vmatprep.subr.bf16.mxu1 %v4260_v7  ;;  %v4201_v6 = vcombine.low %v74_v56, %v78_v57  ;;  %v4203_v7 = vcombine.low %v75_v58, %v79_v59  ;;  %v5005_v9 = vcombine.high %v948_v3, %v952_v4  ;;  %v891_v59 = vld [vmem:[#allocation6] sm:$0xff] }
  0x40   :  { %v5012_v19 = vcombine.low %v948_v3, %v952_v4  ;;  %v1011_v4 = vld [vmem:[#allocation6 + $0x3c0] sm:$0xff] }
  0x41   :  { %536 = vmatmul.mubr.bf16.vlgmr.msra.gmra.mxu0 %v4992_v10  ;;  %579 = vmatmul.mubr.bf16.vlgmr.msra.gmra.mxu1 %v4992_v10  ;;  %7238 = vst [vmem:[#allocation16_spill] sm:$0xff] %v5005_v9 }
  0x42   :  { %590 = vmatpush1.bf16.msra.mxu0 %v4257_v13  ;;  %633 = vmatpush1.bf16.msra.mxu1 %v4259_v14  ;;  %v886_v13 = vcombine.high %v5001_v5, %v5001_v5  ;;  %v940_v14 = vld [vmem:[#allocation6 + $0x188] sm:$0xff]  ;;  %7240 = vst [vmem:[#allocation18_spill] sm:$0xff] %v5012_v19 }
  0x43   :  { %591 = vmatprep.subr.bf16.mxu0 %v4250_v15  ;;  %634 = vmatprep.subr.bf16.mxu1 %v4252_v16  ;;  %v944_v15 = vld [vmem:[#allocation6 + $0x1a8] sm:$0xff]  ;;  %v5009_v16 = vcombine.low %v947_v1, %v951_v2 }
  0x44   :  { %621 = vmatprep.mubr.bf16.mxu0 %v4907_v0  ;;  %664 = vmatprep.mubr.bf16.mxu1 %v4907_v0  ;;  %v4228_v0 = vcombine.high %v99_v35, %v103_v36  ;;  %v5028_v28 = vcombine.low %v940_v14, %v944_v15  ;;  %v5044_v36 = vcombine.high %v923_v26, %v927_v27 }
  0x45   :  { %7239 = vst [vmem:[#allocation17_spill] sm:$0xff] %v5009_v16 }
  0x46   :  { %592 = vmatpush1.bf16.msra.mxu0 %v4249_v21  ;;  %635 = vmatpush1.bf16.msra.mxu1 %v4251_v22  ;;  %v932_v21 = vld [vmem:[#allocation6 + $0x148] sm:$0xff]  ;;  %7244 = vst [vmem:[#allocation22_spill] sm:$0xff] %v5028_v28  ;;  %7249 = vst [vmem:[#allocation27_spill] sm:$0xff] %v5044_v36 }
  0x47   :  { %593 = vmatprep.subr.bf16.mxu0 %v4242_v23  ;;  %636 = vmatprep.subr.bf16.mxu1 %v4244_v24  ;;  %v936_v22 = vld [vmem:[#allocation6 + $0x168] sm:$0xff]  ;;  %v5017_v23 = vcombine.high %v940_v14, %v944_v15  ;;  %v5019_v24 = vpack.c.bf16 %v886_v13, %v886_v13 }
  0x48   :  { %v5042_v35 = vcombine.low %v932_v21, %v936_v22 }
  0x49   :  { %7242 = vst [vmem:[#allocation20_spill] sm:$0xff] %v5017_v23 }
  0x4a   :  { %594 = vmatpush1.bf16.msra.mxu0 %v4241_v29  ;;  %637 = vmatpush1.bf16.msra.mxu1 %v4243_v30  ;;  %v5030_v29 = vcombine.high %v931_v17, %v935_v18  ;;  %v924_v30 = vld [vmem:[#allocation6 + $0x108] sm:$0xff]  ;;  %7248 = vst [vmem:[#allocation26_spill] sm:$0xff] %v5042_v35 }
  0x4b   :  { %595 = vmatprep.subr.bf16.mxu0 %v4234_v31  ;;  %638 = vmatprep.subr.bf16.mxu1 %v4236_v32  ;;  %v5033_v31 = vcombine.high %v932_v21, %v936_v22  ;;  %v5038_v32 = vcombine.low %v931_v17, %v935_v18  ;;  %v1003_v17 = vld [vmem:[#allocation6 + $0x380] sm:$0xff]  ;;  %v1004_v21 = vld [vmem:[#allocation6 + $0x388] sm:$0xff] }
  0x4c   :  { %7245 = vst [vmem:[#allocation23_spill] sm:$0xff] %v5030_v29  ;;  %v1007_v18 = vld [vmem:[#allocation6 + $0x3a0] sm:$0xff]  ;;  %v1008_v22 = vld [vmem:[#allocation6 + $0x3a8] sm:$0xff] }
  0x4d   :  { %7246 = vst [vmem:[#allocation24_spill] sm:$0xff] %v5033_v31  ;;  %7247 = vst [vmem:[#allocation25_spill] sm:$0xff] %v5038_v32 }
  0x4e   :  { %596 = vmatpush1.bf16.msra.mxu0 %v4233_v37  ;;  %639 = vmatpush1.bf16.msra.mxu1 %v4235_v38  ;;  %v916_v37 = vld [vmem:[#allocation6 + $0xc8] sm:$0xff] }
  0x4f   :  { %597 = vmatprep.subr.bf16.mxu0 %v4226_v39  ;;  %640 = vmatprep.subr.bf16.mxu1 %v4228_v0  ;;  %v920_v38 = vld [vmem:[#allocation6 + $0xe8] sm:$0xff]  ;;  %v5050_v0 = vcombine.low %v923_v26, %v927_v27 }
  0x50   :  { %v5059_v42 = vcombine.high %v916_v37, %v920_v38  ;;  %v5066_v48 = vcombine.low %v916_v37, %v920_v38  ;;  %v996_v37 = vld [vmem:[#allocation6 + $0x348] sm:$0xff] }
  0x51   :  { %7251 = vst [vmem:[#allocation29_spill] sm:$0xff] %v5050_v0  ;;  %v1000_v38 = vld [vmem:[#allocation6 + $0x368] sm:$0xff] }
  0x52   :  { %598 = vmatpush1.bf16.msra.mxu0 %v4225_v44  ;;  %641 = vmatpush1.bf16.msra.mxu1 %v4227_v45  ;;  %7254 = vst [vmem:[#allocation32_spill] sm:$0xff] %v5059_v42  ;;  %v911_v44 = vld [vmem:[#allocation6 + $0xa0] sm:$0xff]  ;;  %v908_v45 = vld [vmem:[#allocation6 + $0x88] sm:$0xff]  ;;  %7256 = vst [vmem:[#allocation34_spill] sm:$0xff] %v5066_v48 }
  0x53   :  { %599 = vmatprep.subr.bf16.mxu0 %v4218_v46  ;;  %642 = vmatprep.subr.bf16.mxu1 %v4220_v47  ;;  %v912_v46 = vld [vmem:[#allocation6 + $0xa8] sm:$0xff]  ;;  %v5062_v47 = vcombine.low %v915_v33, %v919_v34  ;;  %v5068_v49 = vcombine.high %v907_v43, %v911_v44  ;;  %v995_v33 = vld [vmem:[#allocation6 + $0x340] sm:$0xff] }
  0x54   :  { %v5071_v50 = vcombine.high %v908_v45, %v912_v46  ;;  %v5078_v56 = vcombine.low %v908_v45, %v912_v46  ;;  %v999_v34 = vld [vmem:[#allocation6 + $0x360] sm:$0xff]  ;;  %v5131_v46 = vcombine.high %v996_v37, %v1000_v38 }
  0x55   :  { %7255 = vst [vmem:[#allocation33_spill] sm:$0xff] %v5062_v47  ;;  %7257 = vst [vmem:[#allocation35_spill] sm:$0xff] %v5068_v49  ;;  %v5128_v45 = vcombine.high %v995_v33, %v999_v34 }
  0x56   :  { %600 = vmatpush1.bf16.msra.mxu0 %v4217_v52  ;;  %643 = vmatpush1.bf16.msra.mxu1 %v4219_v53  ;;  %7258 = vst [vmem:[#allocation36_spill] sm:$0xff] %v5071_v50  ;;  %v903_v52 = vld [vmem:[#allocation6 + $0x60] sm:$0xff]  ;;  %v900_v53 = vld [vmem:[#allocation6 + $0x48] sm:$0xff]  ;;  %7260 = vst [vmem:[#allocation38_spill] sm:$0xff] %v5078_v56 }
  0x57   :  { %601 = vmatprep.subr.bf16.mxu0 %v4210_v54  ;;  %644 = vmatprep.subr.bf16.mxu1 %v4212_v55  ;;  %v904_v54 = vld [vmem:[#allocation6 + $0x68] sm:$0xff]  ;;  %v5074_v55 = vcombine.low %v907_v43, %v911_v44  ;;  %v5080_v57 = vcombine.high %v899_v51, %v903_v52  ;;  %v5122_v43 = vcombine.low %v1003_v17, %v1007_v18 }
  0x58   :  { %v5083_v58 = vcombine.high %v900_v53, %v904_v54  ;;  %v5090_v1 = vcombine.low %v900_v53, %v904_v54  ;;  %v5126_v44 = vcombine.low %v1004_v21, %v1008_v22  ;;  %7277 = vst [vmem:[#allocation55_spill] sm:$0xff] %v5128_v45  ;;  %7278 = vst [vmem:[#allocation56_spill] sm:$0xff] %v5131_v46  ;;  %v988_v53 = vld [vmem:[#allocation6 + $0x308] sm:$0xff] }
  0x59   :  { %7259 = vst [vmem:[#allocation37_spill] sm:$0xff] %v5074_v55  ;;  %7261 = vst [vmem:[#allocation39_spill] sm:$0xff] %v5080_v57  ;;  %v992_v54 = vld [vmem:[#allocation6 + $0x328] sm:$0xff] }
  0x5a   :  { %602 = vmatpush1.bf16.msra.mxu0 %v4209_v60  ;;  %645 = vmatpush1.bf16.msra.mxu1 %v4211_v61  ;;  %7262 = vst [vmem:[#allocation40_spill] sm:$0xff] %v5083_v58  ;;  %v895_v60 = vld [vmem:[#allocation6 + $0x20] sm:$0xff]  ;;  %v892_v61 = vld [vmem:[#allocation6 + $0x8] sm:$0xff]  ;;  %7264 = vst [vmem:[#allocation42_spill] sm:$0xff] %v5090_v1 }
  0x5b   :  { %603 = vmatprep.subr.bf16.mxu0 %v4202_v62  ;;  %646 = vmatprep.subr.bf16.mxu1 %v4204_v63  ;;  %v896_v62 = vld [vmem:[#allocation6 + $0x28] sm:$0xff]  ;;  %v5086_v63 = vcombine.low %v899_v51, %v903_v52  ;;  %v5092_v2 = vcombine.high %v891_v59, %v895_v60  ;;  %v5098_v12 = vcombine.low %v891_v59, %v895_v60  ;;  %v987_v51 = vld [vmem:[#allocation6 + $0x300] sm:$0xff] }
  0x5c   :  { %v5095_v3 = vcombine.high %v892_v61, %v896_v62  ;;  %v5102_v13 = vcombine.low %v892_v61, %v896_v62  ;;  %7275 = vst [vmem:[#allocation53_spill] sm:$0xff] %v5122_v43  ;;  %7276 = vst [vmem:[#allocation54_spill] sm:$0xff] %v5126_v44  ;;  %v991_v52 = vld [vmem:[#allocation6 + $0x320] sm:$0xff]  ;;  %v5134_v59 = vcombine.low %v995_v33, %v999_v34 }
  0x5d   :  { %7263 = vst [vmem:[#allocation41_spill] sm:$0xff] %v5086_v63  ;;  %7265 = vst [vmem:[#allocation43_spill] sm:$0xff] %v5092_v2  ;;  %v5138_v60 = vcombine.low %v996_v37, %v1000_v38  ;;  %v5140_v61 = vcombine.high %v987_v51, %v991_v52  ;;  %v5143_v62 = vcombine.high %v988_v53, %v992_v54  ;;  %v971_v33 = vld [vmem:[#allocation6 + $0x280] sm:$0xff]  ;;  %v972_v37 = vld [vmem:[#allocation6 + $0x288] sm:$0xff] }
  0x5e   :  { %604 = vmatpush1.bf16.msra.mxu0 %v4201_v6  ;;  %647 = vmatpush1.bf16.msra.mxu1 %v4203_v7  ;;  %7266 = vst [vmem:[#allocation44_spill] sm:$0xff] %v5095_v3  ;;  %v1015_v6 = vld [vmem:[#allocation6 + $0x3e0] sm:$0xff]  ;;  %v1012_v7 = vld [vmem:[#allocation6 + $0x3c8] sm:$0xff]  ;;  %7267 = vst [vmem:[#allocation45_spill] sm:$0xff] %v5098_v12 }
  0x5f   :  { %1695 = vmatprep.subr.bf16.mxu0 %v5003_v8  ;;  %1735 = vmatprep.subr.bf16.mxu1 %v5005_v9  ;;  %7268 = vst [vmem:[#allocation46_spill] sm:$0xff] %v5102_v13  ;;  %v5104_v14 = vcombine.high %v1011_v4, %v1015_v6  ;;  %v5107_v15 = vcombine.high %v1012_v7, %v1016_v11  ;;  %7279 = vst [vmem:[#allocation57_spill] sm:$0xff] %v5134_v59  ;;  %v975_v34 = vld [vmem:[#allocation6 + $0x2a0] sm:$0xff]  ;;  %v976_v38 = vld [vmem:[#allocation6 + $0x2a8] sm:$0xff] }
  0x60   :  { %v5110_v26 = vcombine.low %v1011_v4, %v1015_v6  ;;  %v5114_v27 = vcombine.low %v1012_v7, %v1016_v11  ;;  %7280 = vst [vmem:[#allocation58_spill] sm:$0xff] %v5138_v60  ;;  %7281 = vst [vmem:[#allocation59_spill] sm:$0xff] %v5140_v61  ;;  %v979_v4 = vld [vmem:[#allocation6 + $0x2c0] sm:$0xff]  ;;  %v980_v7 = vld [vmem:[#allocation6 + $0x2c8] sm:$0xff] }
  0x61   :  { %622 = vmatmul.mubr.bf16.vlgmr.msra.gmra.mxu0 %v4992_v10  ;;  %665 = vmatmul.mubr.bf16.vlgmr.msra.gmra.mxu1 %v4992_v10  ;;  %v928_v10 = vld [vmem:[#allocation6 + $0x128] sm:$0xff]  ;;  %7269 = vst [vmem:[#allocation47_spill] sm:$0xff] %v5104_v14  ;;  %7270 = vst [vmem:[#allocation48_spill] sm:$0xff] %v5107_v15  ;;  %v983_v6 = vld [vmem:[#allocation6 + $0x2e0] sm:$0xff] }
  0x62   :  { %1696 = vmatpush1.bf16.msra.mxu0 %v5009_v16  ;;  %1736 = vmatpush1.bf16.msra.mxu1 %v5012_v19  ;;  %v5047_v39 = vcombine.high %v924_v30, %v928_v10  ;;  %v5054_v40 = vcombine.low %v924_v30, %v928_v10  ;;  %7271 = vst [vmem:[#allocation49_spill] sm:$0xff] %v5110_v26  ;;  %7272 = vst [vmem:[#allocation50_spill] sm:$0xff] %v5114_v27  ;;  %v984_v11 = vld [vmem:[#allocation6 + $0x2e8] sm:$0xff] }
  0x63   :  { %1697 = vmatprep.subr.bf16.mxu0 %v5014_v20  ;;  %1737 = vmatprep.subr.bf16.mxu1 %v5017_v23  ;;  %v5116_v30 = vcombine.high %v1003_v17, %v1007_v18  ;;  %v5119_v10 = vcombine.high %v1004_v21, %v1008_v22  ;;  %7282 = vst [vmem:[#allocation60_spill] sm:$0xff] %v5143_v62 }
  0x64   :  { %1727 = vmatprep.mubr.bf16.mxu0 %v5019_v24  ;;  %1767 = vmatprep.mubr.bf16.mxu1 %v5019_v24  ;;  %7250 = vst [vmem:[#allocation28_spill] sm:$0xff] %v5047_v39  ;;  %7252 = vst [vmem:[#allocation30_spill] sm:$0xff] %v5054_v40  ;;  %v5146_v17 = vcombine.low %v987_v51, %v991_v52  ;;  %v5150_v18 = vcombine.low %v988_v53, %v992_v54 }
  0x65   :  { %7273 = vst [vmem:[#allocation51_spill] sm:$0xff] %v5116_v30  ;;  %7274 = vst [vmem:[#allocation52_spill] sm:$0xff] %v5119_v10  ;;  %v5152_v21 = vcombine.high %v979_v4, %v983_v6  ;;  %v5155_v22 = vcombine.high %v980_v7, %v984_v11  ;;  %v5158_v51 = vcombine.low %v979_v4, %v983_v6 }
  0x66   :  { %1698 = vmatpush1.bf16.msra.mxu0 %v5024_v25  ;;  %1738 = vmatpush1.bf16.msra.mxu1 %v5028_v28  ;;  %7283 = vst [vmem:[#allocation61_spill] sm:$0xff] %v5146_v17  ;;  %7284 = vst [vmem:[#allocation62_spill] sm:$0xff] %v5150_v18  ;;  %v5162_v52 = vcombine.low %v980_v7, %v984_v11  ;;  %v5164_v53 = vcombine.high %v971_v33, %v975_v34 }
  0x67   :  { %1699 = vmatprep.subr.bf16.mxu0 %v5030_v29  ;;  %1739 = vmatprep.subr.bf16.mxu1 %v5033_v31  ;;  %7285 = vst [vmem:[#allocation63_spill] sm:$0xff] %v5152_v21  ;;  %7286 = vst [vmem:[#allocation64_spill] sm:$0xff] %v5155_v22  ;;  %v5167_v54 = vcombine.high %v972_v37, %v976_v38  ;;  %v5170_v4 = vcombine.low %v971_v33, %v975_v34 }
  0x68   :  { %7287 = vst [vmem:[#allocation65_spill] sm:$0xff] %v5158_v51  ;;  %7288 = vst [vmem:[#allocation66_spill] sm:$0xff] %v5162_v52  ;;  %v5174_v6 = vcombine.low %v972_v37, %v976_v38 }
  0x69   :  { %7289 = vst [vmem:[#allocation67_spill] sm:$0xff] %v5164_v53  ;;  %7290 = vst [vmem:[#allocation68_spill] sm:$0xff] %v5167_v54 }
  0x6a   :  { %1700 = vmatpush1.bf16.msra.mxu0 %v5038_v32  ;;  %1740 = vmatpush1.bf16.msra.mxu1 %v5042_v35  ;;  %7291 = vst [vmem:[#allocation69_spill] sm:$0xff] %v5170_v4  ;;  %7292 = vst [vmem:[#allocation70_spill] sm:$0xff] %v5174_v6 }
  0x6b   :  { %1701 = vmatprep.subr.bf16.mxu0 %v5044_v36  ;;  %1741 = vmatprep.subr.bf16.mxu1 %v5047_v39 }
  0x6e   :  { %1702 = vmatpush1.bf16.msra.mxu0 %v5050_v0  ;;  %1742 = vmatpush1.bf16.msra.mxu1 %v5054_v40 }
  0x6f   :  { %1703 = vmatprep.subr.bf16.mxu0 %v5056_v41  ;;  %1743 = vmatprep.subr.bf16.mxu1 %v5059_v42 }
  0x72   :  { %1704 = vmatpush1.bf16.msra.mxu0 %v5062_v47  ;;  %1744 = vmatpush1.bf16.msra.mxu1 %v5066_v48 }
  0x73   :  { %1705 = vmatprep.subr.bf16.mxu0 %v5068_v49  ;;  %1745 = vmatprep.subr.bf16.mxu1 %v5071_v50 }
  0x76   :  { %1706 = vmatpush1.bf16.msra.mxu0 %v5074_v55  ;;  %1746 = vmatpush1.bf16.msra.mxu1 %v5078_v56 }
  0x77   :  { %1707 = vmatprep.subr.bf16.mxu0 %v5080_v57  ;;  %1747 = vmatprep.subr.bf16.mxu1 %v5083_v58 }
  0x7a   :  { %1708 = vmatpush1.bf16.msra.mxu0 %v5086_v63  ;;  %1748 = vmatpush1.bf16.msra.mxu1 %v5090_v1 }
  0x7b   :  { %1709 = vmatprep.subr.bf16.mxu0 %v5092_v2  ;;  %1749 = vmatprep.subr.bf16.mxu1 %v5095_v3 }
  0x7e   :  { %1710 = vmatpush1.bf16.msra.mxu0 %v5098_v12  ;;  %1750 = vmatpush1.bf16.msra.mxu1 %v5102_v13 }
  0x7f   :  { %1711 = vmatprep.subr.bf16.mxu0 %v5104_v14  ;;  %1751 = vmatprep.subr.bf16.mxu1 %v5107_v15 }
  0x82   :  { %1712 = vmatpush2.bf16.msra.mxu0 %v5110_v26  ;;  %1752 = vmatpush2.bf16.msra.mxu1 %v5114_v27 }
  0x83   :  { %1713 = vmatprep.subr.bf16.mxu0 %v5116_v30  ;;  %1753 = vmatprep.subr.bf16.mxu1 %v5119_v10 }
  0x86   :  { %1714 = vmatpush2.bf16.msra.mxu0 %v5122_v43  ;;  %1754 = vmatpush2.bf16.msra.mxu1 %v5126_v44 }
  0x87   :  { %1715 = vmatprep.subr.bf16.mxu0 %v5128_v45  ;;  %1755 = vmatprep.subr.bf16.mxu1 %v5131_v46 }
  0x8a   :  { %1716 = vmatpush2.bf16.msra.mxu0 %v5134_v59  ;;  %1756 = vmatpush2.bf16.msra.mxu1 %v5138_v60  ;;  %v964_v60 = vld [vmem:[#allocation6 + $0x248] sm:$0xff] }
  0x8b   :  { %1717 = vmatprep.subr.bf16.mxu0 %v5140_v61  ;;  %1757 = vmatprep.subr.bf16.mxu1 %v5143_v62  ;;  %v963_v62 = vld [vmem:[#allocation6 + $0x240] sm:$0xff]  ;;  %v968_v59 = vld [vmem:[#allocation6 + $0x268] sm:$0xff] }
  0x8c   :  { %v967_v61 = vld [vmem:[#allocation6 + $0x260] sm:$0xff]  ;;  %v5179_v11 = vcombine.high %v964_v60, %v968_v59  ;;  %v5186_v34 = vcombine.low %v964_v60, %v968_v59 }
  0x8d   :  { %v5176_v7 = vcombine.high %v963_v62, %v967_v61  ;;  %v5182_v33 = vcombine.low %v963_v62, %v967_v61 }
  0x8e   :  { %1718 = vmatpush2.bf16.msra.mxu0 %v5146_v17  ;;  %1758 = vmatpush2.bf16.msra.mxu1 %v5150_v18  ;;  %7294 = vst [vmem:[#allocation72_spill] sm:$0xff] %v5179_v11  ;;  %v956_v18 = vld [vmem:[#allocation6 + $0x208] sm:$0xff]  ;;  %7296 = vst [vmem:[#allocation74_spill] sm:$0xff] %v5186_v34 }
  0x8f   :  { %1719 = vmatprep.subr.bf16.mxu0 %v5152_v21  ;;  %1759 = vmatprep.subr.bf16.mxu1 %v5155_v22  ;;  %7293 = vst [vmem:[#allocation71_spill] sm:$0xff] %v5176_v7  ;;  %v955_v22 = vld [vmem:[#allocation6 + $0x200] sm:$0xff]  ;;  %v960_v17 = vld [vmem:[#allocation6 + $0x228] sm:$0xff]  ;;  %7295 = vst [vmem:[#allocation73_spill] sm:$0xff] %v5182_v33 }
  0x90   :  { %v959_v21 = vld [vmem:[#allocation6 + $0x220] sm:$0xff]  ;;  %v5191_v38 = vcombine.high %v956_v18, %v960_v17  ;;  %v5198_v59 = vcombine.low %v956_v18, %v960_v17 }
  0x91   :  { %v5188_v37 = vcombine.high %v955_v22, %v959_v21  ;;  %v5194_v61 = vcombine.low %v955_v22, %v959_v21  ;;  %v942_v21 = vld [vmem:[#allocation6 + $0x198] sm:$0xff] }
  0x92   :  { %1720 = vmatpush2.bf16.msra.mxu0 %v5158_v51  ;;  %1760 = vmatpush2.bf16.msra.mxu1 %v5162_v52  ;;  %7298 = vst [vmem:[#allocation76_spill] sm:$0xff] %v5191_v38  ;;  %v950_v52 = vld [vmem:[#allocation6 + $0x1d8] sm:$0xff]  ;;  %7300 = vst [vmem:[#allocation78_spill] sm:$0xff] %v5198_v59 }
  0x93   :  { %1721 = vmatprep.subr.bf16.mxu0 %v5164_v53  ;;  %1761 = vmatprep.subr.bf16.mxu1 %v5167_v54  ;;  %7297 = vst [vmem:[#allocation75_spill] sm:$0xff] %v5188_v37  ;;  %v949_v54 = vld [vmem:[#allocation6 + $0x1d0] sm:$0xff]  ;;  %v954_v51 = vld [vmem:[#allocation6 + $0x1f8] sm:$0xff]  ;;  %7299 = vst [vmem:[#allocation77_spill] sm:$0xff] %v5194_v61 }
  0x94   :  { %v953_v53 = vld [vmem:[#allocation6 + $0x1f0] sm:$0xff]  ;;  %v5203_v62 = vcombine.high %v950_v52, %v954_v51  ;;  %v946_v22 = vld [vmem:[#allocation6 + $0x1b8] sm:$0xff]  ;;  %v5214_v17 = vcombine.low %v950_v52, %v954_v51 }
  0x95   :  { %v5200_v60 = vcombine.high %v949_v54, %v953_v53  ;;  %v5228_v51 = vcombine.low %v942_v21, %v946_v22 }
  0x96   :  { %1722 = vmatpush2.bf16.msra.mxu0 %v5170_v4  ;;  %1762 = vmatpush2.bf16.msra.mxu1 %v5174_v6  ;;  %7302 = vst [vmem:[#allocation80_spill] sm:$0xff] %v5203_v62  ;;  %v5207_v6 = vpack.c.bf16 %v5001_v5, %v5001_v5  ;;  %7304 = vst [vmem:[#allocation82_spill] sm:$0xff] %v5214_v17  ;;  %v933_v5 = vld [vmem:[#allocation6 + $0x150] sm:$0xff]  ;;  %v922_v4 = vld [vmem:[#allocation6 + $0xf8] sm:$0xff] }
  0x97   :  { %1723 = vmatprep.subr.bf16.mxu0 %v5176_v7  ;;  %1763 = vmatprep.subr.bf16.mxu1 %v5179_v11  ;;  %7301 = vst [vmem:[#allocation79_spill] sm:$0xff] %v5200_v60  ;;  %v941_v11 = vld [vmem:[#allocation6 + $0x190] sm:$0xff]  ;;  %7308 = vst [vmem:[#allocation86_spill] sm:$0xff] %v5228_v51 }
  0x98   :  { %v945_v7 = vld [vmem:[#allocation6 + $0x1b0] sm:$0xff] }
  0x99   :  { %v5216_v18 = vcombine.high %v941_v11, %v945_v7 }
  0x9a   :  { %1724 = vmatpush2.bf16.msra.mxu0 %v5182_v33  ;;  %1764 = vmatpush2.bf16.msra.mxu1 %v5186_v34  ;;  %v5210_v34 = vcombine.low %v949_v54, %v953_v53  ;;  %v934_v33 = vld [vmem:[#allocation6 + $0x158] sm:$0xff]  ;;  %v5224_v53 = vcombine.low %v941_v11, %v945_v7 }
  0x9b   :  { %1725 = vmatprep.subr.bf16.mxu0 %v5188_v37  ;;  %1765 = vmatprep.subr.bf16.mxu1 %v5191_v38  ;;  %7305 = vst [vmem:[#allocation83_spill] sm:$0xff] %v5216_v18  ;;  %v5219_v38 = vcombine.high %v942_v21, %v946_v22  ;;  %v937_v37 = vld [vmem:[#allocation6 + $0x170] sm:$0xff] }
  0x9c   :  { %7303 = vst [vmem:[#allocation81_spill] sm:$0xff] %v5210_v34  ;;  %7307 = vst [vmem:[#allocation85_spill] sm:$0xff] %v5224_v53  ;;  %v5230_v52 = vcombine.high %v933_v5, %v937_v37  ;;  %v5238_v7 = vcombine.low %v933_v5, %v937_v37 }
  0x9d   :  { %7306 = vst [vmem:[#allocation84_spill] sm:$0xff] %v5219_v38 }
  0x9e   :  { %1726 = vmatpush2.bf16.msra.mxu0 %v5194_v61  ;;  %1766 = vmatpush2.bf16.msra.mxu1 %v5198_v59  ;;  %v938_v61 = vld [vmem:[#allocation6 + $0x178] sm:$0xff]  ;;  %7309 = vst [vmem:[#allocation87_spill] sm:$0xff] %v5230_v52  ;;  %7311 = vst [vmem:[#allocation89_spill] sm:$0xff] %v5238_v7 }
  0x9f   :  { %1775 = vmatprep.subr.bf16.mxu0 %v5200_v60  ;;  %1815 = vmatprep.subr.bf16.mxu1 %v5203_v62  ;;  %v5233_v54 = vcombine.high %v934_v33, %v938_v61  ;;  %v925_v62 = vld [vmem:[#allocation6 + $0x110] sm:$0xff]  ;;  %v926_v59 = vld [vmem:[#allocation6 + $0x118] sm:$0xff]  ;;  %v5242_v11 = vcombine.low %v934_v33, %v938_v61 }
  0xa0   :  { %v929_v60 = vld [vmem:[#allocation6 + $0x130] sm:$0xff] }
  0xa1   :  { %1728 = vmatmul.mubr.bf16.vlgmr.msra.gmra.mxu0 %v5207_v6  ;;  %1768 = vmatmul.mubr.bf16.vlgmr.msra.gmra.mxu1 %v5207_v6  ;;  %7310 = vst [vmem:[#allocation88_spill] sm:$0xff] %v5233_v54  ;;  %7312 = vst [vmem:[#allocation90_spill] sm:$0xff] %v5242_v11  ;;  %v5244_v21 = vcombine.high %v925_v62, %v929_v60  ;;  %v5250_v37 = vcombine.low %v925_v62, %v929_v60 }
  0xa2   :  { %1776 = vmatpush1.bf16.msra.mxu0 %v5210_v34  ;;  %1816 = vmatpush1.bf16.msra.mxu1 %v5214_v17  ;;  %v930_v34 = vld [vmem:[#allocation6 + $0x138] sm:$0xff] }
  0xa3   :  { %1777 = vmatprep.subr.bf16.mxu0 %v5216_v18  ;;  %1817 = vmatprep.subr.bf16.mxu1 %v5219_v38  ;;  %7313 = vst [vmem:[#allocation91_spill] sm:$0xff] %v5244_v21  ;;  %v5247_v22 = vcombine.high %v926_v59, %v930_v34  ;;  %v917_v38 = vld [vmem:[#allocation6 + $0xd0] sm:$0xff]  ;;  %v918_v17 = vld [vmem:[#allocation6 + $0xd8] sm:$0xff]  ;;  %7315 = vst [vmem:[#allocation93_spill] sm:$0xff] %v5250_v37  ;;  %v5254_v33 = vcombine.low %v926_v59, %v930_v34 }
  0xa4   :  { %1807 = vmatprep.mubr.bf16.mxu0 %v5019_v24  ;;  %1847 = vmatprep.mubr.bf16.mxu1 %v5019_v24  ;;  %v921_v18 = vld [vmem:[#allocation6 + $0xf0] sm:$0xff]  ;;  %v5259_v5 = vcombine.high %v918_v17, %v922_v4  ;;  %v5266_v34 = vcombine.low %v918_v17, %v922_v4 }
  0xa5   :  { %7314 = vst [vmem:[#allocation92_spill] sm:$0xff] %v5247_v22  ;;  %7316 = vst [vmem:[#allocation94_spill] sm:$0xff] %v5254_v33  ;;  %v5256_v61 = vcombine.high %v917_v38, %v921_v18  ;;  %v5262_v60 = vcombine.low %v917_v38, %v921_v18 }
  0xa6   :  { %1778 = vmatpush1.bf16.msra.mxu0 %v5224_v53  ;;  %1818 = vmatpush1.bf16.msra.mxu1 %v5228_v51  ;;  %7318 = vst [vmem:[#allocation96_spill] sm:$0xff] %v5259_v5  ;;  %v910_v51 = vld [vmem:[#allocation6 + $0x98] sm:$0xff]  ;;  %7320 = vst [vmem:[#allocation98_spill] sm:$0xff] %v5266_v34 }
  0xa7   :  { %1779 = vmatprep.subr.bf16.mxu0 %v5230_v52  ;;  %1819 = vmatprep.subr.bf16.mxu1 %v5233_v54  ;;  %7317 = vst [vmem:[#allocation95_spill] sm:$0xff] %v5256_v61  ;;  %v909_v54 = vld [vmem:[#allocation6 + $0x90] sm:$0xff]  ;;  %v914_v53 = vld [vmem:[#allocation6 + $0xb8] sm:$0xff]  ;;  %7319 = vst [vmem:[#allocation97_spill] sm:$0xff] %v5262_v60 }
  0xa8   :  { %v913_v52 = vld [vmem:[#allocation6 + $0xb0] sm:$0xff]  ;;  %v5271_v62 = vcombine.high %v910_v51, %v914_v53  ;;  %v5278_v4 = vcombine.low %v910_v51, %v914_v53 }
  0xa9   :  { %v5268_v59 = vcombine.high %v909_v54, %v913_v52  ;;  %v5274_v38 = vcombine.low %v909_v54, %v913_v52 }
  0xaa   :  { %1780 = vmatpush1.bf16.msra.mxu0 %v5238_v7  ;;  %1820 = vmatpush1.bf16.msra.mxu1 %v5242_v11  ;;  %7322 = vst [vmem:[#allocation100_spill] sm:$0xff] %v5271_v62  ;;  %v902_v11 = vld [vmem:[#allocation6 + $0x58] sm:$0xff]  ;;  %7324 = vst [vmem:[#allocation102_spill] sm:$0xff] %v5278_v4 }
  0xab   :  { %1781 = vmatprep.subr.bf16.mxu0 %v5244_v21  ;;  %1821 = vmatprep.subr.bf16.mxu1 %v5247_v22  ;;  %7321 = vst [vmem:[#allocation99_spill] sm:$0xff] %v5268_v59  ;;  %v901_v22 = vld [vmem:[#allocation6 + $0x50] sm:$0xff]  ;;  %v906_v7 = vld [vmem:[#allocation6 + $0x78] sm:$0xff]  ;;  %7323 = vst [vmem:[#allocation101_spill] sm:$0xff] %v5274_v38 }
  0xac   :  { %v905_v21 = vld [vmem:[#allocation6 + $0x70] sm:$0xff]  ;;  %v5283_v18 = vcombine.high %v902_v11, %v906_v7  ;;  %v5290_v53 = vcombine.low %v902_v11, %v906_v7 }
  0xad   :  { %v5280_v17 = vcombine.high %v901_v22, %v905_v21  ;;  %v5286_v52 = vcombine.low %v901_v22, %v905_v21 }
  0xae   :  { %1782 = vmatpush1.bf16.msra.mxu0 %v5250_v37  ;;  %1822 = vmatpush1.bf16.msra.mxu1 %v5254_v33  ;;  %7326 = vst [vmem:[#allocation104_spill] sm:$0xff] %v5283_v18  ;;  %v894_v33 = vld [vmem:[#allocation6 + $0x18] sm:$0xff]  ;;  %7328 = vst [vmem:[#allocation106_spill] sm:$0xff] %v5290_v53 }
  0xaf   :  { %1783 = vmatprep.subr.bf16.mxu0 %v5256_v61  ;;  %1823 = vmatprep.subr.bf16.mxu1 %v5259_v5  ;;  %7325 = vst [vmem:[#allocation103_spill] sm:$0xff] %v5280_v17  ;;  %v893_v5 = vld [vmem:[#allocation6 + $0x10] sm:$0xff]  ;;  %v898_v37 = vld [vmem:[#allocation6 + $0x38] sm:$0xff]  ;;  %7327 = vst [vmem:[#allocation105_spill] sm:$0xff] %v5286_v52 }
  0xb0   :  { %v897_v61 = vld [vmem:[#allocation6 + $0x30] sm:$0xff]  ;;  %v5295_v54 = vcombine.high %v894_v33, %v898_v37  ;;  %v5302_v7 = vcombine.low %v894_v33, %v898_v37 }
  0xb1   :  { %v5292_v51 = vcombine.high %v893_v5, %v897_v61  ;;  %v5298_v21 = vcombine.low %v893_v5, %v897_v61 }
  0xb2   :  { %1784 = vmatpush1.bf16.msra.mxu0 %v5262_v60  ;;  %1824 = vmatpush1.bf16.msra.mxu1 %v5266_v34  ;;  %7330 = vst [vmem:[#allocation108_spill] sm:$0xff] %v5295_v54  ;;  %v1014_v34 = vld [vmem:[#allocation6 + $0x3d8] sm:$0xff]  ;;  %7332 = vst [vmem:[#allocation110_spill] sm:$0xff] %v5302_v7 }
  0xb3   :  { %1785 = vmatprep.subr.bf16.mxu0 %v5268_v59  ;;  %1825 = vmatprep.subr.bf16.mxu1 %v5271_v62  ;;  %7329 = vst [vmem:[#allocation107_spill] sm:$0xff] %v5292_v51  ;;  %v1013_v62 = vld [vmem:[#allocation6 + $0x3d0] sm:$0xff]  ;;  %v1018_v60 = vld [vmem:[#allocation6 + $0x3f8] sm:$0xff]  ;;  %7331 = vst [vmem:[#allocation109_spill] sm:$0xff] %v5298_v21 }
  0xb4   :  { %v1017_v59 = vld [vmem:[#allocation6 + $0x3f0] sm:$0xff]  ;;  %v5307_v22 = vcombine.high %v1014_v34, %v1018_v60  ;;  %v5314_v37 = vcombine.low %v1014_v34, %v1018_v60 }
  0xb5   :  { %v5304_v11 = vcombine.high %v1013_v62, %v1017_v59  ;;  %v5310_v61 = vcombine.low %v1013_v62, %v1017_v59 }
  0xb6   :  { %1786 = vmatpush1.bf16.msra.mxu0 %v5274_v38  ;;  %1826 = vmatpush1.bf16.msra.mxu1 %v5278_v4  ;;  %7334 = vst [vmem:[#allocation112_spill] sm:$0xff] %v5307_v22  ;;  %v1006_v4 = vld [vmem:[#allocation6 + $0x398] sm:$0xff]  ;;  %7336 = vst [vmem:[#allocation114_spill] sm:$0xff] %v5314_v37 }
  0xb7   :  { %1787 = vmatprep.subr.bf16.mxu0 %v5280_v17  ;;  %1827 = vmatprep.subr.bf16.mxu1 %v5283_v18  ;;  %7333 = vst [vmem:[#allocation111_spill] sm:$0xff] %v5304_v11  ;;  %v1005_v18 = vld [vmem:[#allocation6 + $0x390] sm:$0xff]  ;;  %v1010_v38 = vld [vmem:[#allocation6 + $0x3b8] sm:$0xff]  ;;  %7335 = vst [vmem:[#allocation113_spill] sm:$0xff] %v5310_v61 }
  0xb8   :  { %v1009_v17 = vld [vmem:[#allocation6 + $0x3b0] sm:$0xff]  ;;  %v5319_v5 = vcombine.high %v1006_v4, %v1010_v38  ;;  %v5326_v60 = vcombine.low %v1006_v4, %v1010_v38 }
  0xb9   :  { %v5316_v33 = vcombine.high %v1005_v18, %v1009_v17  ;;  %v5322_v59 = vcombine.low %v1005_v18, %v1009_v17 }
  0xba   :  { %1788 = vmatpush1.bf16.msra.mxu0 %v5286_v52  ;;  %1828 = vmatpush1.bf16.msra.mxu1 %v5290_v53  ;;  %7338 = vst [vmem:[#allocation116_spill] sm:$0xff] %v5319_v5  ;;  %v998_v53 = vld [vmem:[#allocation6 + $0x358] sm:$0xff]  ;;  %7340 = vst [vmem:[#allocation118_spill] sm:$0xff] %v5326_v60 }
  0xbb   :  { %1789 = vmatprep.subr.bf16.mxu0 %v5292_v51  ;;  %1829 = vmatprep.subr.bf16.mxu1 %v5295_v54  ;;  %7337 = vst [vmem:[#allocation115_spill] sm:$0xff] %v5316_v33  ;;  %v997_v54 = vld [vmem:[#allocation6 + $0x350] sm:$0xff]  ;;  %v1002_v52 = vld [vmem:[#allocation6 + $0x378] sm:$0xff]  ;;  %7339 = vst [vmem:[#allocation117_spill] sm:$0xff] %v5322_v59 }
  0xbc   :  { %v1001_v51 = vld [vmem:[#allocation6 + $0x370] sm:$0xff]  ;;  %v5331_v62 = vcombine.high %v998_v53, %v1002_v52  ;;  %v5338_v38 = vcombine.low %v998_v53, %v1002_v52 }
  0xbd   :  { %v5328_v34 = vcombine.high %v997_v54, %v1001_v51  ;;  %v5334_v17 = vcombine.low %v997_v54, %v1001_v51 }
  0xbe   :  { %1790 = vmatpush1.bf16.msra.mxu0 %v5298_v21  ;;  %1830 = vmatpush1.bf16.msra.mxu1 %v5302_v7  ;;  %7342 = vst [vmem:[#allocation120_spill] sm:$0xff] %v5331_v62  ;;  %v990_v7 = vld [vmem:[#allocation6 + $0x318] sm:$0xff]  ;;  %7344 = vst [vmem:[#allocation122_spill] sm:$0xff] %v5338_v38 }
  0xbf   :  { %1791 = vmatprep.subr.bf16.mxu0 %v5304_v11  ;;  %1831 = vmatprep.subr.bf16.mxu1 %v5307_v22  ;;  %7341 = vst [vmem:[#allocation119_spill] sm:$0xff] %v5328_v34  ;;  %v989_v22 = vld [vmem:[#allocation6 + $0x310] sm:$0xff]  ;;  %v994_v21 = vld [vmem:[#allocation6 + $0x338] sm:$0xff]  ;;  %7343 = vst [vmem:[#allocation121_spill] sm:$0xff] %v5334_v17 }
  0xc0   :  { %v993_v11 = vld [vmem:[#allocation6 + $0x330] sm:$0xff]  ;;  %v5343_v18 = vcombine.high %v990_v7, %v994_v21  ;;  %v5350_v52 = vcombine.low %v990_v7, %v994_v21 }
  0xc1   :  { %v5340_v4 = vcombine.high %v989_v22, %v993_v11  ;;  %v5346_v51 = vcombine.low %v989_v22, %v993_v11 }
  0xc2   :  { %1792 = vmatpush2.bf16.msra.mxu0 %v5310_v61  ;;  %1832 = vmatpush2.bf16.msra.mxu1 %v5314_v37  ;;  %7346 = vst [vmem:[#allocation124_spill] sm:$0xff] %v5343_v18  ;;  %v982_v37 = vld [vmem:[#allocation6 + $0x2d8] sm:$0xff]  ;;  %7348 = vst [vmem:[#allocation126_spill] sm:$0xff] %v5350_v52 }
  0xc3   :  { %1793 = vmatprep.subr.bf16.mxu0 %v5316_v33  ;;  %1833 = vmatprep.subr.bf16.mxu1 %v5319_v5  ;;  %7345 = vst [vmem:[#allocation123_spill] sm:$0xff] %v5340_v4  ;;  %v981_v5 = vld [vmem:[#allocation6 + $0x2d0] sm:$0xff]  ;;  %v986_v61 = vld [vmem:[#allocation6 + $0x2f8] sm:$0xff]  ;;  %7347 = vst [vmem:[#allocation125_spill] sm:$0xff] %v5346_v51 }
  0xc4   :  { %v985_v33 = vld [vmem:[#allocation6 + $0x2f0] sm:$0xff]  ;;  %v5355_v54 = vcombine.high %v982_v37, %v986_v61  ;;  %v5362_v21 = vcombine.low %v982_v37, %v986_v61 }
  0xc5   :  { %v5352_v53 = vcombine.high %v981_v5, %v985_v33  ;;  %v5358_v11 = vcombine.low %v981_v5, %v985_v33 }
  0xc6   :  { %1794 = vmatpush2.bf16.msra.mxu0 %v5322_v59  ;;  %1834 = vmatpush2.bf16.msra.mxu1 %v5326_v60  ;;  %7350 = vst [vmem:[#allocation128_spill] sm:$0xff] %v5355_v54  ;;  %v974_v60 = vld [vmem:[#allocation6 + $0x298] sm:$0xff]  ;;  %7352 = vst [vmem:[#allocation130_spill] sm:$0xff] %v5362_v21 }
  0xc7   :  { %1795 = vmatprep.subr.bf16.mxu0 %v5328_v34  ;;  %1835 = vmatprep.subr.bf16.mxu1 %v5331_v62  ;;  %7349 = vst [vmem:[#allocation127_spill] sm:$0xff] %v5352_v53  ;;  %v973_v62 = vld [vmem:[#allocation6 + $0x290] sm:$0xff]  ;;  %v978_v59 = vld [vmem:[#allocation6 + $0x2b8] sm:$0xff]  ;;  %7351 = vst [vmem:[#allocation129_spill] sm:$0xff] %v5358_v11 }
  0xc8   :  { %v977_v34 = vld [vmem:[#allocation6 + $0x2b0] sm:$0xff]  ;;  %v5367_v22 = vcombine.high %v974_v60, %v978_v59  ;;  %v5374_v61 = vcombine.low %v974_v60, %v978_v59 }
  0xc9   :  { %v5364_v7 = vcombine.high %v973_v62, %v977_v34  ;;  %v5370_v33 = vcombine.low %v973_v62, %v977_v34 }
  0xca   :  { %1796 = vmatpush2.bf16.msra.mxu0 %v5334_v17  ;;  %1836 = vmatpush2.bf16.msra.mxu1 %v5338_v38  ;;  %7354 = vst [vmem:[#allocation132_spill] sm:$0xff] %v5367_v22  ;;  %v966_v38 = vld [vmem:[#allocation6 + $0x258] sm:$0xff]  ;;  %7356 = vst [vmem:[#allocation134_spill] sm:$0xff] %v5374_v61 }
  0xcb   :  { %1797 = vmatprep.subr.bf16.mxu0 %v5340_v4  ;;  %1837 = vmatprep.subr.bf16.mxu1 %v5343_v18  ;;  %7353 = vst [vmem:[#allocation131_spill] sm:$0xff] %v5364_v7  ;;  %v965_v18 = vld [vmem:[#allocation6 + $0x250] sm:$0xff]  ;;  %v970_v17 = vld [vmem:[#allocation6 + $0x278] sm:$0xff]  ;;  %7355 = vst [vmem:[#allocation133_spill] sm:$0xff] %v5370_v33 }
  0xcc   :  { %v969_v4 = vld [vmem:[#allocation6 + $0x270] sm:$0xff]  ;;  %v5379_v5 = vcombine.high %v966_v38, %v970_v17  ;;  %v5386_v59 = vcombine.low %v966_v38, %v970_v17 }
  0xcd   :  { %v5376_v37 = vcombine.high %v965_v18, %v969_v4  ;;  %v5382_v34 = vcombine.low %v965_v18, %v969_v4  ;;  %v5440_v18 = vld [vmem:[%s6929_s3] sm:$0xff] }
  0xce   :  { %1798 = vmatpush2.bf16.msra.mxu0 %v5346_v51  ;;  %1838 = vmatpush2.bf16.msra.mxu1 %v5350_v52  ;;  %7358 = vst [vmem:[#allocation136_spill] sm:$0xff] %v5379_v5  ;;  %v958_v52 = vld [vmem:[#allocation6 + $0x218] sm:$0xff]  ;;  %7360 = vst [vmem:[#allocation138_spill] sm:$0xff] %v5386_v59 }
  0xcf   :  { %1799 = vmatprep.subr.bf16.mxu0 %v5352_v53  ;;  %1839 = vmatprep.subr.bf16.mxu1 %v5355_v54  ;;  %7357 = vst [vmem:[#allocation135_spill] sm:$0xff] %v5376_v37  ;;  %v957_v54 = vld [vmem:[#allocation6 + $0x210] sm:$0xff]  ;;  %v962_v51 = vld [vmem:[#allocation6 + $0x238] sm:$0xff]  ;;  %7359 = vst [vmem:[#allocation137_spill] sm:$0xff] %v5382_v34 }
  0xd0   :  { %v961_v53 = vld [vmem:[#allocation6 + $0x230] sm:$0xff]  ;;  %v5391_v62 = vcombine.high %v958_v52, %v962_v51  ;;  %v5398_v4 = vcombine.low %v958_v52, %v962_v51 }
  0xd1   :  { %v5388_v60 = vcombine.high %v957_v54, %v961_v53 }
  0xd2   :  { %1800 = vmatpush2.bf16.msra.mxu0 %v5358_v11  ;;  %1840 = vmatpush2.bf16.msra.mxu1 %v5362_v21  ;;  %7362 = vst [vmem:[#allocation140_spill] sm:$0xff] %v5391_v62  ;;  %7364 = vst [vmem:[#allocation142_spill] sm:$0xff] %v5398_v4 }
  0xd3   :  { %1801 = vmatprep.subr.bf16.mxu0 %v5364_v7  ;;  %1841 = vmatprep.subr.bf16.mxu1 %v5367_v22  ;;  %7361 = vst [vmem:[#allocation139_spill] sm:$0xff] %v5388_v60  ;;  %v5394_v22 = vcombine.low %v957_v54, %v961_v53  ;;  %v4908_v53 = vmov 1983009808  }
  0xd4   :  { %v686_v54 = vunpack.c.l.s4 %v4908_v53 }
  0xd5   :  { %7363 = vst [vmem:[#allocation141_spill] sm:$0xff] %v5394_v22 }
  0xd6   :  { %1802 = vmatpush2.bf16.msra.mxu0 %v5370_v33  ;;  %1842 = vmatpush2.bf16.msra.mxu1 %v5374_v61 }
  0xd7   :  { %1803 = vmatprep.subr.bf16.mxu0 %v5376_v37  ;;  %1843 = vmatprep.subr.bf16.mxu1 %v5379_v5 }
  0xda   :  { %1804 = vmatpush2.bf16.msra.mxu0 %v5382_v34  ;;  %1844 = vmatpush2.bf16.msra.mxu1 %v5386_v59 }
  0xdb   :  { %1805 = vmatprep.subr.bf16.mxu0 %v5388_v60  ;;  %1845 = vmatprep.subr.bf16.mxu1 %v5391_v62 }
  0xde   :  { %1806 = vmatpush2.bf16.msra.mxu0 %v5394_v22  ;;  %1846 = vmatpush2.bf16.msra.mxu1 %v5398_v4 }
  0xdf   :  { %1937 = vmatprep.subr.bf16.mxu0 %v5003_v8  ;;  %1978 = vmatprep.subr.bf16.mxu1 %v5005_v9 }
  0xe1   :  { %1808 = vmatmul.mubr.bf16.vlgmr.msra.gmra.mxu0 %v5207_v6  ;;  %1848 = vmatmul.mubr.bf16.vlgmr.msra.gmra.mxu1 %v5207_v6  ;;  %v137_v6 = vlaneseq }
  0xe2   :  { %1938 = vmatpush1.bf16.msra.mxu0 %v5009_v16  ;;  %1979 = vmatpush1.bf16.msra.mxu1 %v5012_v19 }
  0xe3   :  { %1939 = vmatprep.subr.bf16.mxu0 %v5014_v20  ;;  %1980 = vmatprep.subr.bf16.mxu1 %v5017_v23  ;;  %v5429_v17 = vshrl.u32 %v137_v6, 7 }
  0xe4   :  { %1969 = vmatprep.mubr.bf16.mxu0 %v5019_v24  ;;  %2010 = vmatprep.mubr.bf16.mxu1 %v5019_v24 }
  0xe5   :  { %v139_v38 = vsub.s32 0, %v5429_v17  ;;  %v147_v51 = vsub.s32 2, %v5429_v17  ;;  %v143_v52 = vsub.s32 1, %v5429_v17  ;;  %v151_v6 = vsub.s32 3, %v5429_v17 }
  0xe6   :  { %1940 = vmatpush1.bf16.msra.mxu0 %v5024_v25  ;;  %1981 = vmatpush1.bf16.msra.mxu1 %v5028_v28 }
  0xe7   :  { %1941 = vmatprep.subr.bf16.mxu0 %v5030_v29  ;;  %1982 = vmatprep.subr.bf16.mxu1 %v5033_v31 }
  0xea   :  { %1942 = vmatpush1.bf16.msra.mxu0 %v5038_v32  ;;  %1983 = vmatpush1.bf16.msra.mxu1 %v5042_v35 }
  0xeb   :  { %1943 = vmatprep.subr.bf16.mxu0 %v5044_v36  ;;  %1984 = vmatprep.subr.bf16.mxu1 %v5047_v39 }
  0xee   :  { %1944 = vmatpush1.bf16.msra.mxu0 %v5050_v0  ;;  %1985 = vmatpush1.bf16.msra.mxu1 %v5054_v40 }
  0xef   :  { %1945 = vmatprep.subr.bf16.mxu0 %v5056_v41  ;;  %1986 = vmatprep.subr.bf16.mxu1 %v5059_v42 }
  0xf2   :  { %1946 = vmatpush1.bf16.msra.mxu0 %v5062_v47  ;;  %1987 = vmatpush1.bf16.msra.mxu1 %v5066_v48 }
  0xf3   :  { %1947 = vmatprep.subr.bf16.mxu0 %v5068_v49  ;;  %1988 = vmatprep.subr.bf16.mxu1 %v5071_v50 }
  0xf6   :  { %1948 = vmatpush1.bf16.msra.mxu0 %v5074_v55  ;;  %1989 = vmatpush1.bf16.msra.mxu1 %v5078_v56 }
  0xf7   :  { %1949 = vmatprep.subr.bf16.mxu0 %v5080_v57  ;;  %1990 = vmatprep.subr.bf16.mxu1 %v5083_v58  ;;  %v148_v58 = vrot.slane %v5440_v18, %v147_v51 }
  0xfa   :  { %1950 = vmatpush1.bf16.msra.mxu0 %v5086_v63  ;;  %1991 = vmatpush1.bf16.msra.mxu1 %v5090_v1  ;;  %v140_v63 = vrot.slane %v5440_v18, %v139_v38  ;;  %v687_v1 = vunpack.c.0.s8 %v686_v54 }
  0xfb   :  { %1951 = vmatprep.subr.bf16.mxu0 %v5092_v2  ;;  %1992 = vmatprep.subr.bf16.mxu1 %v5095_v3  ;;  %v5454_v2 = vrot.slane %v5440_v18, %v143_v52  ;;  %v5458_v3 = vrot.slane %v5440_v18, %v151_v6 }
  0xfc   :  { %v5465_v54 = vsub.s32 %v687_v1, %v5429_v17 }
  0xfd   :  { %7365 = vst [vmem:[#allocation143_spill] sm:$0xff] %v5454_v2  ;;  %7366 = vst [vmem:[#allocation144_spill] sm:$0xff] %v5458_v3 }
  0xfe   :  { %1952 = vmatpush1.bf16.msra.mxu0 %v5098_v12  ;;  %1993 = vmatpush1.bf16.msra.mxu1 %v5102_v13 }
  0xff   :  { %1953 = vmatprep.subr.bf16.mxu0 %v5104_v14  ;;  %1994 = vmatprep.subr.bf16.mxu1 %v5107_v15 }
 0x101   :  { %v537_v53 = vpop.f32.mrf.mxu0  ;;  %v580_v38 = vpop.f32.mrf.mxu1 }
 0x102   :  { %v538_v57 = vadd.f32 %v537_v53, %v140_v63  ;;  %1954 = vmatpush2.bf16.msra.mxu0 %v5110_v26  ;;  %v581_v12 = vadd.f32 %v580_v38, %v148_v58  ;;  %1995 = vmatpush2.bf16.msra.mxu1 %v5114_v27 }
 0x103   :  { %v539_v51 = vpop.f32.mrf.mxu0  ;;  %1955 = vmatprep.subr.bf16.mxu0 %v5116_v30  ;;  %v582_v15 = vpop.f32.mrf.mxu1  ;;  %1996 = vmatprep.subr.bf16.mxu1 %v5119_v10 }
 0x104   :  { %v540_v52 = vadd.f32 %v539_v51, %v5454_v2  ;;  %v583_v6 = vadd.f32 %v582_v15, %v5458_v3 }
 0x105   :  { %v541_v53 = vpop.f32.mrf.mxu0  ;;  %v584_v38 = vpop.f32.mrf.mxu1 }
 0x106   :  { %v683_v14 = vcombine.low %v538_v57, %v540_v52  ;;  %v728_v13 = vcombine.high %v538_v57, %v540_v52  ;;  %v542_v26 = vadd.f32 %v541_v53, %v140_v63  ;;  %1956 = vmatpush2.bf16.msra.mxu0 %v5122_v43  ;;  %v684_v27 = vcombine.low %v581_v12, %v583_v6  ;;  %v7367_v53 = vld [vmem:[#allocation57_spill] sm:$0xff] }
 0x107   :  { %v729_v56 = vcombine.high %v581_v12, %v583_v6  ;;  %v585_v30 = vadd.f32 %v584_v38, %v148_v58  ;;  %v543_v55 = vpop.f32.mrf.mxu0  ;;  %1997 = vmatpush2.bf16.msra.mxu1 %v5126_v44  ;;  %1957 = vmatprep.subr.bf16.mxu0 %v5128_v45  ;;  %v586_v57 = vpop.f32.mrf.mxu1  ;;  %v7368_v45 = vld [vmem:[#allocation58_spill] sm:$0xff] }
 0x108   :  { %v5473_v1 = vrot.slane %v683_v14, %v5465_v54  ;;  %v736_v15 = vrot.slane %v728_v13, %v5465_v54  ;;  %v544_v51 = vadd.f32 %v543_v55, %v5454_v2  ;;  %1998 = vmatprep.subr.bf16.mxu1 %v5131_v46  ;;  %v5479_v63 = vrot.slane %v684_v27, %v5465_v54  ;;  %v7369_v2 = vld [vmem:[#allocation59_spill] sm:$0xff]  ;;  %v7370_v27 = vld [vmem:[#allocation60_spill] sm:$0xff] }
 0x109   :  { %v743_v58 = vrot.slane %v729_v56, %v5465_v54  ;;  %v587_v12 = vadd.f32 %v586_v57, %v5458_v3  ;;  %v7373_v3 = vld [vmem:[#allocation62_spill] sm:$0xff] }
 0x10a   :  { %v782_v52 = vcombine.low %v542_v26, %v544_v51  ;;  %v828_v6 = vcombine.high %v542_v26, %v544_v51  ;;  %1958 = vmatpush2.bf16.msra.mxu0 %v7367_v53  ;;  %v721_v56 = vcombine.high %v5473_v1, %v5479_v63  ;;  %v7371_v51 = vld [vmem:[#allocation61_spill] sm:$0xff] }
 0x10b   :  { %v783_v14 = vcombine.low %v585_v30, %v587_v12  ;;  %v829_v38 = vcombine.high %v585_v30, %v587_v12  ;;  %1999 = vmatpush2.bf16.msra.mxu1 %v7368_v45  ;;  %1959 = vmatprep.subr.bf16.mxu0 %v7369_v2  ;;  %v4459_v12 = vcombine.high %v5479_v63, %v5479_v63 }
 0x10c   :  { %v790_v55 = vrot.slane %v782_v52, %v5465_v54  ;;  %v836_v13 = vrot.slane %v828_v6, %v5465_v54  ;;  %2000 = vmatprep.subr.bf16.mxu1 %v7370_v27  ;;  %v5495_v30 = vrot.slane %v721_v56, %v5465_v54  ;;  %v744_v52 = vcombine.low %v736_v15, %v743_v58  ;;  %v7374_v27 = vld [vmem:[#allocation63_spill] sm:$0xff] }
 0x10d   :  { %v797_v57 = vrot.slane %v783_v14, %v5465_v54  ;;  %v843_v26 = vrot.slane %v829_v38, %v5465_v54  ;;  %v4461_v6 = vcombine.low %v743_v58, %v743_v58  ;;  %v767_v2 = vcombine.high %v736_v15, %v743_v58  ;;  %v7375_v14 = vld [vmem:[#allocation64_spill] sm:$0xff] }
 0x10e   :  { %1960 = vmatpush2.bf16.msra.mxu0 %v7371_v51  ;;  %7372 = vst [vmem:[#allocation145_spill] sm:$0xff] %v5495_v30  ;;  %v4463_v45 = vcombine.high %v743_v58, %v743_v58  ;;  %v5503_v38 = vrot.slane %v4459_v12, %v5465_v54  ;;  %v5506_v56 = vrot.slane %v744_v52, %v5465_v54  ;;  %v7384_v52 = vld [vmem:[#allocation67_spill] sm:$0xff] }
 0x10f   :  { %2001 = vmatpush2.bf16.msra.mxu1 %v7373_v3  ;;  %1961 = vmatprep.subr.bf16.mxu0 %v7374_v27  ;;  %v798_v53 = vcombine.low %v790_v55, %v797_v57  ;;  %v5509_v30 = vrot.slane %v4461_v6, %v5465_v54  ;;  %v5512_v51 = vrot.slane %v767_v2, %v5465_v54 }
 0x110   :  { %2002 = vmatprep.subr.bf16.mxu1 %v7375_v14  ;;  %7376 = vst [vmem:[#allocation146_spill] sm:$0xff] %v5503_v38  ;;  %7377 = vst [vmem:[#allocation147_spill] sm:$0xff] %v5506_v56  ;;  %v5515_v3 = vrot.slane %v4463_v45, %v5465_v54  ;;  %v4465_v58 = vcombine.low %v797_v57, %v797_v57  ;;  %v7382_v14 = vld [vmem:[#allocation65_spill] sm:$0xff]  ;;  %v821_v12 = vcombine.high %v790_v55, %v797_v57  ;;  %v7383_v38 = vld [vmem:[#allocation66_spill] sm:$0xff] }
 0x111   :  { %7378 = vst [vmem:[#allocation148_spill] sm:$0xff] %v5509_v30  ;;  %7379 = vst [vmem:[#allocation149_spill] sm:$0xff] %v5512_v51  ;;  %v5518_v15 = vrot.slane %v798_v53, %v5465_v54  ;;  %v7386_v30 = vld [vmem:[#allocation68_spill] sm:$0xff]  ;;  %v4467_v45 = vcombine.high %v797_v57, %v797_v57  ;;  %v4469_v53 = vcombine.low %v843_v26, %v843_v26  ;;  %v7388_v56 = vld [vmem:[#allocation69_spill] sm:$0xff] }
 0x112   :  { %7380 = vst [vmem:[#allocation150_spill] sm:$0xff] %v5515_v3  ;;  %1962 = vmatpush2.bf16.msra.mxu0 %v7382_v14  ;;  %v5524_v6 = vrot.slane %v4465_v58, %v5465_v54  ;;  %v5528_v2 = vrot.slane %v821_v12, %v5465_v54  ;;  %v844_v3 = vcombine.low %v836_v13, %v843_v26  ;;  %v7391_v58 = vld [vmem:[#allocation70_spill] sm:$0xff] }
 0x113   :  { %7381 = vst [vmem:[#allocation151_spill] sm:$0xff] %v5518_v15  ;;  %2003 = vmatpush2.bf16.msra.mxu1 %v7383_v38  ;;  %1963 = vmatprep.subr.bf16.mxu0 %v7384_v52  ;;  %v867_v15 = vcombine.high %v836_v13, %v843_v26  ;;  %v4471_v51 = vcombine.high %v843_v26, %v843_v26  ;;  %v7396_v26 = vld [vmem:[#allocation72_spill] sm:$0xff] }
 0x114   :  { %7385 = vst [vmem:[#allocation152_spill] sm:$0xff] %v5524_v6  ;;  %2004 = vmatprep.subr.bf16.mxu1 %v7386_v30  ;;  %7387 = vst [vmem:[#allocation153_spill] sm:$0xff] %v5528_v2  ;;  %v5532_v55 = vrot.slane %v4467_v45, %v5465_v54  ;;  %v5535_v52 = vrot.slane %v844_v3, %v5465_v54  ;;  %v7392_v6 = vld [vmem:[#allocation71_spill] sm:$0xff]  ;;  %v5540_v12 = vrot.slane %v4469_v53, %v5465_v54 }
 0x115   :  { %v5543_v57 = vrot.slane %v867_v15, %v5465_v54  ;;  %v5546_v13 = vrot.slane %v4471_v51, %v5465_v54  ;;  %v155_v45 = vsub.s32 4, %v5429_v17  ;;  %v163_v3 = vsub.s32 6, %v5429_v17  ;;  %v7399_v2 = vld [vmem:[#allocation75_spill] sm:$0xff] }
 0x116   :  { %1964 = vmatpush2.bf16.msra.mxu0 %v7388_v56  ;;  %7389 = vst [vmem:[#allocation154_spill] sm:$0xff] %v5532_v55  ;;  %7390 = vst [vmem:[#allocation155_spill] sm:$0xff] %v5535_v52  ;;  %v7397_v55 = vld [vmem:[#allocation73_spill] sm:$0xff]  ;;  %v7398_v52 = vld [vmem:[#allocation74_spill] sm:$0xff]  ;;  %v159_v53 = vsub.s32 5, %v5429_v17  ;;  %v167_v15 = vsub.s32 7, %v5429_v17 }
 0x117   :  { %2005 = vmatpush2.bf16.msra.mxu1 %v7391_v58  ;;  %1965 = vmatprep.subr.bf16.mxu0 %v7392_v6  ;;  %7393 = vst [vmem:[#allocation156_spill] sm:$0xff] %v5540_v12  ;;  %7394 = vst [vmem:[#allocation157_spill] sm:$0xff] %v5543_v57  ;;  %v7400_v12 = vld [vmem:[#allocation76_spill] sm:$0xff]  ;;  %v156_v51 = vrot.slane %v5440_v18, %v155_v45  ;;  %v164_v57 = vrot.slane %v5440_v18, %v163_v3 }
 0x118   :  { %7395 = vst [vmem:[#allocation158_spill] sm:$0xff] %v5546_v13  ;;  %2006 = vmatprep.subr.bf16.mxu1 %v7396_v26  ;;  %v7401_v13 = vld [vmem:[#allocation77_spill] sm:$0xff]  ;;  %v7402_v26 = vld [vmem:[#allocation78_spill] sm:$0xff] }
 0x11a   :  { %1966 = vmatpush2.bf16.msra.mxu0 %v7397_v55  ;;  %v7403_v55 = vld [vmem:[#allocation79_spill] sm:$0xff] }
 0x11b   :  { %2007 = vmatpush2.bf16.msra.mxu1 %v7398_v52  ;;  %1967 = vmatprep.subr.bf16.mxu0 %v7399_v2  ;;  %v5563_v52 = vrot.slane %v5440_v18, %v159_v53  ;;  %v7405_v2 = vld [vmem:[#allocation80_spill] sm:$0xff] }
 0x11c   :  { %2008 = vmatprep.subr.bf16.mxu1 %v7400_v12  ;;  %v5567_v12 = vrot.slane %v5440_v18, %v167_v15 }
 0x11d   :  { %7404 = vst [vmem:[#allocation159_spill] sm:$0xff] %v5563_v52 }
 0x11e   :  { %1968 = vmatpush2.bf16.msra.mxu0 %v7401_v13  ;;  %7406 = vst [vmem:[#allocation160_spill] sm:$0xff] %v5567_v12 }
 0x11f   :  { %2009 = vmatpush2.bf16.msra.mxu1 %v7402_v26  ;;  %2019 = vmatprep.subr.bf16.mxu0 %v7403_v55 }
 0x120   :  { %2060 = vmatprep.subr.bf16.mxu1 %v7405_v2 }
 0x121   :  { %v623_v6 = vpop.f32.mrf.mxu0  ;;  %v666_v58 = vpop.f32.mrf.mxu1 }
 0x122   :  { %v624_v17 = vadd.f32 %v623_v6, %v156_v51  ;;  %v667_v45 = vadd.f32 %v666_v58, %v164_v57 }
 0x123   :  { %v625_v56 = vpop.f32.mrf.mxu0  ;;  %v668_v3 = vpop.f32.mrf.mxu1 }
 0x124   :  { %v626_v13 = vadd.f32 %v625_v56, %v5563_v52  ;;  %v669_v26 = vadd.f32 %v668_v3, %v5567_v12 }
 0x125   :  { %v627_v30 = vpop.f32.mrf.mxu0  ;;  %v670_v14 = vpop.f32.mrf.mxu1 }
 0x126   :  { %v700_v55 = vcombine.low %v624_v17, %v626_v13  ;;  %v745_v38 = vcombine.high %v624_v17, %v626_v13  ;;  %v628_v53 = vadd.f32 %v627_v30, %v156_v51  ;;  %v701_v27 = vcombine.low %v667_v45, %v669_v26 }
 0x127   :  { %v746_v2 = vcombine.high %v667_v45, %v669_v26  ;;  %v671_v46 = vadd.f32 %v670_v14, %v164_v57  ;;  %v629_v44 = vpop.f32.mrf.mxu0  ;;  %v672_v56 = vpop.f32.mrf.mxu1 }
 0x128   :  { %v5572_v18 = vrot.slane %v700_v55, %v5465_v54  ;;  %v753_v6 = vrot.slane %v745_v38, %v5465_v54  ;;  %v630_v58 = vadd.f32 %v629_v44, %v5563_v52  ;;  %v5577_v15 = vrot.slane %v701_v27, %v5465_v54 }
 0x129   :  { %v760_v3 = vrot.slane %v746_v2, %v5465_v54  ;;  %v673_v30 = vadd.f32 %v672_v56, %v5567_v12 }
 0x12a   :  { %v799_v13 = vcombine.low %v628_v53, %v630_v58  ;;  %v845_v51 = vcombine.high %v628_v53, %v630_v58  ;;  %v722_v38 = vcombine.high %v5572_v18, %v5577_v15  ;;  %v4460_v44 = vcombine.high %v5577_v15, %v5577_v15 }
 0x12b   :  { %v800_v26 = vcombine.low %v671_v46, %v673_v30  ;;  %v846_v14 = vcombine.high %v671_v46, %v673_v30  ;;  %v761_v46 = vcombine.low %v753_v6, %v760_v3  ;;  %v4462_v53 = vcombine.low %v760_v3, %v760_v3 }
 0x12c   :  { %v807_v57 = vrot.slane %v799_v13, %v5465_v54  ;;  %v853_v55 = vrot.slane %v845_v51, %v5465_v54  ;;  %v5590_v17 = vrot.slane %v722_v38, %v5465_v54  ;;  %v5593_v45 = vrot.slane %v4460_v44, %v5465_v54 }
 0x12d   :  { %v814_v27 = vrot.slane %v800_v26, %v5465_v54  ;;  %v860_v2 = vrot.slane %v846_v14, %v5465_v54  ;;  %v768_v58 = vcombine.high %v753_v6, %v760_v3  ;;  %v4464_v56 = vcombine.high %v760_v3, %v760_v3 }
 0x12e   :  { %v5596_v51 = vrot.slane %v761_v46, %v5465_v54  ;;  %v5599_v12 = vrot.slane %v4462_v53, %v5465_v54 }
 0x12f   :  { %v815_v30 = vcombine.low %v807_v57, %v814_v27  ;;  %v4466_v13 = vcombine.low %v814_v27, %v814_v27  ;;  %v5602_v26 = vrot.slane %v768_v58, %v5465_v54  ;;  %v5605_v14 = vrot.slane %v4464_v56, %v5465_v54 }
 0x130   :  { %7407 = vst [vmem:[#allocation161_spill] sm:$0xff] %v5596_v51  ;;  %7408 = vst [vmem:[#allocation162_spill] sm:$0xff] %v5599_v12  ;;  %v822_v3 = vcombine.high %v807_v57, %v814_v27  ;;  %v4468_v44 = vcombine.high %v814_v27, %v814_v27  ;;  %v861_v52 = vcombine.low %v853_v55, %v860_v2  ;;  %v7440_v51 = vld [vmem:[#allocation102_spill] sm:$0xff] }
 0x131   :  { %7409 = vst [vmem:[#allocation163_spill] sm:$0xff] %v5602_v26  ;;  %7410 = vst [vmem:[#allocation164_spill] sm:$0xff] %v5605_v14  ;;  %v5608_v38 = vrot.slane %v815_v30, %v5465_v54  ;;  %v5611_v6 = vrot.slane %v4466_v13, %v5465_v54  ;;  %v4470_v58 = vcombine.low %v860_v2, %v860_v2  ;;  %v7439_v14 = vld [vmem:[#allocation101_spill] sm:$0xff] }
 0x132   :  { %v5614_v46 = vrot.slane %v822_v3, %v5465_v54  ;;  %v5617_v53 = vrot.slane %v4468_v44, %v5465_v54  ;;  %v868_v26 = vcombine.high %v853_v55, %v860_v2  ;;  %v4472_v12 = vcombine.high %v860_v2, %v860_v2 }
 0x133   :  { %7411 = vst [vmem:[#allocation165_spill] sm:$0xff] %v5608_v38  ;;  %7412 = vst [vmem:[#allocation166_spill] sm:$0xff] %v5611_v6  ;;  %v5620_v56 = vrot.slane %v861_v52, %v5465_v54  ;;  %v5623_v30 = vrot.slane %v4470_v58, %v5465_v54  ;;  %v4457_v52 = vcombine.low %v5479_v63, %v5479_v63  ;;  %v7438_v38 = vld [vmem:[#allocation100_spill] sm:$0xff] }
 0x134   :  { %7413 = vst [vmem:[#allocation167_spill] sm:$0xff] %v5614_v46  ;;  %7414 = vst [vmem:[#allocation168_spill] sm:$0xff] %v5617_v53  ;;  %v5626_v13 = vrot.slane %v868_v26, %v5465_v54  ;;  %v5629_v57 = vrot.slane %v4472_v12, %v5465_v54  ;;  %v699_v58 = vcombine.low %v5473_v1, %v5479_v63 }
 0x135   :  { %7415 = vst [vmem:[#allocation169_spill] sm:$0xff] %v5620_v56  ;;  %7416 = vst [vmem:[#allocation170_spill] sm:$0xff] %v5623_v30  ;;  %v1675_v26 = vrot.slane %v4457_v52, %v5465_v54 }
 0x136   :  { %7417 = vst [vmem:[#allocation171_spill] sm:$0xff] %v5626_v13  ;;  %7418 = vst [vmem:[#allocation172_spill] sm:$0xff] %v5629_v57  ;;  %v1668_v13 = vrot.slane %v699_v58, %v5465_v54 }
 0x161   :  { %v1729_v27 = vpop.f32.mrf.mxu0  ;;  %v1769_v3 = vpop.f32.mrf.mxu1 }
 0x162   :  { %v1770_v12 = vadd.f32 %v1769_v3, %v1675_v26  ;;  %v1730_v57 = vadd.f32 %v1729_v27, %v1668_v13 }
 0x163   :  { %v1731_v44 = vpop.f32.mrf.mxu0  ;;  %v1771_v53 = vpop.f32.mrf.mxu1 }
 0x164   :  { %v4391_v30 = vmul.f32 -1.442695, %v1770_v12  ;;  %v4390_v56 = vmul.f32 -1.442695, %v1730_v57  ;;  %v716_v53 = vcombine.low %v5572_v18, %v5577_v15  ;;  %v4458_v44 = vcombine.low %v5577_v15, %v5577_v15 }
 0x165   :  { %v1732_v46 = vpop.f32.mrf.mxu0  ;;  %v1772_v6 = vpop.f32.mrf.mxu1 }
 0x166   :  { %4559 = vpow2.f32 %v4391_v30  ;;  %v1683_v63 = vrot.slane %v716_v53, %v5465_v54  ;;  %v1690_v3 = vrot.slane %v4458_v44, %v5465_v54 }
 0x167   :  { %v1733_v55 = vpop.f32.mrf.mxu0  ;;  %v1773_v2 = vpop.f32.mrf.mxu1  ;;  %4561 = vpow2.f32 %v4390_v56 }
 0x173   :  { %v4560_v46 = vpop.eup %4559 }
 0x174   :  { %v4562_v6 = vpop.eup %4561  ;;  %v1864_v55 = vadd.f32 1.0, %v4560_v46  ;;  %v5646_v46 = vld.sshfl [vmem:[%s6931_s5] sm:$0x33 pattern:$0x76325410] }
 0x175   :  { %v1858_v1 = vadd.f32 1.0, %v4562_v6 }
 0x176   :  { %4563 = vrcp.f32 %v1864_v55 }
 0x177   :  { %4565 = vrcp.f32 %v1858_v1 }
 0x183   :  { %v4564_v12 = vpop.eup %4563 }
 0x184   :  { %v4566_v54 = vpop.eup %4565  ;;  %v1883_v53 = vmul.f32 %v4564_v12, %v5646_v46  ;;  %v7427_v12 = vld [vmem:[#allocation89_spill] sm:$0xff] }
 0x1a1   :  { %v1809_v2 = vpop.f32.mrf.mxu0  ;;  %v1849_v57 = vpop.f32.mrf.mxu1 }
 0x1a2   :  { %v1810_v13 = vadd.f32 %v1809_v2, %v1683_v63  ;;  %v1850_v56 = vadd.f32 %v1849_v57, %v1690_v3 }
 0x1a3   :  { %v1811_v30 = vpop.f32.mrf.mxu0  ;;  %v1851_v27 = vpop.f32.mrf.mxu1 }
 0x1a4   :  { %4567 = vtanh.f32 %v1810_v13  ;;  %v4392_v52 = vmul.f32 -1.442695, %v1850_v56  ;;  %v7419_v56 = vld [vmem:[#allocation81_spill] sm:$0xff]  ;;  %v7420_v30 = vld [vmem:[#allocation82_spill] sm:$0xff]  ;;  %v7421_v27 = vld [vmem:[#allocation83_spill] sm:$0xff] }
 0x1a5   :  { %v1812_v18 = vpop.f32.mrf.mxu0  ;;  %v1852_v58 = vpop.f32.mrf.mxu1 }
 0x1a6   :  { %4569 = vpow2.f32 %v4392_v52  ;;  %v7422_v52 = vld [vmem:[#allocation84_spill] sm:$0xff]  ;;  %v7423_v18 = vld [vmem:[#allocation85_spill] sm:$0xff]  ;;  %v7424_v58 = vld [vmem:[#allocation86_spill] sm:$0xff] }
 0x1a7   :  { %v1813_v15 = vpop.f32.mrf.mxu0  ;;  %v1853_v26 = vpop.f32.mrf.mxu1 }
 0x1a8   :  { %v7425_v15 = vld [vmem:[#allocation87_spill] sm:$0xff]  ;;  %v7426_v26 = vld [vmem:[#allocation88_spill] sm:$0xff] }
 0x1b1   :  { %v4568_v6 = vpop.eup %4567 }
 0x1b2   :  { %v1884_v44 = vmul.f32 %v4568_v6, %v4566_v54  ;;  %v7428_v54 = vld [vmem:[#allocation90_spill] sm:$0xff]  ;;  %v7429_v6 = vld [vmem:[#allocation91_spill] sm:$0xff] }
 0x1b3   :  { %v4570_v55 = vpop.eup %4569 }
 0x1b4   :  { %v5649_v1 = vadd.f32 %v1884_v44, %v1883_v53  ;;  %v1871_v63 = vadd.f32 1.0, %v4570_v55  ;;  %v7430_v53 = vld [vmem:[#allocation92_spill] sm:$0xff]  ;;  %v7431_v44 = vld [vmem:[#allocation93_spill] sm:$0xff]  ;;  %v7432_v55 = vld [vmem:[#allocation94_spill] sm:$0xff] }
 0x1b6   :  { %4571 = vtanh.f32 %v5649_v1 }
 0x1b7   :  { %4573 = vrcp.f32 %v1871_v63  ;;  %v7434_v63 = vld [vmem:[#allocation96_spill] sm:$0xff] }
 0x1c3   :  { %v4572_v2 = vpop.eup %4571 }
 0x1c4   :  { %v4574_v3 = vpop.eup %4573 }
 0x1c5   :  { %v1887_v13 = vmul.f32 %v4574_v3, %v4572_v2  ;;  %v7435_v2 = vld [vmem:[#allocation97_spill] sm:$0xff]  ;;  %v7436_v3 = vld [vmem:[#allocation98_spill] sm:$0xff] }
 0x1c7   :  { %v5652_v57 = vpack.c.bf16 %v1887_v13, %v1887_v13  ;;  %v7437_v13 = vld [vmem:[#allocation99_spill] sm:$0xff] }
 0x1c9   :  { %1970 = vmatmul.mubr.bf16.vlgmr.msra.gmra.mxu0 %v5652_v57  ;;  %2011 = vmatmul.mubr.bf16.vlgmr.msra.gmra.mxu1 %v5652_v57 }
 0x1ca   :  { %2020 = vmatpush1.bf16.msra.mxu0 %v7419_v56  ;;  %2061 = vmatpush1.bf16.msra.mxu1 %v7420_v30 }
 0x1cb   :  { %2021 = vmatprep.subr.bf16.mxu0 %v7421_v27  ;;  %2062 = vmatprep.subr.bf16.mxu1 %v7422_v52 }
 0x1cc   :  { %2051 = vmatprep.mubr.bf16.mxu0 %v5019_v24  ;;  %2092 = vmatprep.mubr.bf16.mxu1 %v5019_v24  ;;  %v7433_v24 = vld [vmem:[#allocation95_spill] sm:$0xff] }
 0x1ce   :  { %2022 = vmatpush1.bf16.msra.mxu0 %v7423_v18  ;;  %2063 = vmatpush1.bf16.msra.mxu1 %v7424_v58 }
 0x1cf   :  { %2023 = vmatprep.subr.bf16.mxu0 %v7425_v15  ;;  %2064 = vmatprep.subr.bf16.mxu1 %v7426_v26 }
 0x1d2   :  { %2024 = vmatpush1.bf16.msra.mxu0 %v7427_v12  ;;  %2065 = vmatpush1.bf16.msra.mxu1 %v7428_v54 }
 0x1d3   :  { %2025 = vmatprep.subr.bf16.mxu0 %v7429_v6  ;;  %2066 = vmatprep.subr.bf16.mxu1 %v7430_v53  ;;  %v7441_v53 = vld [vmem:[#allocation103_spill] sm:$0xff] }
 0x1d6   :  { %2026 = vmatpush1.bf16.msra.mxu0 %v7431_v44  ;;  %2067 = vmatpush1.bf16.msra.mxu1 %v7432_v55  ;;  %v7442_v44 = vld [vmem:[#allocation104_spill] sm:$0xff]  ;;  %v7443_v55 = vld [vmem:[#allocation105_spill] sm:$0xff] }
 0x1d7   :  { %2027 = vmatprep.subr.bf16.mxu0 %v7433_v24  ;;  %2068 = vmatprep.subr.bf16.mxu1 %v7434_v63  ;;  %v7444_v24 = vld [vmem:[#allocation106_spill] sm:$0xff]  ;;  %v7445_v63 = vld [vmem:[#allocation107_spill] sm:$0xff] }
 0x1da   :  { %2028 = vmatpush1.bf16.msra.mxu0 %v7435_v2  ;;  %2069 = vmatpush1.bf16.msra.mxu1 %v7436_v3  ;;  %v7446_v2 = vld [vmem:[#allocation108_spill] sm:$0xff]  ;;  %v7447_v3 = vld [vmem:[#allocation109_spill] sm:$0xff] }
 0x1db   :  { %2029 = vmatprep.subr.bf16.mxu0 %v7437_v13  ;;  %2070 = vmatprep.subr.bf16.mxu1 %v7438_v38  ;;  %v7448_v13 = vld [vmem:[#allocation110_spill] sm:$0xff]  ;;  %v7449_v38 = vld [vmem:[#allocation111_spill] sm:$0xff] }
 0x1de   :  { %2030 = vmatpush1.bf16.msra.mxu0 %v7439_v14  ;;  %2071 = vmatpush1.bf16.msra.mxu1 %v7440_v51  ;;  %v7450_v14 = vld [vmem:[#allocation112_spill] sm:$0xff]  ;;  %v7451_v51 = vld [vmem:[#allocation113_spill] sm:$0xff] }
 0x1df   :  { %2031 = vmatprep.subr.bf16.mxu0 %v7441_v53  ;;  %2072 = vmatprep.subr.bf16.mxu1 %v7442_v44  ;;  %v7452_v53 = vld [vmem:[#allocation114_spill] sm:$0xff]  ;;  %v7453_v44 = vld [vmem:[#allocation115_spill] sm:$0xff] }
 0x1e2   :  { %2032 = vmatpush1.bf16.msra.mxu0 %v7443_v55  ;;  %2073 = vmatpush1.bf16.msra.mxu1 %v7444_v24  ;;  %v7454_v55 = vld [vmem:[#allocation116_spill] sm:$0xff]  ;;  %v7455_v24 = vld [vmem:[#allocation117_spill] sm:$0xff] }
 0x1e3   :  { %2033 = vmatprep.subr.bf16.mxu0 %v7445_v63  ;;  %2074 = vmatprep.subr.bf16.mxu1 %v7446_v2  ;;  %v7456_v63 = vld [vmem:[#allocation118_spill] sm:$0xff]  ;;  %v7457_v2 = vld [vmem:[#allocation119_spill] sm:$0xff] }
 0x1e6   :  { %2034 = vmatpush1.bf16.msra.mxu0 %v7447_v3  ;;  %2075 = vmatpush1.bf16.msra.mxu1 %v7448_v13  ;;  %v7458_v3 = vld [vmem:[#allocation120_spill] sm:$0xff]  ;;  %v7459_v13 = vld [vmem:[#allocation121_spill] sm:$0xff] }
 0x1e7   :  { %2035 = vmatprep.subr.bf16.mxu0 %v7449_v38  ;;  %2076 = vmatprep.subr.bf16.mxu1 %v7450_v14  ;;  %v7460_v38 = vld [vmem:[#allocation122_spill] sm:$0xff]  ;;  %v7461_v14 = vld [vmem:[#allocation123_spill] sm:$0xff] }
 0x1ea   :  { %2036 = vmatpush2.bf16.msra.mxu0 %v7451_v51  ;;  %2077 = vmatpush2.bf16.msra.mxu1 %v7452_v53  ;;  %v7462_v51 = vld [vmem:[#allocation124_spill] sm:$0xff]  ;;  %v7463_v53 = vld [vmem:[#allocation125_spill] sm:$0xff] }
 0x1eb   :  { %2037 = vmatprep.subr.bf16.mxu0 %v7453_v44  ;;  %2078 = vmatprep.subr.bf16.mxu1 %v7454_v55  ;;  %v7464_v44 = vld [vmem:[#allocation126_spill] sm:$0xff]  ;;  %v7465_v55 = vld [vmem:[#allocation127_spill] sm:$0xff] }
 0x1ee   :  { %2038 = vmatpush2.bf16.msra.mxu0 %v7455_v24  ;;  %2079 = vmatpush2.bf16.msra.mxu1 %v7456_v63  ;;  %v7466_v24 = vld [vmem:[#allocation128_spill] sm:$0xff] }
 0x1ef   :  { %2039 = vmatprep.subr.bf16.mxu0 %v7457_v2  ;;  %2080 = vmatprep.subr.bf16.mxu1 %v7458_v3 }
 0x1f2   :  { %2040 = vmatpush2.bf16.msra.mxu0 %v7459_v13  ;;  %2081 = vmatpush2.bf16.msra.mxu1 %v7460_v38  ;;  %v7467_v13 = vld [vmem:[#allocation132_spill] sm:$0xff] }
 0x1f3   :  { %2041 = vmatprep.subr.bf16.mxu0 %v7461_v14  ;;  %2082 = vmatprep.subr.bf16.mxu1 %v7462_v51 }
 0x1f6   :  { %2042 = vmatpush2.bf16.msra.mxu0 %v7463_v53  ;;  %2083 = vmatpush2.bf16.msra.mxu1 %v7464_v44 }
 0x1f7   :  { %2043 = vmatprep.subr.bf16.mxu0 %v7465_v55  ;;  %2084 = vmatprep.subr.bf16.mxu1 %v7466_v24 }
 0x1fa   :  { %2044 = vmatpush2.bf16.msra.mxu0 %v5358_v11  ;;  %2085 = vmatpush2.bf16.msra.mxu1 %v5362_v21 }
 0x1fb   :  { %2045 = vmatprep.subr.bf16.mxu0 %v5364_v7  ;;  %2086 = vmatprep.subr.bf16.mxu1 %v7467_v13 }
 0x1fe   :  { %2046 = vmatpush2.bf16.msra.mxu0 %v5370_v33  ;;  %2087 = vmatpush2.bf16.msra.mxu1 %v5374_v61 }
 0x1ff   :  { %2047 = vmatprep.subr.bf16.mxu0 %v5376_v37  ;;  %2088 = vmatprep.subr.bf16.mxu1 %v5379_v5 }
 0x202   :  { %2048 = vmatpush2.bf16.msra.mxu0 %v5382_v34  ;;  %2089 = vmatpush2.bf16.msra.mxu1 %v5386_v59 }
 0x203   :  { %2049 = vmatprep.subr.bf16.mxu0 %v5388_v60  ;;  %2090 = vmatprep.subr.bf16.mxu1 %v5391_v62 }
 0x206   :  { %2050 = vmatpush2.bf16.msra.mxu0 %v5394_v22  ;;  %2091 = vmatpush2.bf16.msra.mxu1 %v5398_v4 }
 0x207   :  { %2197 = vmatprep.subr.bf16.mxu0 %v5003_v8  ;;  %2238 = vmatprep.subr.bf16.mxu1 %v5005_v9 }
 0x209   :  { %2052 = vmatmul.mubr.bf16.vlgmr.msra.gmra.mxu0 %v5652_v57  ;;  %2093 = vmatmul.mubr.bf16.vlgmr.msra.gmra.mxu1 %v5652_v57  ;;  %v7468_v57 = vld [vmem:[#allocation37_spill] sm:$0xff] }
 0x20a   :  { %2198 = vmatpush1.bf16.msra.mxu0 %v5009_v16  ;;  %2239 = vmatpush1.bf16.msra.mxu1 %v5012_v19 }
 0x20b   :  { %2199 = vmatprep.subr.bf16.mxu0 %v5014_v20  ;;  %2240 = vmatprep.subr.bf16.mxu1 %v5017_v23 }
 0x20e   :  { %2200 = vmatpush1.bf16.msra.mxu0 %v5024_v25  ;;  %2241 = vmatpush1.bf16.msra.mxu1 %v5028_v28 }
 0x20f   :  { %2201 = vmatprep.subr.bf16.mxu0 %v5030_v29  ;;  %2242 = vmatprep.subr.bf16.mxu1 %v5033_v31 }
 0x212   :  { %2202 = vmatpush1.bf16.msra.mxu0 %v5038_v32  ;;  %2243 = vmatpush1.bf16.msra.mxu1 %v5042_v35  ;;  %v7510_v32 = vld [vmem:[#allocation145_spill] sm:$0xff] }
 0x213   :  { %2203 = vmatprep.subr.bf16.mxu0 %v5044_v36  ;;  %2244 = vmatprep.subr.bf16.mxu1 %v5047_v39  ;;  %v7469_v36 = vld [vmem:[#allocation38_spill] sm:$0xff]  ;;  %v7470_v39 = vld [vmem:[#allocation39_spill] sm:$0xff] }
 0x216   :  { %2204 = vmatpush1.bf16.msra.mxu0 %v5050_v0  ;;  %2245 = vmatpush1.bf16.msra.mxu1 %v5054_v40  ;;  %v7471_v0 = vld [vmem:[#allocation40_spill] sm:$0xff]  ;;  %v7472_v40 = vld [vmem:[#allocation41_spill] sm:$0xff] }
 0x217   :  { %2205 = vmatprep.subr.bf16.mxu0 %v5056_v41  ;;  %2246 = vmatprep.subr.bf16.mxu1 %v5059_v42  ;;  %v7473_v41 = vld [vmem:[#allocation42_spill] sm:$0xff]  ;;  %v7474_v42 = vld [vmem:[#allocation43_spill] sm:$0xff] }
 0x21a   :  { %2206 = vmatpush1.bf16.msra.mxu0 %v5062_v47  ;;  %2247 = vmatpush1.bf16.msra.mxu1 %v5066_v48  ;;  %v7475_v47 = vld [vmem:[#allocation44_spill] sm:$0xff]  ;;  %v7476_v48 = vld [vmem:[#allocation45_spill] sm:$0xff] }
 0x21b   :  { %2207 = vmatprep.subr.bf16.mxu0 %v5068_v49  ;;  %2248 = vmatprep.subr.bf16.mxu1 %v5071_v50  ;;  %v7477_v49 = vld [vmem:[#allocation46_spill] sm:$0xff]  ;;  %v7478_v50 = vld [vmem:[#allocation47_spill] sm:$0xff] }
 0x21e   :  { %2208 = vmatpush1.bf16.msra.mxu0 %v7468_v57  ;;  %2249 = vmatpush1.bf16.msra.mxu1 %v7469_v36  ;;  %v7479_v57 = vld [vmem:[#allocation48_spill] sm:$0xff]  ;;  %v7480_v36 = vld [vmem:[#allocation49_spill] sm:$0xff] }
 0x21f   :  { %2209 = vmatprep.subr.bf16.mxu0 %v7470_v39  ;;  %2250 = vmatprep.subr.bf16.mxu1 %v7471_v0  ;;  %v7481_v39 = vld [vmem:[#allocation50_spill] sm:$0xff]  ;;  %v7482_v0 = vld [vmem:[#allocation51_spill] sm:$0xff] }
 0x222   :  { %2210 = vmatpush1.bf16.msra.mxu0 %v7472_v40  ;;  %2251 = vmatpush1.bf16.msra.mxu1 %v7473_v41 }
 0x223   :  { %2211 = vmatprep.subr.bf16.mxu0 %v7474_v42  ;;  %2252 = vmatprep.subr.bf16.mxu1 %v7475_v47  ;;  %v7483_v42 = vld [vmem:[#allocation54_spill] sm:$0xff]  ;;  %v7484_v47 = vld [vmem:[#allocation55_spill] sm:$0xff] }
 0x226   :  { %2212 = vmatpush1.bf16.msra.mxu0 %v7476_v48  ;;  %2253 = vmatpush1.bf16.msra.mxu1 %v7477_v49  ;;  %v7485_v48 = vld [vmem:[#allocation56_spill] sm:$0xff]  ;;  %v7486_v49 = vld [vmem:[#allocation57_spill] sm:$0xff] }
 0x227   :  { %2213 = vmatprep.subr.bf16.mxu0 %v7478_v50  ;;  %2254 = vmatprep.subr.bf16.mxu1 %v7479_v57  ;;  %v7487_v50 = vld [vmem:[#allocation58_spill] sm:$0xff]  ;;  %v7488_v57 = vld [vmem:[#allocation59_spill] sm:$0xff] }
 0x22a   :  { %2214 = vmatpush2.bf16.msra.mxu0 %v7480_v36  ;;  %2255 = vmatpush2.bf16.msra.mxu1 %v7481_v39  ;;  %v7489_v36 = vld [vmem:[#allocation60_spill] sm:$0xff]  ;;  %v7490_v39 = vld [vmem:[#allocation61_spill] sm:$0xff] }
 0x22b   :  { %2215 = vmatprep.subr.bf16.mxu0 %v7482_v0  ;;  %2256 = vmatprep.subr.bf16.mxu1 %v5119_v10  ;;  %v7491_v0 = vld [vmem:[#allocation62_spill] sm:$0xff]  ;;  %v7492_v10 = vld [vmem:[#allocation63_spill] sm:$0xff] }
 0x22e   :  { %2216 = vmatpush2.bf16.msra.mxu0 %v5122_v43  ;;  %2257 = vmatpush2.bf16.msra.mxu1 %v7483_v42  ;;  %v7493_v43 = vld [vmem:[#allocation64_spill] sm:$0xff]  ;;  %v7494_v42 = vld [vmem:[#allocation65_spill] sm:$0xff] }
 0x22f   :  { %2217 = vmatprep.subr.bf16.mxu0 %v7484_v47  ;;  %2258 = vmatprep.subr.bf16.mxu1 %v7485_v48  ;;  %v7495_v47 = vld [vmem:[#allocation66_spill] sm:$0xff]  ;;  %v7496_v48 = vld [vmem:[#allocation67_spill] sm:$0xff] }
 0x232   :  { %2218 = vmatpush2.bf16.msra.mxu0 %v7486_v49  ;;  %2259 = vmatpush2.bf16.msra.mxu1 %v7487_v50  ;;  %v7497_v49 = vld [vmem:[#allocation68_spill] sm:$0xff]  ;;  %v7498_v50 = vld [vmem:[#allocation69_spill] sm:$0xff] }
 0x233   :  { %2219 = vmatprep.subr.bf16.mxu0 %v7488_v57  ;;  %2260 = vmatprep.subr.bf16.mxu1 %v7489_v36  ;;  %v7499_v57 = vld [vmem:[#allocation70_spill] sm:$0xff]  ;;  %v7500_v36 = vld [vmem:[#allocation71_spill] sm:$0xff] }
 0x236   :  { %2220 = vmatpush2.bf16.msra.mxu0 %v7490_v39  ;;  %2261 = vmatpush2.bf16.msra.mxu1 %v7491_v0  ;;  %v7501_v39 = vld [vmem:[#allocation72_spill] sm:$0xff]  ;;  %v7502_v0 = vld [vmem:[#allocation73_spill] sm:$0xff] }
 0x237   :  { %2221 = vmatprep.subr.bf16.mxu0 %v7492_v10  ;;  %2262 = vmatprep.subr.bf16.mxu1 %v7493_v43  ;;  %v7503_v10 = vld [vmem:[#allocation74_spill] sm:$0xff]  ;;  %v7504_v43 = vld [vmem:[#allocation75_spill] sm:$0xff] }
 0x23a   :  { %2222 = vmatpush2.bf16.msra.mxu0 %v7494_v42  ;;  %2263 = vmatpush2.bf16.msra.mxu1 %v7495_v47  ;;  %v7505_v42 = vld [vmem:[#allocation76_spill] sm:$0xff]  ;;  %v7506_v47 = vld [vmem:[#allocation77_spill] sm:$0xff] }
 0x23b   :  { %2223 = vmatprep.subr.bf16.mxu0 %v7496_v48  ;;  %2264 = vmatprep.subr.bf16.mxu1 %v7497_v49  ;;  %v7507_v48 = vld [vmem:[#allocation78_spill] sm:$0xff]  ;;  %v7508_v49 = vld [vmem:[#allocation79_spill] sm:$0xff] }
 0x23e   :  { %2224 = vmatpush2.bf16.msra.mxu0 %v7498_v50  ;;  %2265 = vmatpush2.bf16.msra.mxu1 %v7499_v57  ;;  %v7509_v50 = vld [vmem:[#allocation80_spill] sm:$0xff] }
 0x23f   :  { %2225 = vmatprep.subr.bf16.mxu0 %v7500_v36  ;;  %2266 = vmatprep.subr.bf16.mxu1 %v7501_v39 }
 0x242   :  { %2226 = vmatpush2.bf16.msra.mxu0 %v7502_v0  ;;  %2267 = vmatpush2.bf16.msra.mxu1 %v7503_v10 }
 0x243   :  { %2227 = vmatprep.subr.bf16.mxu0 %v7504_v43  ;;  %2268 = vmatprep.subr.bf16.mxu1 %v7505_v42  ;;  %v1910_v42 = vcombine.high %v7510_v32, %v7510_v32 }
 0x246   :  { %2228 = vmatpush2.bf16.msra.mxu0 %v7506_v47  ;;  %2269 = vmatpush2.bf16.msra.mxu1 %v7507_v48  ;;  %v7511_v47 = vld [vmem:[#allocation146_spill] sm:$0xff] }
 0x247   :  { %2279 = vmatprep.subr.bf16.mxu0 %v7508_v49  ;;  %2320 = vmatprep.subr.bf16.mxu1 %v7509_v50  ;;  %v1911_v49 = vcombine.high %v7511_v47, %v7511_v47 }
 0x289   :  { %v1971_v57 = vpop.f32.mrf.mxu0  ;;  %v2012_v36 = vpop.f32.mrf.mxu1 }
 0x28a   :  { %v1972_v43 = vadd.f32 %v1971_v57, %v7510_v32  ;;  %v2013_v31 = vadd.f32 %v2012_v36, %v7511_v47 }
 0x28b   :  { %v1973_v41 = vpop.f32.mrf.mxu0  ;;  %v2014_v39 = vpop.f32.mrf.mxu1 }
 0x28c   :  { %v1974_v48 = vadd.f32 %v1973_v41, %v1910_v42  ;;  %v4394_v50 = vmul.f32 -1.442695, %v1972_v43  ;;  %v2015_v29 = vadd.f32 %v2014_v39, %v1911_v49  ;;  %v4396_v28 = vmul.f32 -1.442695, %v2013_v31 }
 0x28d   :  { %v1975_v40 = vpop.f32.mrf.mxu0  ;;  %v2016_v0 = vpop.f32.mrf.mxu1  ;;  %v1927_v31 = vcombine.high %v5590_v17, %v5590_v17 }
 0x28e   :  { %v4395_v25 = vmul.f32 -1.442695, %v1974_v48  ;;  %4575 = vpow2.f32 %v4394_v50  ;;  %v4397_v40 = vmul.f32 -1.442695, %v2015_v29 }
 0x28f   :  { %v1976_v35 = vpop.f32.mrf.mxu0  ;;  %v2017_v10 = vpop.f32.mrf.mxu1  ;;  %4577 = vpow2.f32 %v4396_v28  ;;  %v1928_v28 = vcombine.high %v5593_v45, %v5593_v45 }
 0x290   :  { %4579 = vpow2.f32 %v4395_v25 }
 0x291   :  { %4581 = vpow2.f32 %v4397_v40 }
 0x29b   :  { %v4576_v35 = vpop.eup %4575 }
 0x29c   :  { %v4578_v0 = vpop.eup %4577  ;;  %v2107_v57 = vadd.f32 1.0, %v4576_v35 }
 0x29d   :  { %v4580_v10 = vpop.eup %4579  ;;  %v2119_v23 = vadd.f32 1.0, %v4578_v0 }
 0x29e   :  { %v4582_v32 = vpop.eup %4581  ;;  %v2108_v36 = vadd.f32 1.0, %v4580_v10  ;;  %4583 = vrcp.f32 %v2107_v57 }
 0x29f   :  { %v2120_v41 = vadd.f32 1.0, %v4582_v32  ;;  %4585 = vrcp.f32 %v2119_v23 }
 0x2a0   :  { %4587 = vrcp.f32 %v2108_v36  ;;  %v1888_v36 = vcombine.high %v5646_v46, %v5646_v46 }
 0x2ab   :  { %v4584_v10 = vpop.eup %4583 }
 0x2ac   :  { %v4586_v57 = vpop.eup %4585 }
 0x2ad   :  { %v4588_v32 = vpop.eup %4587 }
 0x2c9   :  { %v2053_v42 = vpop.f32.mrf.mxu0  ;;  %v2094_v47 = vpop.f32.mrf.mxu1 }
 0x2ca   :  { %v2054_v29 = vadd.f32 %v2053_v42, %v5590_v17  ;;  %v2095_v25 = vadd.f32 %v2094_v47, %v5593_v45  ;;  %v2139_v47 = vmul.f32 %v4586_v57, %v5649_v1  ;;  %v7513_v57 = vld [vmem:[#allocation92_spill] sm:$0xff] }
 0x2cb   :  { %v2055_v39 = vpop.f32.mrf.mxu0  ;;  %v2096_v48 = vpop.f32.mrf.mxu1 }
 0x2cc   :  { %4589 = vtanh.f32 %v2054_v29  ;;  %v4398_v49 = vmul.f32 -1.442695, %v2095_v25  ;;  %v2056_v50 = vadd.f32 %v2055_v39, %v1927_v31  ;;  %v2097_v43 = vadd.f32 %v2096_v48, %v1928_v28 }
 0x2cd   :  { %4591 = vrcp.f32 %v2120_v41  ;;  %v2057_v40 = vpop.f32.mrf.mxu0  ;;  %v2098_v35 = vpop.f32.mrf.mxu1 }
 0x2ce   :  { %4593 = vpow2.f32 %v4398_v49  ;;  %v4399_v0 = vmul.f32 -1.442695, %v2097_v43 }
 0x2cf   :  { %4595 = vtanh.f32 %v2056_v50  ;;  %v2058_v23 = vpop.f32.mrf.mxu0  ;;  %v2099_v17 = vpop.f32.mrf.mxu1 }
 0x2d0   :  { %4597 = vpow2.f32 %v4399_v0 }
 0x2d9   :  { %v4590_v45 = vpop.eup %4589 }
 0x2da   :  { %v4592_v42 = vpop.eup %4591  ;;  %v2141_v31 = vmul.f32 %v4590_v45, %v4584_v10  ;;  %v7515_v45 = vld [vmem:[#allocation94_spill] sm:$0xff] }
 0x2db   :  { %v4594_v41 = vpop.eup %4593  ;;  %v2140_v48 = vmul.f32 %v4592_v42, %v1888_v36  ;;  %v7516_v36 = vld [vmem:[#allocation95_spill] sm:$0xff]  ;;  %v7517_v42 = vld [vmem:[#allocation96_spill] sm:$0xff] }
 0x2dc   :  { %v4596_v29 = vpop.eup %4595  ;;  %v5803_v25 = vadd.f32 %v2141_v31, %v2139_v47  ;;  %v2133_v28 = vadd.f32 1.0, %v4594_v41  ;;  %v7518_v47 = vld [vmem:[#allocation97_spill] sm:$0xff]  ;;  %v7519_v31 = vld [vmem:[#allocation98_spill] sm:$0xff]  ;;  %v7520_v41 = vld [vmem:[#allocation99_spill] sm:$0xff] }
 0x2dd   :  { %v4598_v39 = vpop.eup %4597  ;;  %v2142_v49 = vmul.f32 %v4596_v29, %v4588_v32  ;;  %v7514_v32 = vld [vmem:[#allocation93_spill] sm:$0xff]  ;;  %v7521_v29 = vld [vmem:[#allocation100_spill] sm:$0xff] }
 0x2de   :  { %4599 = vtanh.f32 %v5803_v25  ;;  %v2134_v50 = vadd.f32 1.0, %v4598_v39  ;;  %v7523_v39 = vld [vmem:[#allocation102_spill] sm:$0xff] }
 0x2df   :  { %4601 = vrcp.f32 %v2133_v28  ;;  %v5806_v43 = vadd.f32 %v2142_v49, %v2140_v48  ;;  %v7522_v28 = vld [vmem:[#allocation101_spill] sm:$0xff]  ;;  %v7524_v48 = vld [vmem:[#allocation103_spill] sm:$0xff]  ;;  %v7525_v49 = vld [vmem:[#allocation104_spill] sm:$0xff] }
 0x2e0   :  { %4603 = vrcp.f32 %v2134_v50  ;;  %v7526_v50 = vld [vmem:[#allocation105_spill] sm:$0xff] }
 0x2e1   :  { %4605 = vtanh.f32 %v5806_v43 }
 0x2eb   :  { %v4600_v46 = vpop.eup %4599 }
 0x2ec   :  { %v4602_v1 = vpop.eup %4601 }
 0x2ed   :  { %v4604_v40 = vpop.eup %4603  ;;  %v2147_v0 = vmul.f32 %v4602_v1, %v4600_v46  ;;  %v7527_v46 = vld [vmem:[#allocation106_spill] sm:$0xff]  ;;  %v7528_v1 = vld [vmem:[#allocation107_spill] sm:$0xff] }
 0x2ee   :  { %v4606_v35 = vpop.eup %4605 }
 0x2ef   :  { %v5809_v23 = vmul.f32 %v4606_v35, %v4604_v40  ;;  %v5813_v10 = vpack.c.bf16 %v2147_v0, %v2147_v0  ;;  %v7529_v40 = vld [vmem:[#allocation108_spill] sm:$0xff]  ;;  %v7530_v35 = vld [vmem:[#allocation109_spill] sm:$0xff]  ;;  %v7531_v0 = vld [vmem:[#allocation110_spill] sm:$0xff] }
 0x2f1   :  { %7512 = vst [vmem:[#allocation81_spill] sm:$0xff] %v5809_v23  ;;  %v2152_v17 = vpack.c.bf16 %v5809_v23, %v5809_v23  ;;  %v7533_v23 = vld [vmem:[#allocation112_spill] sm:$0xff] }
 0x2f3   :  { %2229 = vmatprep.mubr.bf16.mxu0 %v2152_v17  ;;  %2270 = vmatprep.mubr.bf16.mxu1 %v2152_v17 }
 0x2f4   :  { %2230 = vmatmul.mubr.bf16.vlgmr.msra.gmra.mxu0 %v5813_v10  ;;  %2271 = vmatmul.mubr.bf16.vlgmr.msra.gmra.mxu1 %v5813_v10 }
 0x2f5   :  { %2280 = vmatpush1.bf16.msra.mxu0 %v7419_v56  ;;  %2321 = vmatpush1.bf16.msra.mxu1 %v7420_v30 }
 0x2f6   :  { %2311 = vmatprep.mubr.bf16.mxu0 %v2152_v17  ;;  %2352 = vmatprep.mubr.bf16.mxu1 %v2152_v17  ;;  %v7532_v17 = vld [vmem:[#allocation111_spill] sm:$0xff] }
 0x2f7   :  { %2281 = vmatprep.subr.bf16.mxu0 %v7421_v27  ;;  %2322 = vmatprep.subr.bf16.mxu1 %v7422_v52 }
 0x2f9   :  { %2282 = vmatpush1.bf16.msra.mxu0 %v7423_v18  ;;  %2323 = vmatpush1.bf16.msra.mxu1 %v7424_v58 }
 0x2fa   :  { %2283 = vmatprep.subr.bf16.mxu0 %v7425_v15  ;;  %2324 = vmatprep.subr.bf16.mxu1 %v7426_v26 }
 0x2fd   :  { %2284 = vmatpush1.bf16.msra.mxu0 %v7427_v12  ;;  %2325 = vmatpush1.bf16.msra.mxu1 %v7428_v54 }
 0x2fe   :  { %2285 = vmatprep.subr.bf16.mxu0 %v7429_v6  ;;  %2326 = vmatprep.subr.bf16.mxu1 %v7513_v57 }
 0x301   :  { %2286 = vmatpush1.bf16.msra.mxu0 %v7514_v32  ;;  %2327 = vmatpush1.bf16.msra.mxu1 %v7515_v45 }
 0x302   :  { %2287 = vmatprep.subr.bf16.mxu0 %v7516_v36  ;;  %2328 = vmatprep.subr.bf16.mxu1 %v7517_v42 }
 0x305   :  { %2288 = vmatpush1.bf16.msra.mxu0 %v7518_v47  ;;  %2329 = vmatpush1.bf16.msra.mxu1 %v7519_v31 }
 0x306   :  { %2289 = vmatprep.subr.bf16.mxu0 %v7520_v41  ;;  %2330 = vmatprep.subr.bf16.mxu1 %v7521_v29 }
 0x309   :  { %2290 = vmatpush1.bf16.msra.mxu0 %v7522_v28  ;;  %2331 = vmatpush1.bf16.msra.mxu1 %v7523_v39  ;;  %v7534_v39 = vld [vmem:[#allocation113_spill] sm:$0xff] }
 0x30a   :  { %2291 = vmatprep.subr.bf16.mxu0 %v7524_v48  ;;  %2332 = vmatprep.subr.bf16.mxu1 %v7525_v49  ;;  %v7535_v48 = vld [vmem:[#allocation114_spill] sm:$0xff]  ;;  %v7536_v49 = vld [vmem:[#allocation115_spill] sm:$0xff] }
 0x30d   :  { %2292 = vmatpush1.bf16.msra.mxu0 %v7526_v50  ;;  %2333 = vmatpush1.bf16.msra.mxu1 %v7527_v46  ;;  %v7537_v50 = vld [vmem:[#allocation116_spill] sm:$0xff]  ;;  %v7538_v46 = vld [vmem:[#allocation117_spill] sm:$0xff] }
 0x30e   :  { %2293 = vmatprep.subr.bf16.mxu0 %v7528_v1  ;;  %2334 = vmatprep.subr.bf16.mxu1 %v7529_v40 }
 0x311   :  { %2294 = vmatpush1.bf16.msra.mxu0 %v7530_v35  ;;  %2335 = vmatpush1.bf16.msra.mxu1 %v7531_v0  ;;  %v7539_v0 = vld [vmem:[#allocation121_spill] sm:$0xff] }
 0x312   :  { %2295 = vmatprep.subr.bf16.mxu0 %v7532_v17  ;;  %2336 = vmatprep.subr.bf16.mxu1 %v7533_v23 }
 0x315   :  { %2296 = vmatpush2.bf16.msra.mxu0 %v7534_v39  ;;  %2337 = vmatpush2.bf16.msra.mxu1 %v7535_v48 }
 0x316   :  { %2297 = vmatprep.subr.bf16.mxu0 %v7536_v49  ;;  %2338 = vmatprep.subr.bf16.mxu1 %v7537_v50 }
 0x319   :  { %2298 = vmatpush2.bf16.msra.mxu0 %v7538_v46  ;;  %2339 = vmatpush2.bf16.msra.mxu1 %v7456_v63 }
 0x31a   :  { %2299 = vmatprep.subr.bf16.mxu0 %v7457_v2  ;;  %2340 = vmatprep.subr.bf16.mxu1 %v7458_v3 }
 0x31d   :  { %2300 = vmatpush2.bf16.msra.mxu0 %v7539_v0  ;;  %2341 = vmatpush2.bf16.msra.mxu1 %v7460_v38 }
 0x31e   :  { %2301 = vmatprep.subr.bf16.mxu0 %v7461_v14  ;;  %2342 = vmatprep.subr.bf16.mxu1 %v7462_v51 }
 0x321   :  { %2302 = vmatpush2.bf16.msra.mxu0 %v7463_v53  ;;  %2343 = vmatpush2.bf16.msra.mxu1 %v7464_v44 }
 0x322   :  { %2303 = vmatprep.subr.bf16.mxu0 %v7465_v55  ;;  %2344 = vmatprep.subr.bf16.mxu1 %v7466_v24 }
 0x325   :  { %2304 = vmatpush2.bf16.msra.mxu0 %v5358_v11  ;;  %2345 = vmatpush2.bf16.msra.mxu1 %v5362_v21 }
 0x326   :  { %2305 = vmatprep.subr.bf16.mxu0 %v5364_v7  ;;  %2346 = vmatprep.subr.bf16.mxu1 %v7467_v13 }
 0x329   :  { %2306 = vmatpush2.bf16.msra.mxu0 %v5370_v33  ;;  %2347 = vmatpush2.bf16.msra.mxu1 %v5374_v61  ;;  %v7601_v61 = vld [vmem:[#allocation147_spill] sm:$0xff] }
 0x32a   :  { %2307 = vmatprep.subr.bf16.mxu0 %v5376_v37  ;;  %2348 = vmatprep.subr.bf16.mxu1 %v5379_v5 }
 0x32d   :  { %2308 = vmatpush2.bf16.msra.mxu0 %v5382_v34  ;;  %2349 = vmatpush2.bf16.msra.mxu1 %v5386_v59  ;;  %v7546_v59 = vld [vmem:[#allocation26_spill] sm:$0xff] }
 0x32e   :  { %2309 = vmatprep.subr.bf16.mxu0 %v5388_v60  ;;  %2350 = vmatprep.subr.bf16.mxu1 %v5391_v62  ;;  %v7540_v60 = vld [vmem:[#allocation20_spill] sm:$0xff]  ;;  %v7541_v62 = vld [vmem:[#allocation21_spill] sm:$0xff] }
 0x331   :  { %2310 = vmatpush2.bf16.msra.mxu0 %v5394_v22  ;;  %2351 = vmatpush2.bf16.msra.mxu1 %v5398_v4  ;;  %v7542_v22 = vld [vmem:[#allocation22_spill] sm:$0xff]  ;;  %v7543_v4 = vld [vmem:[#allocation23_spill] sm:$0xff] }
 0x332   :  { %2457 = vmatprep.subr.bf16.mxu0 %v5003_v8  ;;  %2498 = vmatprep.subr.bf16.mxu1 %v5005_v9  ;;  %v7544_v8 = vld [vmem:[#allocation24_spill] sm:$0xff]  ;;  %v7545_v9 = vld [vmem:[#allocation25_spill] sm:$0xff] }
 0x334   :  { %2312 = vmatmul.mubr.bf16.vlgmr.msra.gmra.mxu0 %v5813_v10  ;;  %2353 = vmatmul.mubr.bf16.vlgmr.msra.gmra.mxu1 %v5813_v10  ;;  %v7547_v10 = vld [vmem:[#allocation27_spill] sm:$0xff] }
 0x335   :  { %2458 = vmatpush1.bf16.msra.mxu0 %v5009_v16  ;;  %2499 = vmatpush1.bf16.msra.mxu1 %v5012_v19  ;;  %v7548_v16 = vld [vmem:[#allocation28_spill] sm:$0xff]  ;;  %v7549_v19 = vld [vmem:[#allocation29_spill] sm:$0xff] }
 0x336   :  { %2459 = vmatprep.subr.bf16.mxu0 %v5014_v20  ;;  %2500 = vmatprep.subr.bf16.mxu1 %v7540_v60  ;;  %v7550_v20 = vld [vmem:[#allocation30_spill] sm:$0xff]  ;;  %v7551_v60 = vld [vmem:[#allocation31_spill] sm:$0xff] }
 0x339   :  { %2460 = vmatpush1.bf16.msra.mxu0 %v7541_v62  ;;  %2501 = vmatpush1.bf16.msra.mxu1 %v7542_v22  ;;  %v7552_v62 = vld [vmem:[#allocation32_spill] sm:$0xff]  ;;  %v7553_v22 = vld [vmem:[#allocation33_spill] sm:$0xff] }
 0x33a   :  { %2461 = vmatprep.subr.bf16.mxu0 %v7543_v4  ;;  %2502 = vmatprep.subr.bf16.mxu1 %v7544_v8  ;;  %v7554_v4 = vld [vmem:[#allocation34_spill] sm:$0xff]  ;;  %v7555_v8 = vld [vmem:[#allocation35_spill] sm:$0xff] }
 0x33d   :  { %2462 = vmatpush1.bf16.msra.mxu0 %v7545_v9  ;;  %2503 = vmatpush1.bf16.msra.mxu1 %v7546_v59  ;;  %v7556_v9 = vld [vmem:[#allocation36_spill] sm:$0xff]  ;;  %v7557_v59 = vld [vmem:[#allocation37_spill] sm:$0xff] }
 0x33e   :  { %2463 = vmatprep.subr.bf16.mxu0 %v7547_v10  ;;  %2504 = vmatprep.subr.bf16.mxu1 %v7548_v16  ;;  %v7558_v10 = vld [vmem:[#allocation38_spill] sm:$0xff]  ;;  %v7559_v16 = vld [vmem:[#allocation39_spill] sm:$0xff] }
 0x341   :  { %2464 = vmatpush1.bf16.msra.mxu0 %v7549_v19  ;;  %2505 = vmatpush1.bf16.msra.mxu1 %v7550_v20  ;;  %v7560_v19 = vld [vmem:[#allocation40_spill] sm:$0xff]  ;;  %v7561_v20 = vld [vmem:[#allocation41_spill] sm:$0xff] }
 0x342   :  { %2465 = vmatprep.subr.bf16.mxu0 %v7551_v60  ;;  %2506 = vmatprep.subr.bf16.mxu1 %v7552_v62  ;;  %v7562_v60 = vld [vmem:[#allocation42_spill] sm:$0xff]  ;;  %v7563_v62 = vld [vmem:[#allocation43_spill] sm:$0xff] }
 0x345   :  { %2466 = vmatpush1.bf16.msra.mxu0 %v7553_v22  ;;  %2507 = vmatpush1.bf16.msra.mxu1 %v7554_v4  ;;  %v7564_v22 = vld [vmem:[#allocation44_spill] sm:$0xff]  ;;  %v7565_v4 = vld [vmem:[#allocation45_spill] sm:$0xff] }
 0x346   :  { %2467 = vmatprep.subr.bf16.mxu0 %v7555_v8  ;;  %2508 = vmatprep.subr.bf16.mxu1 %v7556_v9  ;;  %v7566_v8 = vld [vmem:[#allocation46_spill] sm:$0xff]  ;;  %v7567_v9 = vld [vmem:[#allocation47_spill] sm:$0xff] }
 0x349   :  { %2468 = vmatpush1.bf16.msra.mxu0 %v7557_v59  ;;  %2509 = vmatpush1.bf16.msra.mxu1 %v7558_v10  ;;  %v7568_v59 = vld [vmem:[#allocation48_spill] sm:$0xff]  ;;  %v7569_v10 = vld [vmem:[#allocation49_spill] sm:$0xff] }
 0x34a   :  { %2469 = vmatprep.subr.bf16.mxu0 %v7559_v16  ;;  %2510 = vmatprep.subr.bf16.mxu1 %v7560_v19  ;;  %v7570_v16 = vld [vmem:[#allocation50_spill] sm:$0xff]  ;;  %v7571_v19 = vld [vmem:[#allocation51_spill] sm:$0xff] }
 0x34d   :  { %2470 = vmatpush1.bf16.msra.mxu0 %v7561_v20  ;;  %2511 = vmatpush1.bf16.msra.mxu1 %v7562_v60  ;;  %v7572_v20 = vld [vmem:[#allocation52_spill] sm:$0xff]  ;;  %v7573_v60 = vld [vmem:[#allocation53_spill] sm:$0xff] }
 0x34e   :  { %2471 = vmatprep.subr.bf16.mxu0 %v7563_v62  ;;  %2512 = vmatprep.subr.bf16.mxu1 %v7564_v22  ;;  %v7574_v62 = vld [vmem:[#allocation54_spill] sm:$0xff]  ;;  %v7575_v22 = vld [vmem:[#allocation55_spill] sm:$0xff] }
 0x351   :  { %2472 = vmatpush1.bf16.msra.mxu0 %v7565_v4  ;;  %2513 = vmatpush1.bf16.msra.mxu1 %v7566_v8  ;;  %v7576_v4 = vld [vmem:[#allocation56_spill] sm:$0xff]  ;;  %v7577_v8 = vld [vmem:[#allocation57_spill] sm:$0xff] }
 0x352   :  { %2473 = vmatprep.subr.bf16.mxu0 %v7567_v9  ;;  %2514 = vmatprep.subr.bf16.mxu1 %v7568_v59  ;;  %v7578_v9 = vld [vmem:[#allocation58_spill] sm:$0xff]  ;;  %v7579_v59 = vld [vmem:[#allocation59_spill] sm:$0xff] }
 0x355   :  { %2474 = vmatpush2.bf16.msra.mxu0 %v7569_v10  ;;  %2515 = vmatpush2.bf16.msra.mxu1 %v7570_v16  ;;  %v7580_v10 = vld [vmem:[#allocation60_spill] sm:$0xff]  ;;  %v7581_v16 = vld [vmem:[#allocation61_spill] sm:$0xff] }
 0x356   :  { %2475 = vmatprep.subr.bf16.mxu0 %v7571_v19  ;;  %2516 = vmatprep.subr.bf16.mxu1 %v7572_v20  ;;  %v7582_v19 = vld [vmem:[#allocation62_spill] sm:$0xff]  ;;  %v7583_v20 = vld [vmem:[#allocation63_spill] sm:$0xff] }
 0x359   :  { %2476 = vmatpush2.bf16.msra.mxu0 %v7573_v60  ;;  %2517 = vmatpush2.bf16.msra.mxu1 %v7574_v62  ;;  %v7584_v60 = vld [vmem:[#allocation64_spill] sm:$0xff]  ;;  %v7585_v62 = vld [vmem:[#allocation65_spill] sm:$0xff] }
 0x35a   :  { %2477 = vmatprep.subr.bf16.mxu0 %v7575_v22  ;;  %2518 = vmatprep.subr.bf16.mxu1 %v7576_v4  ;;  %v7586_v22 = vld [vmem:[#allocation66_spill] sm:$0xff]  ;;  %v7587_v4 = vld [vmem:[#allocation67_spill] sm:$0xff] }
 0x35d   :  { %2478 = vmatpush2.bf16.msra.mxu0 %v7577_v8  ;;  %2519 = vmatpush2.bf16.msra.mxu1 %v7578_v9  ;;  %v7588_v8 = vld [vmem:[#allocation68_spill] sm:$0xff]  ;;  %v7589_v9 = vld [vmem:[#allocation69_spill] sm:$0xff] }
 0x35e   :  { %2479 = vmatprep.subr.bf16.mxu0 %v7579_v59  ;;  %2520 = vmatprep.subr.bf16.mxu1 %v7580_v10  ;;  %v7590_v59 = vld [vmem:[#allocation70_spill] sm:$0xff]  ;;  %v7591_v10 = vld [vmem:[#allocation71_spill] sm:$0xff] }
 0x361   :  { %2480 = vmatpush2.bf16.msra.mxu0 %v7581_v16  ;;  %2521 = vmatpush2.bf16.msra.mxu1 %v7582_v19  ;;  %v7592_v16 = vld [vmem:[#allocation72_spill] sm:$0xff]  ;;  %v7593_v19 = vld [vmem:[#allocation73_spill] sm:$0xff] }
 0x362   :  { %2481 = vmatprep.subr.bf16.mxu0 %v7583_v20  ;;  %2522 = vmatprep.subr.bf16.mxu1 %v7584_v60  ;;  %v7594_v20 = vld [vmem:[#allocation74_spill] sm:$0xff]  ;;  %v7595_v60 = vld [vmem:[#allocation75_spill] sm:$0xff] }
 0x365   :  { %2482 = vmatpush2.bf16.msra.mxu0 %v7585_v62  ;;  %2523 = vmatpush2.bf16.msra.mxu1 %v7586_v22  ;;  %v7596_v62 = vld [vmem:[#allocation76_spill] sm:$0xff]  ;;  %v7597_v22 = vld [vmem:[#allocation77_spill] sm:$0xff] }
 0x366   :  { %2483 = vmatprep.subr.bf16.mxu0 %v7587_v4  ;;  %2524 = vmatprep.subr.bf16.mxu1 %v7588_v8  ;;  %v7598_v4 = vld [vmem:[#allocation78_spill] sm:$0xff]  ;;  %v7599_v8 = vld [vmem:[#allocation79_spill] sm:$0xff] }
 0x369   :  { %2484 = vmatpush2.bf16.msra.mxu0 %v7589_v9  ;;  %2525 = vmatpush2.bf16.msra.mxu1 %v7590_v59  ;;  %v7600_v9 = vld [vmem:[#allocation80_spill] sm:$0xff] }
 0x36a   :  { %2485 = vmatprep.subr.bf16.mxu0 %v7591_v10  ;;  %2526 = vmatprep.subr.bf16.mxu1 %v7592_v16 }
 0x36d   :  { %2486 = vmatpush2.bf16.msra.mxu0 %v7593_v19  ;;  %2527 = vmatpush2.bf16.msra.mxu1 %v7594_v20 }
 0x36e   :  { %2487 = vmatprep.subr.bf16.mxu0 %v7595_v60  ;;  %2528 = vmatprep.subr.bf16.mxu1 %v7596_v62  ;;  %v2170_v62 = vcombine.high %v7601_v61, %v7601_v61 }
 0x371   :  { %2488 = vmatpush2.bf16.msra.mxu0 %v7597_v22  ;;  %2529 = vmatpush2.bf16.msra.mxu1 %v7598_v4  ;;  %v7602_v22 = vld [vmem:[#allocation148_spill] sm:$0xff] }
 0x372   :  { %2539 = vmatprep.subr.bf16.mxu0 %v7599_v8  ;;  %2580 = vmatprep.subr.bf16.mxu1 %v7600_v9  ;;  %v2171_v8 = vcombine.high %v7602_v22, %v7602_v22 }
 0x3b4   :  { %v2231_v59 = vpop.f32.mrf.mxu0  ;;  %v2272_v10 = vpop.f32.mrf.mxu1 }
 0x3b5   :  { %v2232_v60 = vadd.f32 %v2231_v59, %v7601_v61  ;;  %v2273_v33 = vadd.f32 %v2272_v10, %v7602_v22 }
 0x3b6   :  { %v2233_v34 = vpop.f32.mrf.mxu0  ;;  %v2274_v16 = vpop.f32.mrf.mxu1 }
 0x3b7   :  { %v2234_v4 = vadd.f32 %v2233_v34, %v2170_v62  ;;  %v4400_v9 = vmul.f32 -1.442695, %v2232_v60  ;;  %v2275_v13 = vadd.f32 %v2274_v16, %v2171_v8  ;;  %v4402_v7 = vmul.f32 -1.442695, %v2273_v33  ;;  %v7603_v60 = vld [vmem:[#allocation161_spill] sm:$0xff]  ;;  %v7604_v16 = vld [vmem:[#allocation162_spill] sm:$0xff] }
 0x3b8   :  { %v2235_v5 = vpop.f32.mrf.mxu0  ;;  %v2276_v19 = vpop.f32.mrf.mxu1  ;;  %v2187_v8 = vcombine.high %v7603_v60, %v7603_v60 }
 0x3b9   :  { %v4401_v21 = vmul.f32 -1.442695, %v2234_v4  ;;  %4607 = vpow2.f32 %v4400_v9  ;;  %v4403_v5 = vmul.f32 -1.442695, %v2275_v13 }
 0x3ba   :  { %v2236_v37 = vpop.f32.mrf.mxu0  ;;  %v2277_v20 = vpop.f32.mrf.mxu1  ;;  %4609 = vpow2.f32 %v4402_v7  ;;  %v2188_v7 = vcombine.high %v7604_v16, %v7604_v16 }
 0x3bb   :  { %4611 = vpow2.f32 %v4401_v21 }
 0x3bc   :  { %4613 = vpow2.f32 %v4403_v5 }
 0x3c6   :  { %v4608_v19 = vpop.eup %4607 }
 0x3c7   :  { %v4610_v20 = vpop.eup %4609  ;;  %v2367_v59 = vadd.f32 1.0, %v4608_v19 }
 0x3c8   :  { %v4612_v37 = vpop.eup %4611  ;;  %v2379_v11 = vadd.f32 1.0, %v4610_v20 }
 0x3c9   :  { %v4614_v61 = vpop.eup %4613  ;;  %v2368_v10 = vadd.f32 1.0, %v4612_v37  ;;  %4615 = vrcp.f32 %v2367_v59 }
 0x3ca   :  { %v2380_v34 = vadd.f32 1.0, %v4614_v61  ;;  %4617 = vrcp.f32 %v2379_v11 }
 0x3cb   :  { %4619 = vrcp.f32 %v2368_v10 }
 0x3f4   :  { %v2313_v62 = vpop.f32.mrf.mxu0  ;;  %v2354_v22 = vpop.f32.mrf.mxu1 }
 0x3f5   :  { %v2314_v9 = vadd.f32 %v2313_v62, %v7603_v60  ;;  %v2355_v21 = vadd.f32 %v2354_v22, %v7604_v16  ;;  %v4616_v62 = vpop.eup %4615 }
 0x3f6   :  { %v2315_v33 = vpop.f32.mrf.mxu0  ;;  %v2356_v4 = vpop.f32.mrf.mxu1 }
 0x3f7   :  { %4621 = vtanh.f32 %v2314_v9  ;;  %v4404_v13 = vmul.f32 -1.442695, %v2355_v21  ;;  %v2316_v5 = vadd.f32 %v2315_v33, %v2187_v8  ;;  %v2357_v19 = vadd.f32 %v2356_v4, %v2188_v7  ;;  %v4618_v22 = vpop.eup %4617 }
 0x3f8   :  { %4623 = vrcp.f32 %v2380_v34  ;;  %v2317_v20 = vpop.f32.mrf.mxu0  ;;  %v2358_v37 = vpop.f32.mrf.mxu1  ;;  %v2399_v24 = vmul.f32 %v4618_v22, %v5803_v25  ;;  %v7606_v22 = vld [vmem:[#allocation103_spill] sm:$0xff] }
 0x3f9   :  { %4625 = vpow2.f32 %v4404_v13  ;;  %v4405_v59 = vmul.f32 -1.442695, %v2357_v19  ;;  %v4620_v60 = vpop.eup %4619 }
 0x3fa   :  { %4627 = vtanh.f32 %v2316_v5  ;;  %v2318_v11 = vpop.f32.mrf.mxu0  ;;  %v2359_v61 = vpop.f32.mrf.mxu1 }
 0x3fb   :  { %4629 = vpow2.f32 %v4405_v59 }
 0x404   :  { %v4622_v16 = vpop.eup %4621 }
 0x405   :  { %v4624_v10 = vpop.eup %4623  ;;  %v2401_v9 = vmul.f32 %v4622_v16, %v4616_v62  ;;  %v7605_v62 = vld [vmem:[#allocation102_spill] sm:$0xff]  ;;  %v7608_v16 = vld [vmem:[#allocation105_spill] sm:$0xff] }
 0x406   :  { %v4626_v21 = vpop.eup %4625  ;;  %v2400_v4 = vmul.f32 %v4624_v10, %v5806_v43  ;;  %v7609_v10 = vld [vmem:[#allocation106_spill] sm:$0xff] }
 0x407   :  { %v4628_v8 = vpop.eup %4627  ;;  %v5960_v7 = vadd.f32 %v2401_v9, %v2399_v24  ;;  %v2393_v34 = vadd.f32 1.0, %v4626_v21  ;;  %v7610_v9 = vld [vmem:[#allocation110_spill] sm:$0xff]  ;;  %v7611_v21 = vld [vmem:[#allocation128_spill] sm:$0xff] }
 0x408   :  { %v4630_v33 = vpop.eup %4629  ;;  %v2402_v13 = vmul.f32 %v4628_v8, %v4620_v60  ;;  %v7607_v60 = vld [vmem:[#allocation104_spill] sm:$0xff]  ;;  %v7612_v8 = vld [vmem:[#allocation129_spill] sm:$0xff] }
 0x409   :  { %4631 = vtanh.f32 %v5960_v7  ;;  %v2394_v5 = vadd.f32 1.0, %v4630_v33  ;;  %v7614_v33 = vld [vmem:[#allocation131_spill] sm:$0xff] }
 0x40a   :  { %4633 = vrcp.f32 %v2393_v34  ;;  %v5964_v19 = vadd.f32 %v2402_v13, %v2400_v4  ;;  %v7613_v34 = vld [vmem:[#allocation130_spill] sm:$0xff]  ;;  %v7615_v4 = vld [vmem:[#allocation132_spill] sm:$0xff]  ;;  %v7616_v13 = vld [vmem:[#allocation133_spill] sm:$0xff] }
 0x40b   :  { %4635 = vrcp.f32 %v2394_v5  ;;  %v7617_v5 = vld [vmem:[#allocation134_spill] sm:$0xff] }
 0x40c   :  { %4637 = vtanh.f32 %v5964_v19 }
 0x416   :  { %v4632_v25 = vpop.eup %4631 }
 0x417   :  { %v4634_v20 = vpop.eup %4633 }
 0x418   :  { %v4636_v37 = vpop.eup %4635  ;;  %v2407_v24 = vmul.f32 %v4634_v20, %v4632_v25  ;;  %v7618_v25 = vld [vmem:[#allocation135_spill] sm:$0xff]  ;;  %v7619_v20 = vld [vmem:[#allocation136_spill] sm:$0xff] }
 0x419   :  { %v4638_v59 = vpop.eup %4637 }
 0x41a   :  { %v5967_v11 = vmul.f32 %v4638_v59, %v4636_v37  ;;  %v5971_v61 = vpack.c.bf16 %v2407_v24, %v2407_v24  ;;  %v7620_v37 = vld [vmem:[#allocation137_spill] sm:$0xff]  ;;  %v7621_v59 = vld [vmem:[#allocation138_spill] sm:$0xff]  ;;  %v7622_v24 = vld [vmem:[#allocation139_spill] sm:$0xff] }
 0x41c   :  { %v2412_v43 = vpack.c.bf16 %v5967_v11, %v5967_v11 }
 0x41e   :  { %2489 = vmatprep.mubr.bf16.mxu0 %v2412_v43  ;;  %2530 = vmatprep.mubr.bf16.mxu1 %v2412_v43 }
 0x41f   :  { %2490 = vmatmul.mubr.bf16.vlgmr.msra.gmra.mxu0 %v5971_v61  ;;  %2531 = vmatmul.mubr.bf16.vlgmr.msra.gmra.mxu1 %v5971_v61 }
 0x420   :  { %2540 = vmatpush1.bf16.msra.mxu0 %v7419_v56  ;;  %2581 = vmatpush1.bf16.msra.mxu1 %v7420_v30 }
 0x421   :  { %2571 = vmatprep.mubr.bf16.mxu0 %v2412_v43  ;;  %2612 = vmatprep.mubr.bf16.mxu1 %v2412_v43  ;;  %v7623_v43 = vld [vmem:[#allocation140_spill] sm:$0xff] }
 0x422   :  { %2541 = vmatprep.subr.bf16.mxu0 %v7421_v27  ;;  %2582 = vmatprep.subr.bf16.mxu1 %v7422_v52 }
 0x424   :  { %2542 = vmatpush1.bf16.msra.mxu0 %v7423_v18  ;;  %2583 = vmatpush1.bf16.msra.mxu1 %v7424_v58 }
 0x425   :  { %2543 = vmatprep.subr.bf16.mxu0 %v7425_v15  ;;  %2584 = vmatprep.subr.bf16.mxu1 %v7426_v26 }
 0x428   :  { %2544 = vmatpush1.bf16.msra.mxu0 %v7427_v12  ;;  %2585 = vmatpush1.bf16.msra.mxu1 %v7428_v54 }
 0x429   :  { %2545 = vmatprep.subr.bf16.mxu0 %v7429_v6  ;;  %2586 = vmatprep.subr.bf16.mxu1 %v7513_v57 }
 0x42c   :  { %2546 = vmatpush1.bf16.msra.mxu0 %v7514_v32  ;;  %2587 = vmatpush1.bf16.msra.mxu1 %v7515_v45 }
 0x42d   :  { %2547 = vmatprep.subr.bf16.mxu0 %v7516_v36  ;;  %2588 = vmatprep.subr.bf16.mxu1 %v7517_v42 }
 0x430   :  { %2548 = vmatpush1.bf16.msra.mxu0 %v7518_v47  ;;  %2589 = vmatpush1.bf16.msra.mxu1 %v7519_v31 }
 0x431   :  { %2549 = vmatprep.subr.bf16.mxu0 %v7520_v41  ;;  %2590 = vmatprep.subr.bf16.mxu1 %v7521_v29 }
 0x434   :  { %2550 = vmatpush1.bf16.msra.mxu0 %v7522_v28  ;;  %2591 = vmatpush1.bf16.msra.mxu1 %v7605_v62 }
 0x435   :  { %2551 = vmatprep.subr.bf16.mxu0 %v7606_v22  ;;  %2592 = vmatprep.subr.bf16.mxu1 %v7607_v60 }
 0x438   :  { %2552 = vmatpush1.bf16.msra.mxu0 %v7608_v16  ;;  %2593 = vmatpush1.bf16.msra.mxu1 %v7609_v10 }
 0x439   :  { %2553 = vmatprep.subr.bf16.mxu0 %v7528_v1  ;;  %2594 = vmatprep.subr.bf16.mxu1 %v7529_v40 }
 0x43c   :  { %2554 = vmatpush1.bf16.msra.mxu0 %v7530_v35  ;;  %2595 = vmatpush1.bf16.msra.mxu1 %v7610_v9 }
 0x43d   :  { %2555 = vmatprep.subr.bf16.mxu0 %v7532_v17  ;;  %2596 = vmatprep.subr.bf16.mxu1 %v7533_v23 }
 0x440   :  { %2556 = vmatpush2.bf16.msra.mxu0 %v7534_v39  ;;  %2597 = vmatpush2.bf16.msra.mxu1 %v7535_v48 }
 0x441   :  { %2557 = vmatprep.subr.bf16.mxu0 %v7536_v49  ;;  %2598 = vmatprep.subr.bf16.mxu1 %v7537_v50 }
 0x444   :  { %2558 = vmatpush2.bf16.msra.mxu0 %v7538_v46  ;;  %2599 = vmatpush2.bf16.msra.mxu1 %v7456_v63 }
 0x445   :  { %2559 = vmatprep.subr.bf16.mxu0 %v7457_v2  ;;  %2600 = vmatprep.subr.bf16.mxu1 %v7458_v3 }
 0x448   :  { %2560 = vmatpush2.bf16.msra.mxu0 %v7539_v0  ;;  %2601 = vmatpush2.bf16.msra.mxu1 %v7460_v38 }
 0x449   :  { %2561 = vmatprep.subr.bf16.mxu0 %v7461_v14  ;;  %2602 = vmatprep.subr.bf16.mxu1 %v7462_v51 }
 0x44c   :  { %2562 = vmatpush2.bf16.msra.mxu0 %v7463_v53  ;;  %2603 = vmatpush2.bf16.msra.mxu1 %v7464_v44 }
 0x44d   :  { %2563 = vmatprep.subr.bf16.mxu0 %v7465_v55  ;;  %2604 = vmatprep.subr.bf16.mxu1 %v7611_v21  ;;  %v7692_v55 = vld [vmem:[#allocation149_spill] sm:$0xff] }
 0x450   :  { %2564 = vmatpush2.bf16.msra.mxu0 %v7612_v8  ;;  %2605 = vmatpush2.bf16.msra.mxu1 %v7613_v34  ;;  %v7624_v34 = vld [vmem:[#allocation141_spill] sm:$0xff] }
 0x451   :  { %2565 = vmatprep.subr.bf16.mxu0 %v7614_v33  ;;  %2606 = vmatprep.subr.bf16.mxu1 %v7615_v4  ;;  %v7625_v33 = vld [vmem:[#allocation142_spill] sm:$0xff]  ;;  %v7626_v4 = vld [vmem:[#allocation15_spill] sm:$0xff] }
 0x454   :  { %2566 = vmatpush2.bf16.msra.mxu0 %v7616_v13  ;;  %2607 = vmatpush2.bf16.msra.mxu1 %v7617_v5  ;;  %v7627_v13 = vld [vmem:[#allocation16_spill] sm:$0xff] }
 0x455   :  { %2567 = vmatprep.subr.bf16.mxu0 %v7618_v25  ;;  %2608 = vmatprep.subr.bf16.mxu1 %v7619_v20  ;;  %v7628_v20 = vld [vmem:[#allocation17_spill] sm:$0xff]  ;;  %v7637_v25 = vld [vmem:[#allocation26_spill] sm:$0xff] }
 0x458   :  { %2568 = vmatpush2.bf16.msra.mxu0 %v7620_v37  ;;  %2609 = vmatpush2.bf16.msra.mxu1 %v7621_v59  ;;  %v7629_v37 = vld [vmem:[#allocation18_spill] sm:$0xff]  ;;  %v7630_v59 = vld [vmem:[#allocation19_spill] sm:$0xff] }
 0x459   :  { %2569 = vmatprep.subr.bf16.mxu0 %v7622_v24  ;;  %2610 = vmatprep.subr.bf16.mxu1 %v7623_v43  ;;  %v7631_v24 = vld [vmem:[#allocation20_spill] sm:$0xff]  ;;  %v7632_v43 = vld [vmem:[#allocation21_spill] sm:$0xff] }
 0x45c   :  { %2570 = vmatpush2.bf16.msra.mxu0 %v7624_v34  ;;  %2611 = vmatpush2.bf16.msra.mxu1 %v7625_v33  ;;  %v7633_v34 = vld [vmem:[#allocation22_spill] sm:$0xff]  ;;  %v7634_v33 = vld [vmem:[#allocation23_spill] sm:$0xff] }
 0x45d   :  { %2717 = vmatprep.subr.bf16.mxu0 %v7626_v4  ;;  %2758 = vmatprep.subr.bf16.mxu1 %v7627_v13  ;;  %v7635_v4 = vld [vmem:[#allocation24_spill] sm:$0xff]  ;;  %v7636_v13 = vld [vmem:[#allocation25_spill] sm:$0xff] }
 0x45f   :  { %2572 = vmatmul.mubr.bf16.vlgmr.msra.gmra.mxu0 %v5971_v61  ;;  %2613 = vmatmul.mubr.bf16.vlgmr.msra.gmra.mxu1 %v5971_v61  ;;  %v7638_v61 = vld [vmem:[#allocation27_spill] sm:$0xff] }
 0x460   :  { %2718 = vmatpush1.bf16.msra.mxu0 %v7628_v20  ;;  %2759 = vmatpush1.bf16.msra.mxu1 %v7629_v37  ;;  %v7639_v20 = vld [vmem:[#allocation28_spill] sm:$0xff]  ;;  %v7640_v37 = vld [vmem:[#allocation29_spill] sm:$0xff] }
 0x461   :  { %2719 = vmatprep.subr.bf16.mxu0 %v7630_v59  ;;  %2760 = vmatprep.subr.bf16.mxu1 %v7631_v24  ;;  %v7641_v59 = vld [vmem:[#allocation30_spill] sm:$0xff]  ;;  %v7642_v24 = vld [vmem:[#allocation31_spill] sm:$0xff] }
 0x464   :  { %2720 = vmatpush1.bf16.msra.mxu0 %v7632_v43  ;;  %2761 = vmatpush1.bf16.msra.mxu1 %v7633_v34  ;;  %v7643_v43 = vld [vmem:[#allocation32_spill] sm:$0xff]  ;;  %v7644_v34 = vld [vmem:[#allocation33_spill] sm:$0xff] }
 0x465   :  { %2721 = vmatprep.subr.bf16.mxu0 %v7634_v33  ;;  %2762 = vmatprep.subr.bf16.mxu1 %v7635_v4  ;;  %v7645_v33 = vld [vmem:[#allocation34_spill] sm:$0xff]  ;;  %v7646_v4 = vld [vmem:[#allocation35_spill] sm:$0xff] }
 0x468   :  { %2722 = vmatpush1.bf16.msra.mxu0 %v7636_v13  ;;  %2763 = vmatpush1.bf16.msra.mxu1 %v7637_v25  ;;  %v7647_v13 = vld [vmem:[#allocation36_spill] sm:$0xff]  ;;  %v7648_v25 = vld [vmem:[#allocation37_spill] sm:$0xff] }
 0x469   :  { %2723 = vmatprep.subr.bf16.mxu0 %v7638_v61  ;;  %2764 = vmatprep.subr.bf16.mxu1 %v7639_v20  ;;  %v7649_v61 = vld [vmem:[#allocation38_spill] sm:$0xff]  ;;  %v7650_v20 = vld [vmem:[#allocation39_spill] sm:$0xff] }
 0x46c   :  { %2724 = vmatpush1.bf16.msra.mxu0 %v7640_v37  ;;  %2765 = vmatpush1.bf16.msra.mxu1 %v7641_v59  ;;  %v7651_v37 = vld [vmem:[#allocation40_spill] sm:$0xff]  ;;  %v7652_v59 = vld [vmem:[#allocation41_spill] sm:$0xff] }
 0x46d   :  { %2725 = vmatprep.subr.bf16.mxu0 %v7642_v24  ;;  %2766 = vmatprep.subr.bf16.mxu1 %v7643_v43  ;;  %v7653_v24 = vld [vmem:[#allocation42_spill] sm:$0xff]  ;;  %v7654_v43 = vld [vmem:[#allocation43_spill] sm:$0xff] }
 0x470   :  { %2726 = vmatpush1.bf16.msra.mxu0 %v7644_v34  ;;  %2767 = vmatpush1.bf16.msra.mxu1 %v7645_v33  ;;  %v7655_v34 = vld [vmem:[#allocation44_spill] sm:$0xff]  ;;  %v7656_v33 = vld [vmem:[#allocation45_spill] sm:$0xff] }
 0x471   :  { %2727 = vmatprep.subr.bf16.mxu0 %v7646_v4  ;;  %2768 = vmatprep.subr.bf16.mxu1 %v7647_v13  ;;  %v7657_v4 = vld [vmem:[#allocation46_spill] sm:$0xff]  ;;  %v7658_v13 = vld [vmem:[#allocation47_spill] sm:$0xff] }
 0x474   :  { %2728 = vmatpush1.bf16.msra.mxu0 %v7648_v25  ;;  %2769 = vmatpush1.bf16.msra.mxu1 %v7649_v61  ;;  %v7659_v25 = vld [vmem:[#allocation48_spill] sm:$0xff]  ;;  %v7660_v61 = vld [vmem:[#allocation49_spill] sm:$0xff] }
 0x475   :  { %2729 = vmatprep.subr.bf16.mxu0 %v7650_v20  ;;  %2770 = vmatprep.subr.bf16.mxu1 %v7651_v37  ;;  %v7661_v20 = vld [vmem:[#allocation50_spill] sm:$0xff]  ;;  %v7662_v37 = vld [vmem:[#allocation51_spill] sm:$0xff] }
 0x478   :  { %2730 = vmatpush1.bf16.msra.mxu0 %v7652_v59  ;;  %2771 = vmatpush1.bf16.msra.mxu1 %v7653_v24  ;;  %v7663_v59 = vld [vmem:[#allocation52_spill] sm:$0xff]  ;;  %v7664_v24 = vld [vmem:[#allocation53_spill] sm:$0xff] }
 0x479   :  { %2731 = vmatprep.subr.bf16.mxu0 %v7654_v43  ;;  %2772 = vmatprep.subr.bf16.mxu1 %v7655_v34  ;;  %v7665_v43 = vld [vmem:[#allocation54_spill] sm:$0xff]  ;;  %v7666_v34 = vld [vmem:[#allocation55_spill] sm:$0xff] }
 0x47c   :  { %2732 = vmatpush1.bf16.msra.mxu0 %v7656_v33  ;;  %2773 = vmatpush1.bf16.msra.mxu1 %v7657_v4  ;;  %v7667_v33 = vld [vmem:[#allocation56_spill] sm:$0xff]  ;;  %v7668_v4 = vld [vmem:[#allocation57_spill] sm:$0xff] }
 0x47d   :  { %2733 = vmatprep.subr.bf16.mxu0 %v7658_v13  ;;  %2774 = vmatprep.subr.bf16.mxu1 %v7659_v25  ;;  %v7669_v13 = vld [vmem:[#allocation58_spill] sm:$0xff]  ;;  %v7670_v25 = vld [vmem:[#allocation59_spill] sm:$0xff] }
 0x480   :  { %2734 = vmatpush2.bf16.msra.mxu0 %v7660_v61  ;;  %2775 = vmatpush2.bf16.msra.mxu1 %v7661_v20  ;;  %v7671_v61 = vld [vmem:[#allocation60_spill] sm:$0xff]  ;;  %v7672_v20 = vld [vmem:[#allocation61_spill] sm:$0xff] }
 0x481   :  { %2735 = vmatprep.subr.bf16.mxu0 %v7662_v37  ;;  %2776 = vmatprep.subr.bf16.mxu1 %v7663_v59  ;;  %v7673_v37 = vld [vmem:[#allocation62_spill] sm:$0xff]  ;;  %v7674_v59 = vld [vmem:[#allocation63_spill] sm:$0xff] }
 0x484   :  { %2736 = vmatpush2.bf16.msra.mxu0 %v7664_v24  ;;  %2777 = vmatpush2.bf16.msra.mxu1 %v7665_v43  ;;  %v7675_v24 = vld [vmem:[#allocation64_spill] sm:$0xff]  ;;  %v7676_v43 = vld [vmem:[#allocation65_spill] sm:$0xff] }
 0x485   :  { %2737 = vmatprep.subr.bf16.mxu0 %v7666_v34  ;;  %2778 = vmatprep.subr.bf16.mxu1 %v7667_v33  ;;  %v7677_v34 = vld [vmem:[#allocation66_spill] sm:$0xff]  ;;  %v7678_v33 = vld [vmem:[#allocation67_spill] sm:$0xff] }
 0x488   :  { %2738 = vmatpush2.bf16.msra.mxu0 %v7668_v4  ;;  %2779 = vmatpush2.bf16.msra.mxu1 %v7669_v13  ;;  %v7679_v4 = vld [vmem:[#allocation68_spill] sm:$0xff]  ;;  %v7680_v13 = vld [vmem:[#allocation69_spill] sm:$0xff] }
 0x489   :  { %2739 = vmatprep.subr.bf16.mxu0 %v7670_v25  ;;  %2780 = vmatprep.subr.bf16.mxu1 %v7671_v61  ;;  %v7681_v25 = vld [vmem:[#allocation70_spill] sm:$0xff]  ;;  %v7682_v61 = vld [vmem:[#allocation71_spill] sm:$0xff] }
 0x48c   :  { %2740 = vmatpush2.bf16.msra.mxu0 %v7672_v20  ;;  %2781 = vmatpush2.bf16.msra.mxu1 %v7673_v37  ;;  %v7683_v20 = vld [vmem:[#allocation72_spill] sm:$0xff]  ;;  %v7684_v37 = vld [vmem:[#allocation73_spill] sm:$0xff] }
 0x48d   :  { %2741 = vmatprep.subr.bf16.mxu0 %v7674_v59  ;;  %2782 = vmatprep.subr.bf16.mxu1 %v7675_v24  ;;  %v7685_v59 = vld [vmem:[#allocation74_spill] sm:$0xff]  ;;  %v7686_v24 = vld [vmem:[#allocation75_spill] sm:$0xff] }
 0x490   :  { %2742 = vmatpush2.bf16.msra.mxu0 %v7676_v43  ;;  %2783 = vmatpush2.bf16.msra.mxu1 %v7677_v34  ;;  %v7687_v43 = vld [vmem:[#allocation76_spill] sm:$0xff]  ;;  %v7688_v34 = vld [vmem:[#allocation77_spill] sm:$0xff] }
 0x491   :  { %2743 = vmatprep.subr.bf16.mxu0 %v7678_v33  ;;  %2784 = vmatprep.subr.bf16.mxu1 %v7679_v4  ;;  %v7689_v33 = vld [vmem:[#allocation78_spill] sm:$0xff]  ;;  %v7690_v4 = vld [vmem:[#allocation79_spill] sm:$0xff] }
 0x494   :  { %2744 = vmatpush2.bf16.msra.mxu0 %v7680_v13  ;;  %2785 = vmatpush2.bf16.msra.mxu1 %v7681_v25  ;;  %v7691_v13 = vld [vmem:[#allocation80_spill] sm:$0xff] }
 0x495   :  { %2745 = vmatprep.subr.bf16.mxu0 %v7682_v61  ;;  %2786 = vmatprep.subr.bf16.mxu1 %v7683_v20 }
 0x498   :  { %2746 = vmatpush2.bf16.msra.mxu0 %v7684_v37  ;;  %2787 = vmatpush2.bf16.msra.mxu1 %v7685_v59 }
 0x499   :  { %2747 = vmatprep.subr.bf16.mxu0 %v7686_v24  ;;  %2788 = vmatprep.subr.bf16.mxu1 %v7687_v43  ;;  %v2430_v43 = vcombine.high %v7692_v55, %v7692_v55 }
 0x49c   :  { %2748 = vmatpush2.bf16.msra.mxu0 %v7688_v34  ;;  %2789 = vmatpush2.bf16.msra.mxu1 %v7689_v33  ;;  %v7693_v34 = vld [vmem:[#allocation150_spill] sm:$0xff] }
 0x49d   :  { %2799 = vmatprep.subr.bf16.mxu0 %v7690_v4  ;;  %2840 = vmatprep.subr.bf16.mxu1 %v7691_v13  ;;  %v2431_v4 = vcombine.high %v7693_v34, %v7693_v34 }
 0x4df   :  { %v2491_v25 = vpop.f32.mrf.mxu0  ;;  %v2532_v61 = vpop.f32.mrf.mxu1 }
 0x4e0   :  { %v2492_v24 = vadd.f32 %v2491_v25, %v7692_v55  ;;  %v2533_v44 = vadd.f32 %v2532_v61, %v7693_v34 }
 0x4e1   :  { %v2493_v5 = vpop.f32.mrf.mxu0  ;;  %v2534_v20 = vpop.f32.mrf.mxu1 }
 0x4e2   :  { %v2494_v33 = vadd.f32 %v2493_v5, %v2430_v43  ;;  %v4406_v13 = vmul.f32 -1.442695, %v2492_v24  ;;  %v2535_v53 = vadd.f32 %v2534_v20, %v2431_v4  ;;  %v4408_v51 = vmul.f32 -1.442695, %v2533_v44  ;;  %v7694_v24 = vld [vmem:[#allocation163_spill] sm:$0xff] }
 0x4e3   :  { %v2495_v8 = vpop.f32.mrf.mxu0  ;;  %v2536_v37 = vpop.f32.mrf.mxu1  ;;  %v2447_v44 = vcombine.high %v7694_v24, %v7694_v24 }
 0x4e4   :  { %v4407_v14 = vmul.f32 -1.442695, %v2494_v33  ;;  %4639 = vpow2.f32 %v4406_v13  ;;  %v4409_v8 = vmul.f32 -1.442695, %v2535_v53 }
 0x4e5   :  { %v2496_v21 = vpop.f32.mrf.mxu0  ;;  %v2537_v59 = vpop.f32.mrf.mxu1  ;;  %4641 = vpow2.f32 %v4408_v51  ;;  %v7695_v51 = vld [vmem:[#allocation164_spill] sm:$0xff] }
 0x4e6   :  { %4643 = vpow2.f32 %v4407_v14  ;;  %v2448_v33 = vcombine.high %v7695_v51, %v7695_v51 }
 0x4e7   :  { %4645 = vpow2.f32 %v4409_v8 }
 0x4f1   :  { %v4640_v21 = vpop.eup %4639 }
 0x4f2   :  { %v4642_v25 = vpop.eup %4641  ;;  %v2627_v59 = vadd.f32 1.0, %v4640_v21 }
 0x4f3   :  { %v4644_v37 = vpop.eup %4643  ;;  %v2639_v38 = vadd.f32 1.0, %v4642_v25 }
 0x4f4   :  { %v4646_v55 = vpop.eup %4645  ;;  %v2628_v61 = vadd.f32 1.0, %v4644_v37  ;;  %4647 = vrcp.f32 %v2627_v59 }
 0x4f5   :  { %v2640_v5 = vadd.f32 1.0, %v4646_v55  ;;  %4649 = vrcp.f32 %v2639_v38 }
 0x4f6   :  { %4651 = vrcp.f32 %v2628_v61 }
 0x51f   :  { %v2573_v43 = vpop.f32.mrf.mxu0  ;;  %v2614_v34 = vpop.f32.mrf.mxu1 }
 0x520   :  { %v2574_v53 = vadd.f32 %v2573_v43, %v7694_v24  ;;  %v2615_v14 = vadd.f32 %v2614_v34, %v7695_v51  ;;  %v4648_v43 = vpop.eup %4647 }
 0x521   :  { %v2575_v4 = vpop.f32.mrf.mxu0  ;;  %v2616_v13 = vpop.f32.mrf.mxu1 }
 0x522   :  { %4653 = vtanh.f32 %v2574_v53  ;;  %v4410_v20 = vmul.f32 -1.442695, %v2615_v14  ;;  %v2576_v8 = vadd.f32 %v2575_v4, %v2447_v44  ;;  %v2617_v21 = vadd.f32 %v2616_v13, %v2448_v33  ;;  %v4650_v34 = vpop.eup %4649 }
 0x523   :  { %4655 = vrcp.f32 %v2640_v5  ;;  %v2577_v25 = vpop.f32.mrf.mxu0  ;;  %v2618_v37 = vpop.f32.mrf.mxu1  ;;  %v2659_v0 = vmul.f32 %v4650_v34, %v5960_v7 }
 0x524   :  { %4657 = vpow2.f32 %v4410_v20  ;;  %v4411_v59 = vmul.f32 -1.442695, %v2617_v21  ;;  %v4652_v24 = vpop.eup %4651 }
 0x525   :  { %4659 = vtanh.f32 %v2576_v8  ;;  %v2578_v38 = vpop.f32.mrf.mxu0  ;;  %v2619_v55 = vpop.f32.mrf.mxu1 }
 0x526   :  { %4661 = vpow2.f32 %v4411_v59 }
 0x52f   :  { %v4654_v51 = vpop.eup %4653 }
 0x530   :  { %v4656_v61 = vpop.eup %4655  ;;  %v2661_v53 = vmul.f32 %v4654_v51, %v4648_v43 }
 0x531   :  { %v4658_v14 = vpop.eup %4657  ;;  %v2660_v13 = vmul.f32 %v4656_v61, %v5964_v19 }
 0x532   :  { %v4660_v44 = vpop.eup %4659  ;;  %v6118_v33 = vadd.f32 %v2661_v53, %v2659_v0  ;;  %v2653_v5 = vadd.f32 1.0, %v4658_v14  ;;  %v3902_v0 = vrot.slane %v5967_v11, 6  ;;  %v7697_v11 = vld [vmem:[#allocation121_spill] sm:$0xff]  ;;  %v7698_v53 = vld [vmem:[#allocation122_spill] sm:$0xff]  ;;  %v7699_v14 = vld [vmem:[#allocation123_spill] sm:$0xff] }
 0x533   :  { %v4662_v4 = vpop.eup %4661  ;;  %v2662_v20 = vmul.f32 %v4660_v44, %v4652_v24  ;;  %v7696_v24 = vld [vmem:[#allocation81_spill] sm:$0xff]  ;;  %v7700_v44 = vld [vmem:[#allocation124_spill] sm:$0xff] }
 0x534   :  { %4663 = vtanh.f32 %v6118_v33  ;;  %v2654_v8 = vadd.f32 1.0, %v4662_v4  ;;  %v3920_v51 = vsel %vm3919_vm0, %v7696_v24, %v3902_v0  ;;  %v7702_v4 = vld [vmem:[#allocation126_spill] sm:$0xff]  ;;  %v7715_v24 = vld [vmem:[#allocation139_spill] sm:$0xff] }
 0x535   :  { %4665 = vrcp.f32 %v2653_v5  ;;  %v6122_v21 = vadd.f32 %v2662_v20, %v2660_v13  ;;  %v7701_v5 = vld [vmem:[#allocation125_spill] sm:$0xff]  ;;  %v7703_v13 = vld [vmem:[#allocation127_spill] sm:$0xff]  ;;  %v7704_v20 = vld [vmem:[#allocation128_spill] sm:$0xff] }
 0x536   :  { %4667 = vrcp.f32 %v2654_v8  ;;  %v7705_v8 = vld [vmem:[#allocation129_spill] sm:$0xff]  ;;  %v7710_v0 = vld [vmem:[#allocation134_spill] sm:$0xff] }
 0x537   :  { %4669 = vtanh.f32 %v6122_v21 }
 0x541   :  { %v4664_v7 = vpop.eup %4663 }
 0x542   :  { %v4666_v25 = vpop.eup %4665 }
 0x543   :  { %v4668_v37 = vpop.eup %4667  ;;  %v2667_v38 = vmul.f32 %v4666_v25, %v4664_v7  ;;  %v7706_v7 = vld [vmem:[#allocation130_spill] sm:$0xff]  ;;  %v7707_v25 = vld [vmem:[#allocation131_spill] sm:$0xff] }
 0x544   :  { %v4670_v59 = vpop.eup %4669 }
 0x545   :  { %v2668_v55 = vmul.f32 %v4670_v59, %v4668_v37  ;;  %v6126_v34 = vpack.c.bf16 %v2667_v38, %v2667_v38  ;;  %v7708_v37 = vld [vmem:[#allocation132_spill] sm:$0xff]  ;;  %v7709_v59 = vld [vmem:[#allocation133_spill] sm:$0xff]  ;;  %v7711_v38 = vld [vmem:[#allocation135_spill] sm:$0xff] }
 0x547   :  { %v2672_v19 = vpack.c.bf16 %v2668_v55, %v2668_v55  ;;  %v3905_v43 = vrot.slane %v2668_v55, 4  ;;  %v7712_v55 = vld [vmem:[#allocation136_spill] sm:$0xff] }
 0x549   :  { %2749 = vmatprep.mubr.bf16.mxu0 %v2672_v19  ;;  %2790 = vmatprep.mubr.bf16.mxu1 %v2672_v19  ;;  %v6131_v61 = vsel %vm3921_vm1, %v3920_v51, %v3905_v43  ;;  %v7714_v43 = vld [vmem:[#allocation138_spill] sm:$0xff]  ;;  %v7716_v51 = vld [vmem:[#allocation140_spill] sm:$0xff] }
 0x54a   :  { %2750 = vmatmul.mubr.bf16.vlgmr.msra.gmra.mxu0 %v6126_v34  ;;  %2791 = vmatmul.mubr.bf16.vlgmr.msra.gmra.mxu1 %v6126_v34 }
 0x54b   :  { %2800 = vmatpush1.bf16.msra.mxu0 %v7419_v56  ;;  %2841 = vmatpush1.bf16.msra.mxu1 %v7420_v30 }
 0x54c   :  { %2831 = vmatprep.mubr.bf16.mxu0 %v2672_v19  ;;  %2872 = vmatprep.mubr.bf16.mxu1 %v2672_v19  ;;  %v7713_v19 = vld [vmem:[#allocation137_spill] sm:$0xff] }
 0x54d   :  { %2801 = vmatprep.subr.bf16.mxu0 %v7421_v27  ;;  %2842 = vmatprep.subr.bf16.mxu1 %v7422_v52 }
 0x54f   :  { %2802 = vmatpush1.bf16.msra.mxu0 %v7423_v18  ;;  %2843 = vmatpush1.bf16.msra.mxu1 %v7424_v58 }
 0x550   :  { %2803 = vmatprep.subr.bf16.mxu0 %v7425_v15  ;;  %2844 = vmatprep.subr.bf16.mxu1 %v7426_v26 }
 0x553   :  { %2804 = vmatpush1.bf16.msra.mxu0 %v7427_v12  ;;  %2845 = vmatpush1.bf16.msra.mxu1 %v7428_v54 }
 0x554   :  { %2805 = vmatprep.subr.bf16.mxu0 %v7429_v6  ;;  %2846 = vmatprep.subr.bf16.mxu1 %v7513_v57 }
 0x557   :  { %2806 = vmatpush1.bf16.msra.mxu0 %v7514_v32  ;;  %2847 = vmatpush1.bf16.msra.mxu1 %v7515_v45 }
 0x558   :  { %2807 = vmatprep.subr.bf16.mxu0 %v7516_v36  ;;  %2848 = vmatprep.subr.bf16.mxu1 %v7517_v42 }
 0x55b   :  { %2808 = vmatpush1.bf16.msra.mxu0 %v7518_v47  ;;  %2849 = vmatpush1.bf16.msra.mxu1 %v7519_v31 }
 0x55c   :  { %2809 = vmatprep.subr.bf16.mxu0 %v7520_v41  ;;  %2850 = vmatprep.subr.bf16.mxu1 %v7521_v29 }
 0x55f   :  { %2810 = vmatpush1.bf16.msra.mxu0 %v7522_v28  ;;  %2851 = vmatpush1.bf16.msra.mxu1 %v7605_v62 }
 0x560   :  { %2811 = vmatprep.subr.bf16.mxu0 %v7606_v22  ;;  %2852 = vmatprep.subr.bf16.mxu1 %v7607_v60 }
 0x563   :  { %2812 = vmatpush1.bf16.msra.mxu0 %v7608_v16  ;;  %2853 = vmatpush1.bf16.msra.mxu1 %v7609_v10 }
 0x564   :  { %2813 = vmatprep.subr.bf16.mxu0 %v7528_v1  ;;  %2854 = vmatprep.subr.bf16.mxu1 %v7529_v40 }
 0x567   :  { %2814 = vmatpush1.bf16.msra.mxu0 %v7530_v35  ;;  %2855 = vmatpush1.bf16.msra.mxu1 %v7610_v9 }
 0x568   :  { %2815 = vmatprep.subr.bf16.mxu0 %v7532_v17  ;;  %2856 = vmatprep.subr.bf16.mxu1 %v7533_v23 }
 0x56b   :  { %2816 = vmatpush2.bf16.msra.mxu0 %v7534_v39  ;;  %2857 = vmatpush2.bf16.msra.mxu1 %v7535_v48 }
 0x56c   :  { %2817 = vmatprep.subr.bf16.mxu0 %v7536_v49  ;;  %2858 = vmatprep.subr.bf16.mxu1 %v7537_v50 }
 0x56f   :  { %2818 = vmatpush2.bf16.msra.mxu0 %v7538_v46  ;;  %2859 = vmatpush2.bf16.msra.mxu1 %v7456_v63 }
 0x570   :  { %2819 = vmatprep.subr.bf16.mxu0 %v7457_v2  ;;  %2860 = vmatprep.subr.bf16.mxu1 %v7458_v3 }
 0x573   :  { %2820 = vmatpush2.bf16.msra.mxu0 %v7697_v11  ;;  %2861 = vmatpush2.bf16.msra.mxu1 %v7698_v53 }
 0x574   :  { %2821 = vmatprep.subr.bf16.mxu0 %v7699_v14  ;;  %2862 = vmatprep.subr.bf16.mxu1 %v7700_v44 }
 0x577   :  { %2822 = vmatpush2.bf16.msra.mxu0 %v7701_v5  ;;  %2863 = vmatpush2.bf16.msra.mxu1 %v7702_v4 }
 0x578   :  { %2823 = vmatprep.subr.bf16.mxu0 %v7703_v13  ;;  %2864 = vmatprep.subr.bf16.mxu1 %v7704_v20  ;;  %v7785_v13 = vld [vmem:[#allocation151_spill] sm:$0xff] }
 0x57b   :  { %2824 = vmatpush2.bf16.msra.mxu0 %v7705_v8  ;;  %2865 = vmatpush2.bf16.msra.mxu1 %v7706_v7  ;;  %v7717_v7 = vld [vmem:[#allocation141_spill] sm:$0xff] }
 0x57c   :  { %2825 = vmatprep.subr.bf16.mxu0 %v7707_v25  ;;  %2866 = vmatprep.subr.bf16.mxu1 %v7708_v37  ;;  %v7718_v25 = vld [vmem:[#allocation142_spill] sm:$0xff]  ;;  %v7719_v37 = vld [vmem:[#allocation15_spill] sm:$0xff] }
 0x57f   :  { %2826 = vmatpush2.bf16.msra.mxu0 %v7709_v59  ;;  %2867 = vmatpush2.bf16.msra.mxu1 %v7710_v0  ;;  %v7720_v59 = vld [vmem:[#allocation16_spill] sm:$0xff] }
 0x580   :  { %2827 = vmatprep.subr.bf16.mxu0 %v7711_v38  ;;  %2868 = vmatprep.subr.bf16.mxu1 %v7712_v55  ;;  %v7721_v55 = vld [vmem:[#allocation17_spill] sm:$0xff]  ;;  %v7730_v38 = vld [vmem:[#allocation26_spill] sm:$0xff] }
 0x583   :  { %2828 = vmatpush2.bf16.msra.mxu0 %v7713_v19  ;;  %2869 = vmatpush2.bf16.msra.mxu1 %v7714_v43  ;;  %v7722_v19 = vld [vmem:[#allocation18_spill] sm:$0xff]  ;;  %v7723_v43 = vld [vmem:[#allocation19_spill] sm:$0xff] }
 0x584   :  { %2829 = vmatprep.subr.bf16.mxu0 %v7715_v24  ;;  %2870 = vmatprep.subr.bf16.mxu1 %v7716_v51  ;;  %v7724_v24 = vld [vmem:[#allocation20_spill] sm:$0xff]  ;;  %v7725_v51 = vld [vmem:[#allocation21_spill] sm:$0xff] }
 0x587   :  { %2830 = vmatpush2.bf16.msra.mxu0 %v7717_v7  ;;  %2871 = vmatpush2.bf16.msra.mxu1 %v7718_v25  ;;  %v7726_v7 = vld [vmem:[#allocation22_spill] sm:$0xff]  ;;  %v7727_v25 = vld [vmem:[#allocation23_spill] sm:$0xff] }
 0x588   :  { %2977 = vmatprep.subr.bf16.mxu0 %v7719_v37  ;;  %3018 = vmatprep.subr.bf16.mxu1 %v7720_v59  ;;  %v7728_v37 = vld [vmem:[#allocation24_spill] sm:$0xff]  ;;  %v7729_v59 = vld [vmem:[#allocation25_spill] sm:$0xff] }
 0x58a   :  { %2832 = vmatmul.mubr.bf16.vlgmr.msra.gmra.mxu0 %v6126_v34  ;;  %2873 = vmatmul.mubr.bf16.vlgmr.msra.gmra.mxu1 %v6126_v34  ;;  %v7731_v34 = vld [vmem:[#allocation27_spill] sm:$0xff] }
 0x58b   :  { %2978 = vmatpush1.bf16.msra.mxu0 %v7721_v55  ;;  %3019 = vmatpush1.bf16.msra.mxu1 %v7722_v19  ;;  %v7732_v55 = vld [vmem:[#allocation28_spill] sm:$0xff]  ;;  %v7733_v19 = vld [vmem:[#allocation29_spill] sm:$0xff] }
 0x58c   :  { %2979 = vmatprep.subr.bf16.mxu0 %v7723_v43  ;;  %3020 = vmatprep.subr.bf16.mxu1 %v7724_v24  ;;  %v7734_v43 = vld [vmem:[#allocation30_spill] sm:$0xff]  ;;  %v7735_v24 = vld [vmem:[#allocation31_spill] sm:$0xff] }
 0x58f   :  { %2980 = vmatpush1.bf16.msra.mxu0 %v7725_v51  ;;  %3021 = vmatpush1.bf16.msra.mxu1 %v7726_v7  ;;  %v7736_v51 = vld [vmem:[#allocation32_spill] sm:$0xff]  ;;  %v7737_v7 = vld [vmem:[#allocation33_spill] sm:$0xff] }
 0x590   :  { %2981 = vmatprep.subr.bf16.mxu0 %v7727_v25  ;;  %3022 = vmatprep.subr.bf16.mxu1 %v7728_v37  ;;  %v7738_v25 = vld [vmem:[#allocation34_spill] sm:$0xff]  ;;  %v7739_v37 = vld [vmem:[#allocation35_spill] sm:$0xff] }
 0x593   :  { %2982 = vmatpush1.bf16.msra.mxu0 %v7729_v59  ;;  %3023 = vmatpush1.bf16.msra.mxu1 %v7730_v38  ;;  %v7740_v59 = vld [vmem:[#allocation36_spill] sm:$0xff]  ;;  %v7741_v38 = vld [vmem:[#allocation37_spill] sm:$0xff] }
 0x594   :  { %2983 = vmatprep.subr.bf16.mxu0 %v7731_v34  ;;  %3024 = vmatprep.subr.bf16.mxu1 %v7732_v55  ;;  %v7742_v34 = vld [vmem:[#allocation38_spill] sm:$0xff]  ;;  %v7743_v55 = vld [vmem:[#allocation39_spill] sm:$0xff] }
 0x597   :  { %2984 = vmatpush1.bf16.msra.mxu0 %v7733_v19  ;;  %3025 = vmatpush1.bf16.msra.mxu1 %v7734_v43  ;;  %v7744_v19 = vld [vmem:[#allocation40_spill] sm:$0xff]  ;;  %v7745_v43 = vld [vmem:[#allocation41_spill] sm:$0xff] }
 0x598   :  { %2985 = vmatprep.subr.bf16.mxu0 %v7735_v24  ;;  %3026 = vmatprep.subr.bf16.mxu1 %v7736_v51  ;;  %v7746_v24 = vld [vmem:[#allocation42_spill] sm:$0xff]  ;;  %v7747_v51 = vld [vmem:[#allocation43_spill] sm:$0xff] }
 0x59b   :  { %2986 = vmatpush1.bf16.msra.mxu0 %v7737_v7  ;;  %3027 = vmatpush1.bf16.msra.mxu1 %v7738_v25  ;;  %v7748_v7 = vld [vmem:[#allocation44_spill] sm:$0xff]  ;;  %v7749_v25 = vld [vmem:[#allocation45_spill] sm:$0xff] }
 0x59c   :  { %2987 = vmatprep.subr.bf16.mxu0 %v7739_v37  ;;  %3028 = vmatprep.subr.bf16.mxu1 %v7740_v59  ;;  %v7750_v37 = vld [vmem:[#allocation46_spill] sm:$0xff]  ;;  %v7751_v59 = vld [vmem:[#allocation47_spill] sm:$0xff] }
 0x59f   :  { %2988 = vmatpush1.bf16.msra.mxu0 %v7741_v38  ;;  %3029 = vmatpush1.bf16.msra.mxu1 %v7742_v34  ;;  %v7752_v38 = vld [vmem:[#allocation48_spill] sm:$0xff]  ;;  %v7753_v34 = vld [vmem:[#allocation49_spill] sm:$0xff] }
 0x5a0   :  { %2989 = vmatprep.subr.bf16.mxu0 %v7743_v55  ;;  %3030 = vmatprep.subr.bf16.mxu1 %v7744_v19  ;;  %v7754_v55 = vld [vmem:[#allocation50_spill] sm:$0xff]  ;;  %v7755_v19 = vld [vmem:[#allocation51_spill] sm:$0xff] }
 0x5a3   :  { %2990 = vmatpush1.bf16.msra.mxu0 %v7745_v43  ;;  %3031 = vmatpush1.bf16.msra.mxu1 %v7746_v24  ;;  %v7756_v43 = vld [vmem:[#allocation52_spill] sm:$0xff]  ;;  %v7757_v24 = vld [vmem:[#allocation53_spill] sm:$0xff] }
 0x5a4   :  { %2991 = vmatprep.subr.bf16.mxu0 %v7747_v51  ;;  %3032 = vmatprep.subr.bf16.mxu1 %v7748_v7  ;;  %v7758_v51 = vld [vmem:[#allocation54_spill] sm:$0xff]  ;;  %v7759_v7 = vld [vmem:[#allocation55_spill] sm:$0xff] }
 0x5a7   :  { %2992 = vmatpush1.bf16.msra.mxu0 %v7749_v25  ;;  %3033 = vmatpush1.bf16.msra.mxu1 %v7750_v37  ;;  %v7760_v25 = vld [vmem:[#allocation56_spill] sm:$0xff]  ;;  %v7761_v37 = vld [vmem:[#allocation57_spill] sm:$0xff] }
 0x5a8   :  { %2993 = vmatprep.subr.bf16.mxu0 %v7751_v59  ;;  %3034 = vmatprep.subr.bf16.mxu1 %v7752_v38  ;;  %v7762_v59 = vld [vmem:[#allocation58_spill] sm:$0xff]  ;;  %v7763_v38 = vld [vmem:[#allocation59_spill] sm:$0xff] }
 0x5ab   :  { %2994 = vmatpush2.bf16.msra.mxu0 %v7753_v34  ;;  %3035 = vmatpush2.bf16.msra.mxu1 %v7754_v55  ;;  %v7764_v34 = vld [vmem:[#allocation60_spill] sm:$0xff]  ;;  %v7765_v55 = vld [vmem:[#allocation61_spill] sm:$0xff] }
 0x5ac   :  { %2995 = vmatprep.subr.bf16.mxu0 %v7755_v19  ;;  %3036 = vmatprep.subr.bf16.mxu1 %v7756_v43  ;;  %v7766_v19 = vld [vmem:[#allocation62_spill] sm:$0xff]  ;;  %v7767_v43 = vld [vmem:[#allocation63_spill] sm:$0xff] }
 0x5af   :  { %2996 = vmatpush2.bf16.msra.mxu0 %v7757_v24  ;;  %3037 = vmatpush2.bf16.msra.mxu1 %v7758_v51  ;;  %v7768_v24 = vld [vmem:[#allocation64_spill] sm:$0xff]  ;;  %v7769_v51 = vld [vmem:[#allocation65_spill] sm:$0xff] }
 0x5b0   :  { %2997 = vmatprep.subr.bf16.mxu0 %v7759_v7  ;;  %3038 = vmatprep.subr.bf16.mxu1 %v7760_v25  ;;  %v7770_v7 = vld [vmem:[#allocation66_spill] sm:$0xff]  ;;  %v7771_v25 = vld [vmem:[#allocation67_spill] sm:$0xff] }
 0x5b3   :  { %2998 = vmatpush2.bf16.msra.mxu0 %v7761_v37  ;;  %3039 = vmatpush2.bf16.msra.mxu1 %v7762_v59  ;;  %v7772_v37 = vld [vmem:[#allocation68_spill] sm:$0xff]  ;;  %v7773_v59 = vld [vmem:[#allocation69_spill] sm:$0xff] }
 0x5b4   :  { %2999 = vmatprep.subr.bf16.mxu0 %v7763_v38  ;;  %3040 = vmatprep.subr.bf16.mxu1 %v7764_v34  ;;  %v7774_v38 = vld [vmem:[#allocation70_spill] sm:$0xff]  ;;  %v7775_v34 = vld [vmem:[#allocation71_spill] sm:$0xff] }
 0x5b7   :  { %3000 = vmatpush2.bf16.msra.mxu0 %v7765_v55  ;;  %3041 = vmatpush2.bf16.msra.mxu1 %v7766_v19  ;;  %v7776_v55 = vld [vmem:[#allocation72_spill] sm:$0xff]  ;;  %v7777_v19 = vld [vmem:[#allocation73_spill] sm:$0xff] }
 0x5b8   :  { %3001 = vmatprep.subr.bf16.mxu0 %v7767_v43  ;;  %3042 = vmatprep.subr.bf16.mxu1 %v7768_v24  ;;  %v7778_v43 = vld [vmem:[#allocation74_spill] sm:$0xff]  ;;  %v7779_v24 = vld [vmem:[#allocation75_spill] sm:$0xff] }
 0x5bb   :  { %3002 = vmatpush2.bf16.msra.mxu0 %v7769_v51  ;;  %3043 = vmatpush2.bf16.msra.mxu1 %v7770_v7  ;;  %v7780_v51 = vld [vmem:[#allocation76_spill] sm:$0xff]  ;;  %v7781_v7 = vld [vmem:[#allocation77_spill] sm:$0xff] }
 0x5bc   :  { %3003 = vmatprep.subr.bf16.mxu0 %v7771_v25  ;;  %3044 = vmatprep.subr.bf16.mxu1 %v7772_v37  ;;  %v7782_v25 = vld [vmem:[#allocation78_spill] sm:$0xff]  ;;  %v7783_v37 = vld [vmem:[#allocation79_spill] sm:$0xff] }
 0x5bf   :  { %3004 = vmatpush2.bf16.msra.mxu0 %v7773_v59  ;;  %3045 = vmatpush2.bf16.msra.mxu1 %v7774_v38  ;;  %v7784_v59 = vld [vmem:[#allocation80_spill] sm:$0xff] }
 0x5c0   :  { %3005 = vmatprep.subr.bf16.mxu0 %v7775_v34  ;;  %3046 = vmatprep.subr.bf16.mxu1 %v7776_v55 }
 0x5c3   :  { %3006 = vmatpush2.bf16.msra.mxu0 %v7777_v19  ;;  %3047 = vmatpush2.bf16.msra.mxu1 %v7778_v43 }
 0x5c4   :  { %3007 = vmatprep.subr.bf16.mxu0 %v7779_v24  ;;  %3048 = vmatprep.subr.bf16.mxu1 %v7780_v51  ;;  %v2690_v51 = vcombine.high %v7785_v13, %v7785_v13 }
 0x5c7   :  { %3008 = vmatpush2.bf16.msra.mxu0 %v7781_v7  ;;  %3049 = vmatpush2.bf16.msra.mxu1 %v7782_v25  ;;  %v7786_v7 = vld [vmem:[#allocation152_spill] sm:$0xff] }
 0x5c8   :  { %3059 = vmatprep.subr.bf16.mxu0 %v7783_v37  ;;  %3100 = vmatprep.subr.bf16.mxu1 %v7784_v59  ;;  %v2691_v37 = vcombine.high %v7786_v7, %v7786_v7 }
 0x60a   :  { %v2751_v38 = vpop.f32.mrf.mxu0  ;;  %v2792_v34 = vpop.f32.mrf.mxu1 }
 0x60b   :  { %v2752_v24 = vadd.f32 %v2751_v38, %v7785_v13  ;;  %v2793_v4 = vadd.f32 %v2792_v34, %v7786_v7 }
 0x60c   :  { %v2753_v0 = vpop.f32.mrf.mxu0  ;;  %v2794_v55 = vpop.f32.mrf.mxu1 }
 0x60d   :  { %v2754_v25 = vadd.f32 %v2753_v0, %v2690_v51  ;;  %v4412_v59 = vmul.f32 -1.442695, %v2752_v24  ;;  %v2795_v5 = vadd.f32 %v2794_v55, %v2691_v37  ;;  %v4414_v44 = vmul.f32 -1.442695, %v2793_v4  ;;  %v7787_v24 = vld [vmem:[#allocation165_spill] sm:$0xff] }
 0x60e   :  { %v2755_v8 = vpop.f32.mrf.mxu0  ;;  %v2796_v19 = vpop.f32.mrf.mxu1  ;;  %v2707_v4 = vcombine.high %v7787_v24, %v7787_v24 }
 0x60f   :  { %v4413_v14 = vmul.f32 -1.442695, %v2754_v25  ;;  %4671 = vpow2.f32 %v4412_v59  ;;  %v4415_v8 = vmul.f32 -1.442695, %v2795_v5 }
 0x610   :  { %v2756_v20 = vpop.f32.mrf.mxu0  ;;  %v2797_v43 = vpop.f32.mrf.mxu1  ;;  %4673 = vpow2.f32 %v4414_v44  ;;  %v7788_v44 = vld [vmem:[#allocation166_spill] sm:$0xff] }
 0x611   :  { %4675 = vpow2.f32 %v4413_v14  ;;  %v2708_v25 = vcombine.high %v7788_v44, %v7788_v44 }
 0x612   :  { %4677 = vpow2.f32 %v4415_v8 }
 0x61c   :  { %v4672_v20 = vpop.eup %4671 }
 0x61d   :  { %v4674_v38 = vpop.eup %4673  ;;  %v2887_v43 = vadd.f32 1.0, %v4672_v20 }
 0x61e   :  { %v4676_v19 = vpop.eup %4675  ;;  %v2899_v53 = vadd.f32 1.0, %v4674_v38 }
 0x61f   :  { %v4678_v13 = vpop.eup %4677  ;;  %v2888_v34 = vadd.f32 1.0, %v4676_v19  ;;  %4679 = vrcp.f32 %v2887_v43 }
 0x620   :  { %v2900_v0 = vadd.f32 1.0, %v4678_v13  ;;  %4681 = vrcp.f32 %v2899_v53 }
 0x621   :  { %4683 = vrcp.f32 %v2888_v34 }
 0x64a   :  { %v2833_v51 = vpop.f32.mrf.mxu0  ;;  %v2874_v7 = vpop.f32.mrf.mxu1 }
 0x64b   :  { %v2834_v5 = vadd.f32 %v2833_v51, %v7787_v24  ;;  %v2875_v14 = vadd.f32 %v2874_v7, %v7788_v44  ;;  %v4680_v51 = vpop.eup %4679 }
 0x64c   :  { %v2835_v37 = vpop.f32.mrf.mxu0  ;;  %v2876_v59 = vpop.f32.mrf.mxu1 }
 0x64d   :  { %4685 = vtanh.f32 %v2834_v5  ;;  %v4416_v55 = vmul.f32 -1.442695, %v2875_v14  ;;  %v2836_v8 = vadd.f32 %v2835_v37, %v2707_v4  ;;  %v2877_v20 = vadd.f32 %v2876_v59, %v2708_v25  ;;  %v4682_v7 = vpop.eup %4681 }
 0x64e   :  { %4687 = vrcp.f32 %v2900_v0  ;;  %v2837_v38 = vpop.f32.mrf.mxu0  ;;  %v2878_v19 = vpop.f32.mrf.mxu1  ;;  %v2919_v11 = vmul.f32 %v4682_v7, %v6118_v33 }
 0x64f   :  { %4689 = vpow2.f32 %v4416_v55  ;;  %v4417_v43 = vmul.f32 -1.442695, %v2877_v20  ;;  %v4684_v24 = vpop.eup %4683 }
 0x650   :  { %4691 = vtanh.f32 %v2836_v8  ;;  %v2838_v53 = vpop.f32.mrf.mxu0  ;;  %v2879_v13 = vpop.f32.mrf.mxu1 }
 0x651   :  { %4693 = vpow2.f32 %v4417_v43 }
 0x65a   :  { %v4686_v44 = vpop.eup %4685 }
 0x65b   :  { %v4688_v34 = vpop.eup %4687  ;;  %v2921_v5 = vmul.f32 %v4686_v44, %v4680_v51  ;;  %v7792_v44 = vld [vmem:[#allocation123_spill] sm:$0xff] }
 0x65c   :  { %v4690_v14 = vpop.eup %4689  ;;  %v2920_v59 = vmul.f32 %v4688_v34, %v6122_v21  ;;  %v7793_v34 = vld [vmem:[#allocation124_spill] sm:$0xff] }
 0x65d   :  { %v4692_v4 = vpop.eup %4691  ;;  %v6278_v25 = vadd.f32 %v2921_v5, %v2919_v11  ;;  %v2913_v0 = vadd.f32 1.0, %v4690_v14  ;;  %v7794_v5 = vld [vmem:[#allocation125_spill] sm:$0xff]  ;;  %v7795_v14 = vld [vmem:[#allocation126_spill] sm:$0xff] }
 0x65e   :  { %v4694_v37 = vpop.eup %4693  ;;  %v2922_v55 = vmul.f32 %v4692_v4, %v4684_v24  ;;  %v7791_v24 = vld [vmem:[#allocation122_spill] sm:$0xff]  ;;  %v7796_v4 = vld [vmem:[#allocation127_spill] sm:$0xff] }
 0x65f   :  { %4695 = vtanh.f32 %v6278_v25  ;;  %v2914_v8 = vadd.f32 1.0, %v4694_v37  ;;  %v7798_v37 = vld [vmem:[#allocation129_spill] sm:$0xff] }
 0x660   :  { %4697 = vrcp.f32 %v2913_v0  ;;  %v6282_v20 = vadd.f32 %v2922_v55, %v2920_v59  ;;  %v7797_v0 = vld [vmem:[#allocation128_spill] sm:$0xff]  ;;  %v7799_v59 = vld [vmem:[#allocation130_spill] sm:$0xff]  ;;  %v7800_v55 = vld [vmem:[#allocation131_spill] sm:$0xff] }
 0x661   :  { %4699 = vrcp.f32 %v2914_v8  ;;  %v7801_v8 = vld [vmem:[#allocation132_spill] sm:$0xff] }
 0x662   :  { %4701 = vtanh.f32 %v6282_v20 }
 0x66c   :  { %v4696_v33 = vpop.eup %4695 }
 0x66d   :  { %v4698_v38 = vpop.eup %4697 }
 0x66e   :  { %v4700_v19 = vpop.eup %4699  ;;  %v2927_v11 = vmul.f32 %v4698_v38, %v4696_v33  ;;  %v7802_v33 = vld [vmem:[#allocation133_spill] sm:$0xff]  ;;  %v7803_v38 = vld [vmem:[#allocation134_spill] sm:$0xff] }
 0x66f   :  { %v4702_v43 = vpop.eup %4701 }
 0x670   :  { %v2928_v53 = vmul.f32 %v4702_v43, %v4700_v19  ;;  %v6285_v21 = vpack.c.bf16 %v2927_v11, %v2927_v11  ;;  %v7804_v19 = vld [vmem:[#allocation135_spill] sm:$0xff]  ;;  %v7805_v43 = vld [vmem:[#allocation136_spill] sm:$0xff]  ;;  %v7806_v11 = vld [vmem:[#allocation137_spill] sm:$0xff] }
 0x672   :  { %v2932_v13 = vpack.c.bf16 %v2928_v53, %v2928_v53  ;;  %v3908_v51 = vrot.slane %v2928_v53, 2  ;;  %v7807_v53 = vld [vmem:[#allocation138_spill] sm:$0xff] }
 0x674   :  { %3009 = vmatprep.mubr.bf16.mxu0 %v2932_v13  ;;  %3050 = vmatprep.mubr.bf16.mxu1 %v2932_v13  ;;  %v6289_v7 = vsel %vm3923_vm2, %v6131_v61, %v3908_v51  ;;  %v7790_v61 = vld [vmem:[#allocation121_spill] sm:$0xff]  ;;  %v7809_v51 = vld [vmem:[#allocation140_spill] sm:$0xff] }
 0x675   :  { %7789 = vst [vmem:[#allocation82_spill] sm:$0xff] %v6289_v7  ;;  %3010 = vmatmul.mubr.bf16.vlgmr.msra.gmra.mxu0 %v6285_v21  ;;  %3051 = vmatmul.mubr.bf16.vlgmr.msra.gmra.mxu1 %v6285_v21  ;;  %v7810_v7 = vld [vmem:[#allocation141_spill] sm:$0xff] }
 0x676   :  { %3060 = vmatpush1.bf16.msra.mxu0 %v7419_v56  ;;  %3101 = vmatpush1.bf16.msra.mxu1 %v7420_v30 }
 0x677   :  { %3091 = vmatprep.mubr.bf16.mxu0 %v2932_v13  ;;  %3132 = vmatprep.mubr.bf16.mxu1 %v2932_v13  ;;  %v7808_v13 = vld [vmem:[#allocation139_spill] sm:$0xff] }
 0x678   :  { %3061 = vmatprep.subr.bf16.mxu0 %v7421_v27  ;;  %3102 = vmatprep.subr.bf16.mxu1 %v7422_v52 }
 0x67a   :  { %3062 = vmatpush1.bf16.msra.mxu0 %v7423_v18  ;;  %3103 = vmatpush1.bf16.msra.mxu1 %v7424_v58 }
 0x67b   :  { %3063 = vmatprep.subr.bf16.mxu0 %v7425_v15  ;;  %3104 = vmatprep.subr.bf16.mxu1 %v7426_v26 }
 0x67e   :  { %3064 = vmatpush1.bf16.msra.mxu0 %v7427_v12  ;;  %3105 = vmatpush1.bf16.msra.mxu1 %v7428_v54 }
 0x67f   :  { %3065 = vmatprep.subr.bf16.mxu0 %v7429_v6  ;;  %3106 = vmatprep.subr.bf16.mxu1 %v7513_v57 }
 0x682   :  { %3066 = vmatpush1.bf16.msra.mxu0 %v7514_v32  ;;  %3107 = vmatpush1.bf16.msra.mxu1 %v7515_v45 }
 0x683   :  { %3067 = vmatprep.subr.bf16.mxu0 %v7516_v36  ;;  %3108 = vmatprep.subr.bf16.mxu1 %v7517_v42 }
 0x686   :  { %3068 = vmatpush1.bf16.msra.mxu0 %v7518_v47  ;;  %3109 = vmatpush1.bf16.msra.mxu1 %v7519_v31 }
 0x687   :  { %3069 = vmatprep.subr.bf16.mxu0 %v7520_v41  ;;  %3110 = vmatprep.subr.bf16.mxu1 %v7521_v29 }
 0x68a   :  { %3070 = vmatpush1.bf16.msra.mxu0 %v7522_v28  ;;  %3111 = vmatpush1.bf16.msra.mxu1 %v7605_v62 }
 0x68b   :  { %3071 = vmatprep.subr.bf16.mxu0 %v7606_v22  ;;  %3112 = vmatprep.subr.bf16.mxu1 %v7607_v60 }
 0x68e   :  { %3072 = vmatpush1.bf16.msra.mxu0 %v7608_v16  ;;  %3113 = vmatpush1.bf16.msra.mxu1 %v7609_v10 }
 0x68f   :  { %3073 = vmatprep.subr.bf16.mxu0 %v7528_v1  ;;  %3114 = vmatprep.subr.bf16.mxu1 %v7529_v40 }
 0x692   :  { %3074 = vmatpush1.bf16.msra.mxu0 %v7530_v35  ;;  %3115 = vmatpush1.bf16.msra.mxu1 %v7610_v9 }
 0x693   :  { %3075 = vmatprep.subr.bf16.mxu0 %v7532_v17  ;;  %3116 = vmatprep.subr.bf16.mxu1 %v7533_v23 }
 0x696   :  { %3076 = vmatpush2.bf16.msra.mxu0 %v7534_v39  ;;  %3117 = vmatpush2.bf16.msra.mxu1 %v7535_v48 }
 0x697   :  { %3077 = vmatprep.subr.bf16.mxu0 %v7536_v49  ;;  %3118 = vmatprep.subr.bf16.mxu1 %v7537_v50 }
 0x69a   :  { %3078 = vmatpush2.bf16.msra.mxu0 %v7538_v46  ;;  %3119 = vmatpush2.bf16.msra.mxu1 %v7456_v63 }
 0x69b   :  { %3079 = vmatprep.subr.bf16.mxu0 %v7457_v2  ;;  %3120 = vmatprep.subr.bf16.mxu1 %v7458_v3 }
 0x69e   :  { %3080 = vmatpush2.bf16.msra.mxu0 %v7790_v61  ;;  %3121 = vmatpush2.bf16.msra.mxu1 %v7791_v24 }
 0x69f   :  { %3081 = vmatprep.subr.bf16.mxu0 %v7792_v44  ;;  %3122 = vmatprep.subr.bf16.mxu1 %v7793_v34 }
 0x6a2   :  { %3082 = vmatpush2.bf16.msra.mxu0 %v7794_v5  ;;  %3123 = vmatpush2.bf16.msra.mxu1 %v7795_v14 }
 0x6a3   :  { %3083 = vmatprep.subr.bf16.mxu0 %v7796_v4  ;;  %3124 = vmatprep.subr.bf16.mxu1 %v7797_v0  ;;  %v7878_v0 = vld [vmem:[#allocation153_spill] sm:$0xff] }
 0x6a6   :  { %3084 = vmatpush2.bf16.msra.mxu0 %v7798_v37  ;;  %3125 = vmatpush2.bf16.msra.mxu1 %v7799_v59 }
 0x6a7   :  { %3085 = vmatprep.subr.bf16.mxu0 %v7800_v55  ;;  %3126 = vmatprep.subr.bf16.mxu1 %v7801_v8  ;;  %v7811_v55 = vld [vmem:[#allocation142_spill] sm:$0xff]  ;;  %v7812_v8 = vld [vmem:[#allocation15_spill] sm:$0xff] }
 0x6aa   :  { %3086 = vmatpush2.bf16.msra.mxu0 %v7802_v33  ;;  %3127 = vmatpush2.bf16.msra.mxu1 %v7803_v38  ;;  %v7813_v33 = vld [vmem:[#allocation16_spill] sm:$0xff] }
 0x6ab   :  { %3087 = vmatprep.subr.bf16.mxu0 %v7804_v19  ;;  %3128 = vmatprep.subr.bf16.mxu1 %v7805_v43  ;;  %v7814_v43 = vld [vmem:[#allocation17_spill] sm:$0xff]  ;;  %v7823_v19 = vld [vmem:[#allocation26_spill] sm:$0xff] }
 0x6ae   :  { %3088 = vmatpush2.bf16.msra.mxu0 %v7806_v11  ;;  %3129 = vmatpush2.bf16.msra.mxu1 %v7807_v53  ;;  %v7815_v11 = vld [vmem:[#allocation18_spill] sm:$0xff]  ;;  %v7816_v53 = vld [vmem:[#allocation19_spill] sm:$0xff] }
 0x6af   :  { %3089 = vmatprep.subr.bf16.mxu0 %v7808_v13  ;;  %3130 = vmatprep.subr.bf16.mxu1 %v7809_v51  ;;  %v7817_v13 = vld [vmem:[#allocation20_spill] sm:$0xff]  ;;  %v7818_v51 = vld [vmem:[#allocation21_spill] sm:$0xff] }
 0x6b2   :  { %3090 = vmatpush2.bf16.msra.mxu0 %v7810_v7  ;;  %3131 = vmatpush2.bf16.msra.mxu1 %v7811_v55  ;;  %v7819_v7 = vld [vmem:[#allocation22_spill] sm:$0xff]  ;;  %v7820_v55 = vld [vmem:[#allocation23_spill] sm:$0xff] }
 0x6b3   :  { %3237 = vmatprep.subr.bf16.mxu0 %v7812_v8  ;;  %3278 = vmatprep.subr.bf16.mxu1 %v7813_v33  ;;  %v7821_v8 = vld [vmem:[#allocation24_spill] sm:$0xff]  ;;  %v7822_v33 = vld [vmem:[#allocation25_spill] sm:$0xff] }
 0x6b5   :  { %3092 = vmatmul.mubr.bf16.vlgmr.msra.gmra.mxu0 %v6285_v21  ;;  %3133 = vmatmul.mubr.bf16.vlgmr.msra.gmra.mxu1 %v6285_v21  ;;  %v7824_v21 = vld [vmem:[#allocation27_spill] sm:$0xff] }
 0x6b6   :  { %3238 = vmatpush1.bf16.msra.mxu0 %v7814_v43  ;;  %3279 = vmatpush1.bf16.msra.mxu1 %v7815_v11  ;;  %v7825_v43 = vld [vmem:[#allocation28_spill] sm:$0xff]  ;;  %v7826_v11 = vld [vmem:[#allocation29_spill] sm:$0xff] }
 0x6b7   :  { %3239 = vmatprep.subr.bf16.mxu0 %v7816_v53  ;;  %3280 = vmatprep.subr.bf16.mxu1 %v7817_v13  ;;  %v7827_v53 = vld [vmem:[#allocation30_spill] sm:$0xff]  ;;  %v7828_v13 = vld [vmem:[#allocation31_spill] sm:$0xff] }
 0x6ba   :  { %3240 = vmatpush1.bf16.msra.mxu0 %v7818_v51  ;;  %3281 = vmatpush1.bf16.msra.mxu1 %v7819_v7  ;;  %v7829_v51 = vld [vmem:[#allocation32_spill] sm:$0xff]  ;;  %v7830_v7 = vld [vmem:[#allocation33_spill] sm:$0xff] }
 0x6bb   :  { %3241 = vmatprep.subr.bf16.mxu0 %v7820_v55  ;;  %3282 = vmatprep.subr.bf16.mxu1 %v7821_v8  ;;  %v7831_v55 = vld [vmem:[#allocation34_spill] sm:$0xff]  ;;  %v7832_v8 = vld [vmem:[#allocation35_spill] sm:$0xff] }
 0x6be   :  { %3242 = vmatpush1.bf16.msra.mxu0 %v7822_v33  ;;  %3283 = vmatpush1.bf16.msra.mxu1 %v7823_v19  ;;  %v7833_v33 = vld [vmem:[#allocation36_spill] sm:$0xff]  ;;  %v7834_v19 = vld [vmem:[#allocation37_spill] sm:$0xff] }
 0x6bf   :  { %3243 = vmatprep.subr.bf16.mxu0 %v7824_v21  ;;  %3284 = vmatprep.subr.bf16.mxu1 %v7825_v43  ;;  %v7835_v21 = vld [vmem:[#allocation38_spill] sm:$0xff]  ;;  %v7836_v43 = vld [vmem:[#allocation39_spill] sm:$0xff] }
 0x6c2   :  { %3244 = vmatpush1.bf16.msra.mxu0 %v7826_v11  ;;  %3285 = vmatpush1.bf16.msra.mxu1 %v7827_v53  ;;  %v7837_v11 = vld [vmem:[#allocation40_spill] sm:$0xff]  ;;  %v7838_v53 = vld [vmem:[#allocation41_spill] sm:$0xff] }
 0x6c3   :  { %3245 = vmatprep.subr.bf16.mxu0 %v7828_v13  ;;  %3286 = vmatprep.subr.bf16.mxu1 %v7829_v51  ;;  %v7839_v13 = vld [vmem:[#allocation42_spill] sm:$0xff]  ;;  %v7840_v51 = vld [vmem:[#allocation43_spill] sm:$0xff] }
 0x6c6   :  { %3246 = vmatpush1.bf16.msra.mxu0 %v7830_v7  ;;  %3287 = vmatpush1.bf16.msra.mxu1 %v7831_v55  ;;  %v7841_v7 = vld [vmem:[#allocation44_spill] sm:$0xff]  ;;  %v7842_v55 = vld [vmem:[#allocation45_spill] sm:$0xff] }
 0x6c7   :  { %3247 = vmatprep.subr.bf16.mxu0 %v7832_v8  ;;  %3288 = vmatprep.subr.bf16.mxu1 %v7833_v33  ;;  %v7843_v8 = vld [vmem:[#allocation46_spill] sm:$0xff]  ;;  %v7844_v33 = vld [vmem:[#allocation47_spill] sm:$0xff] }
 0x6ca   :  { %3248 = vmatpush1.bf16.msra.mxu0 %v7834_v19  ;;  %3289 = vmatpush1.bf16.msra.mxu1 %v7835_v21  ;;  %v7845_v19 = vld [vmem:[#allocation48_spill] sm:$0xff]  ;;  %v7846_v21 = vld [vmem:[#allocation49_spill] sm:$0xff] }
 0x6cb   :  { %3249 = vmatprep.subr.bf16.mxu0 %v7836_v43  ;;  %3290 = vmatprep.subr.bf16.mxu1 %v7837_v11  ;;  %v7847_v43 = vld [vmem:[#allocation50_spill] sm:$0xff]  ;;  %v7848_v11 = vld [vmem:[#allocation51_spill] sm:$0xff] }
 0x6ce   :  { %3250 = vmatpush1.bf16.msra.mxu0 %v7838_v53  ;;  %3291 = vmatpush1.bf16.msra.mxu1 %v7839_v13  ;;  %v7849_v53 = vld [vmem:[#allocation52_spill] sm:$0xff]  ;;  %v7850_v13 = vld [vmem:[#allocation53_spill] sm:$0xff] }
 0x6cf   :  { %3251 = vmatprep.subr.bf16.mxu0 %v7840_v51  ;;  %3292 = vmatprep.subr.bf16.mxu1 %v7841_v7  ;;  %v7851_v51 = vld [vmem:[#allocation54_spill] sm:$0xff]  ;;  %v7852_v7 = vld [vmem:[#allocation55_spill] sm:$0xff] }
 0x6d2   :  { %3252 = vmatpush1.bf16.msra.mxu0 %v7842_v55  ;;  %3293 = vmatpush1.bf16.msra.mxu1 %v7843_v8  ;;  %v7853_v55 = vld [vmem:[#allocation56_spill] sm:$0xff]  ;;  %v7854_v8 = vld [vmem:[#allocation57_spill] sm:$0xff] }
 0x6d3   :  { %3253 = vmatprep.subr.bf16.mxu0 %v7844_v33  ;;  %3294 = vmatprep.subr.bf16.mxu1 %v7845_v19  ;;  %v7855_v33 = vld [vmem:[#allocation58_spill] sm:$0xff]  ;;  %v7856_v19 = vld [vmem:[#allocation59_spill] sm:$0xff] }
 0x6d6   :  { %3254 = vmatpush2.bf16.msra.mxu0 %v7846_v21  ;;  %3295 = vmatpush2.bf16.msra.mxu1 %v7847_v43  ;;  %v7857_v21 = vld [vmem:[#allocation60_spill] sm:$0xff]  ;;  %v7858_v43 = vld [vmem:[#allocation61_spill] sm:$0xff] }
 0x6d7   :  { %3255 = vmatprep.subr.bf16.mxu0 %v7848_v11  ;;  %3296 = vmatprep.subr.bf16.mxu1 %v7849_v53  ;;  %v7859_v11 = vld [vmem:[#allocation62_spill] sm:$0xff]  ;;  %v7860_v53 = vld [vmem:[#allocation63_spill] sm:$0xff] }
 0x6da   :  { %3256 = vmatpush2.bf16.msra.mxu0 %v7850_v13  ;;  %3297 = vmatpush2.bf16.msra.mxu1 %v7851_v51  ;;  %v7861_v13 = vld [vmem:[#allocation64_spill] sm:$0xff]  ;;  %v7862_v51 = vld [vmem:[#allocation65_spill] sm:$0xff] }
 0x6db   :  { %3257 = vmatprep.subr.bf16.mxu0 %v7852_v7  ;;  %3298 = vmatprep.subr.bf16.mxu1 %v7853_v55  ;;  %v7863_v7 = vld [vmem:[#allocation66_spill] sm:$0xff]  ;;  %v7864_v55 = vld [vmem:[#allocation67_spill] sm:$0xff] }
 0x6de   :  { %3258 = vmatpush2.bf16.msra.mxu0 %v7854_v8  ;;  %3299 = vmatpush2.bf16.msra.mxu1 %v7855_v33  ;;  %v7865_v8 = vld [vmem:[#allocation68_spill] sm:$0xff]  ;;  %v7866_v33 = vld [vmem:[#allocation69_spill] sm:$0xff] }
 0x6df   :  { %3259 = vmatprep.subr.bf16.mxu0 %v7856_v19  ;;  %3300 = vmatprep.subr.bf16.mxu1 %v7857_v21  ;;  %v7867_v19 = vld [vmem:[#allocation70_spill] sm:$0xff]  ;;  %v7868_v21 = vld [vmem:[#allocation71_spill] sm:$0xff] }
 0x6e2   :  { %3260 = vmatpush2.bf16.msra.mxu0 %v7858_v43  ;;  %3301 = vmatpush2.bf16.msra.mxu1 %v7859_v11  ;;  %v7869_v43 = vld [vmem:[#allocation72_spill] sm:$0xff]  ;;  %v7870_v11 = vld [vmem:[#allocation73_spill] sm:$0xff] }
 0x6e3   :  { %3261 = vmatprep.subr.bf16.mxu0 %v7860_v53  ;;  %3302 = vmatprep.subr.bf16.mxu1 %v7861_v13  ;;  %v7871_v53 = vld [vmem:[#allocation74_spill] sm:$0xff]  ;;  %v7872_v13 = vld [vmem:[#allocation75_spill] sm:$0xff] }
 0x6e6   :  { %3262 = vmatpush2.bf16.msra.mxu0 %v7862_v51  ;;  %3303 = vmatpush2.bf16.msra.mxu1 %v7863_v7  ;;  %v7873_v51 = vld [vmem:[#allocation76_spill] sm:$0xff]  ;;  %v7874_v7 = vld [vmem:[#allocation77_spill] sm:$0xff] }
 0x6e7   :  { %3263 = vmatprep.subr.bf16.mxu0 %v7864_v55  ;;  %3304 = vmatprep.subr.bf16.mxu1 %v7865_v8  ;;  %v7875_v55 = vld [vmem:[#allocation78_spill] sm:$0xff]  ;;  %v7876_v8 = vld [vmem:[#allocation79_spill] sm:$0xff] }
 0x6ea   :  { %3264 = vmatpush2.bf16.msra.mxu0 %v7866_v33  ;;  %3305 = vmatpush2.bf16.msra.mxu1 %v7867_v19  ;;  %v7877_v33 = vld [vmem:[#allocation80_spill] sm:$0xff] }
 0x6eb   :  { %3265 = vmatprep.subr.bf16.mxu0 %v7868_v21  ;;  %3306 = vmatprep.subr.bf16.mxu1 %v7869_v43 }
 0x6ee   :  { %3266 = vmatpush2.bf16.msra.mxu0 %v7870_v11  ;;  %3307 = vmatpush2.bf16.msra.mxu1 %v7871_v53 }
 0x6ef   :  { %3267 = vmatprep.subr.bf16.mxu0 %v7872_v13  ;;  %3308 = vmatprep.subr.bf16.mxu1 %v7873_v51  ;;  %v2950_v51 = vcombine.high %v7878_v0, %v7878_v0 }
 0x6f2   :  { %3268 = vmatpush2.bf16.msra.mxu0 %v7874_v7  ;;  %3309 = vmatpush2.bf16.msra.mxu1 %v7875_v55  ;;  %v7879_v7 = vld [vmem:[#allocation154_spill] sm:$0xff] }
 0x6f3   :  { %3319 = vmatprep.subr.bf16.mxu0 %v7876_v8  ;;  %3360 = vmatprep.subr.bf16.mxu1 %v7877_v33  ;;  %v2951_v8 = vcombine.high %v7879_v7, %v7879_v7 }
 0x735   :  { %v3011_v19 = vpop.f32.mrf.mxu0  ;;  %v3052_v21 = vpop.f32.mrf.mxu1 }
 0x736   :  { %v3012_v13 = vadd.f32 %v3011_v19, %v7878_v0  ;;  %v3053_v4 = vadd.f32 %v3052_v21, %v7879_v7 }
 0x737   :  { %v3013_v38 = vpop.f32.mrf.mxu0  ;;  %v3054_v43 = vpop.f32.mrf.mxu1 }
 0x738   :  { %v3014_v55 = vadd.f32 %v3013_v38, %v2950_v51  ;;  %v4418_v33 = vmul.f32 -1.442695, %v3012_v13  ;;  %v3055_v14 = vadd.f32 %v3054_v43, %v2951_v8  ;;  %v4420_v5 = vmul.f32 -1.442695, %v3053_v4  ;;  %v7880_v13 = vld [vmem:[#allocation167_spill] sm:$0xff] }
 0x739   :  { %v3015_v59 = vpop.f32.mrf.mxu0  ;;  %v3056_v11 = vpop.f32.mrf.mxu1  ;;  %v2967_v4 = vcombine.high %v7880_v13, %v7880_v13 }
 0x73a   :  { %v4419_v34 = vmul.f32 -1.442695, %v3014_v55  ;;  %4703 = vpow2.f32 %v4418_v33  ;;  %v4421_v59 = vmul.f32 -1.442695, %v3055_v14 }
 0x73b   :  { %v3016_v37 = vpop.f32.mrf.mxu0  ;;  %v3057_v53 = vpop.f32.mrf.mxu1  ;;  %4705 = vpow2.f32 %v4420_v5  ;;  %v7881_v5 = vld [vmem:[#allocation168_spill] sm:$0xff] }
 0x73c   :  { %4707 = vpow2.f32 %v4419_v34  ;;  %v2968_v55 = vcombine.high %v7881_v5, %v7881_v5 }
 0x73d   :  { %4709 = vpow2.f32 %v4421_v59 }
 0x747   :  { %v4704_v37 = vpop.eup %4703 }
 0x748   :  { %v4706_v19 = vpop.eup %4705  ;;  %v3147_v53 = vadd.f32 1.0, %v4704_v37 }
 0x749   :  { %v4708_v11 = vpop.eup %4707  ;;  %v3159_v44 = vadd.f32 1.0, %v4706_v19 }
 0x74a   :  { %v4710_v0 = vpop.eup %4709  ;;  %v3148_v21 = vadd.f32 1.0, %v4708_v11  ;;  %4711 = vrcp.f32 %v3147_v53 }
 0x74b   :  { %v3160_v38 = vadd.f32 1.0, %v4710_v0  ;;  %4713 = vrcp.f32 %v3159_v44 }
 0x74c   :  { %4715 = vrcp.f32 %v3148_v21 }
 0x775   :  { %v3093_v51 = vpop.f32.mrf.mxu0  ;;  %v3134_v7 = vpop.f32.mrf.mxu1 }
 0x776   :  { %v3094_v14 = vadd.f32 %v3093_v51, %v7880_v13  ;;  %v3135_v34 = vadd.f32 %v3134_v7, %v7881_v5  ;;  %v4712_v51 = vpop.eup %4711 }
 0x777   :  { %v3095_v8 = vpop.f32.mrf.mxu0  ;;  %v3136_v33 = vpop.f32.mrf.mxu1 }
 0x778   :  { %4717 = vtanh.f32 %v3094_v14  ;;  %v4422_v43 = vmul.f32 -1.442695, %v3135_v34  ;;  %v3096_v59 = vadd.f32 %v3095_v8, %v2967_v4  ;;  %v3137_v37 = vadd.f32 %v3136_v33, %v2968_v55  ;;  %v4714_v7 = vpop.eup %4713 }
 0x779   :  { %4719 = vrcp.f32 %v3160_v38  ;;  %v3097_v19 = vpop.f32.mrf.mxu0  ;;  %v3138_v11 = vpop.f32.mrf.mxu1  ;;  %v3179_v24 = vmul.f32 %v4714_v7, %v6278_v25  ;;  %v7884_v7 = vld [vmem:[#allocation123_spill] sm:$0xff] }
 0x77a   :  { %4721 = vpow2.f32 %v4422_v43  ;;  %v4423_v53 = vmul.f32 -1.442695, %v3137_v37  ;;  %v4716_v13 = vpop.eup %4715 }
 0x77b   :  { %4723 = vtanh.f32 %v3096_v59  ;;  %v3098_v44 = vpop.f32.mrf.mxu0  ;;  %v3139_v0 = vpop.f32.mrf.mxu1 }
 0x77c   :  { %4725 = vpow2.f32 %v4423_v53 }
 0x785   :  { %v4718_v5 = vpop.eup %4717 }
 0x786   :  { %v4720_v21 = vpop.eup %4719  ;;  %v3181_v14 = vmul.f32 %v4718_v5, %v4712_v51  ;;  %v7883_v51 = vld [vmem:[#allocation122_spill] sm:$0xff]  ;;  %v7886_v5 = vld [vmem:[#allocation125_spill] sm:$0xff] }
 0x787   :  { %v4722_v34 = vpop.eup %4721  ;;  %v3180_v33 = vmul.f32 %v4720_v21, %v6282_v20  ;;  %v7887_v21 = vld [vmem:[#allocation126_spill] sm:$0xff] }
 0x788   :  { %v4724_v4 = vpop.eup %4723  ;;  %v6436_v55 = vadd.f32 %v3181_v14, %v3179_v24  ;;  %v3173_v38 = vadd.f32 1.0, %v4722_v34  ;;  %v7888_v14 = vld [vmem:[#allocation127_spill] sm:$0xff]  ;;  %v7889_v34 = vld [vmem:[#allocation128_spill] sm:$0xff] }
 0x789   :  { %v4726_v8 = vpop.eup %4725  ;;  %v3182_v43 = vmul.f32 %v4724_v4, %v4716_v13  ;;  %v7885_v13 = vld [vmem:[#allocation124_spill] sm:$0xff]  ;;  %v7890_v4 = vld [vmem:[#allocation129_spill] sm:$0xff] }
 0x78a   :  { %4727 = vtanh.f32 %v6436_v55  ;;  %v3174_v59 = vadd.f32 1.0, %v4726_v8  ;;  %v7892_v8 = vld [vmem:[#allocation131_spill] sm:$0xff] }
 0x78b   :  { %4729 = vrcp.f32 %v3173_v38  ;;  %v6440_v37 = vadd.f32 %v3182_v43, %v3180_v33  ;;  %v7891_v38 = vld [vmem:[#allocation130_spill] sm:$0xff]  ;;  %v7893_v33 = vld [vmem:[#allocation132_spill] sm:$0xff]  ;;  %v7894_v43 = vld [vmem:[#allocation133_spill] sm:$0xff] }
 0x78c   :  { %4731 = vrcp.f32 %v3174_v59  ;;  %v7895_v59 = vld [vmem:[#allocation134_spill] sm:$0xff] }
 0x78d   :  { %4733 = vtanh.f32 %v6440_v37 }
 0x797   :  { %v4728_v25 = vpop.eup %4727 }
 0x798   :  { %v4730_v19 = vpop.eup %4729 }
 0x799   :  { %v4732_v11 = vpop.eup %4731  ;;  %v3187_v24 = vmul.f32 %v4730_v19, %v4728_v25  ;;  %v7896_v25 = vld [vmem:[#allocation135_spill] sm:$0xff]  ;;  %v7897_v19 = vld [vmem:[#allocation136_spill] sm:$0xff] }
 0x79a   :  { %v4734_v53 = vpop.eup %4733 }
 0x79b   :  { %v6443_v44 = vmul.f32 %v4734_v53, %v4732_v11  ;;  %v6447_v0 = vpack.c.bf16 %v3187_v24, %v3187_v24  ;;  %v7898_v11 = vld [vmem:[#allocation137_spill] sm:$0xff]  ;;  %v7899_v53 = vld [vmem:[#allocation138_spill] sm:$0xff]  ;;  %v7900_v24 = vld [vmem:[#allocation139_spill] sm:$0xff] }
 0x79d   :  { %7882 = vst [vmem:[#allocation83_spill] sm:$0xff] %v6443_v44  ;;  %v3192_v20 = vpack.c.bf16 %v6443_v44, %v6443_v44  ;;  %v7902_v44 = vld [vmem:[#allocation141_spill] sm:$0xff] }
 0x79f   :  { %3269 = vmatprep.mubr.bf16.mxu0 %v3192_v20  ;;  %3310 = vmatprep.mubr.bf16.mxu1 %v3192_v20 }
 0x7a0   :  { %3270 = vmatmul.mubr.bf16.vlgmr.msra.gmra.mxu0 %v6447_v0  ;;  %3311 = vmatmul.mubr.bf16.vlgmr.msra.gmra.mxu1 %v6447_v0 }
 0x7a1   :  { %3320 = vmatpush1.bf16.msra.mxu0 %v7419_v56  ;;  %3361 = vmatpush1.bf16.msra.mxu1 %v7420_v30 }
 0x7a2   :  { %3351 = vmatprep.mubr.bf16.mxu0 %v3192_v20  ;;  %3392 = vmatprep.mubr.bf16.mxu1 %v3192_v20  ;;  %v7901_v20 = vld [vmem:[#allocation140_spill] sm:$0xff] }
 0x7a3   :  { %3321 = vmatprep.subr.bf16.mxu0 %v7421_v27  ;;  %3362 = vmatprep.subr.bf16.mxu1 %v7422_v52 }
 0x7a5   :  { %3322 = vmatpush1.bf16.msra.mxu0 %v7423_v18  ;;  %3363 = vmatpush1.bf16.msra.mxu1 %v7424_v58 }
 0x7a6   :  { %3323 = vmatprep.subr.bf16.mxu0 %v7425_v15  ;;  %3364 = vmatprep.subr.bf16.mxu1 %v7426_v26 }
 0x7a9   :  { %3324 = vmatpush1.bf16.msra.mxu0 %v7427_v12  ;;  %3365 = vmatpush1.bf16.msra.mxu1 %v7428_v54 }
 0x7aa   :  { %3325 = vmatprep.subr.bf16.mxu0 %v7429_v6  ;;  %3366 = vmatprep.subr.bf16.mxu1 %v7513_v57 }
 0x7ad   :  { %3326 = vmatpush1.bf16.msra.mxu0 %v7514_v32  ;;  %3367 = vmatpush1.bf16.msra.mxu1 %v7515_v45 }
 0x7ae   :  { %3327 = vmatprep.subr.bf16.mxu0 %v7516_v36  ;;  %3368 = vmatprep.subr.bf16.mxu1 %v7517_v42 }
 0x7b1   :  { %3328 = vmatpush1.bf16.msra.mxu0 %v7518_v47  ;;  %3369 = vmatpush1.bf16.msra.mxu1 %v7519_v31 }
 0x7b2   :  { %3329 = vmatprep.subr.bf16.mxu0 %v7520_v41  ;;  %3370 = vmatprep.subr.bf16.mxu1 %v7521_v29 }
 0x7b5   :  { %3330 = vmatpush1.bf16.msra.mxu0 %v7522_v28  ;;  %3371 = vmatpush1.bf16.msra.mxu1 %v7605_v62 }
 0x7b6   :  { %3331 = vmatprep.subr.bf16.mxu0 %v7606_v22  ;;  %3372 = vmatprep.subr.bf16.mxu1 %v7607_v60 }
 0x7b9   :  { %3332 = vmatpush1.bf16.msra.mxu0 %v7608_v16  ;;  %3373 = vmatpush1.bf16.msra.mxu1 %v7609_v10 }
 0x7ba   :  { %3333 = vmatprep.subr.bf16.mxu0 %v7528_v1  ;;  %3374 = vmatprep.subr.bf16.mxu1 %v7529_v40 }
 0x7bd   :  { %3334 = vmatpush1.bf16.msra.mxu0 %v7530_v35  ;;  %3375 = vmatpush1.bf16.msra.mxu1 %v7610_v9 }
 0x7be   :  { %3335 = vmatprep.subr.bf16.mxu0 %v7532_v17  ;;  %3376 = vmatprep.subr.bf16.mxu1 %v7533_v23 }
 0x7c1   :  { %3336 = vmatpush2.bf16.msra.mxu0 %v7534_v39  ;;  %3377 = vmatpush2.bf16.msra.mxu1 %v7535_v48 }
 0x7c2   :  { %3337 = vmatprep.subr.bf16.mxu0 %v7536_v49  ;;  %3378 = vmatprep.subr.bf16.mxu1 %v7537_v50 }
 0x7c5   :  { %3338 = vmatpush2.bf16.msra.mxu0 %v7538_v46  ;;  %3379 = vmatpush2.bf16.msra.mxu1 %v7456_v63 }
 0x7c6   :  { %3339 = vmatprep.subr.bf16.mxu0 %v7457_v2  ;;  %3380 = vmatprep.subr.bf16.mxu1 %v7458_v3 }
 0x7c9   :  { %3340 = vmatpush2.bf16.msra.mxu0 %v7790_v61  ;;  %3381 = vmatpush2.bf16.msra.mxu1 %v7883_v51 }
 0x7ca   :  { %3341 = vmatprep.subr.bf16.mxu0 %v7884_v7  ;;  %3382 = vmatprep.subr.bf16.mxu1 %v7885_v13 }
 0x7cd   :  { %3342 = vmatpush2.bf16.msra.mxu0 %v7886_v5  ;;  %3383 = vmatpush2.bf16.msra.mxu1 %v7887_v21 }
 0x7ce   :  { %3343 = vmatprep.subr.bf16.mxu0 %v7888_v14  ;;  %3384 = vmatprep.subr.bf16.mxu1 %v7889_v34  ;;  %v7970_v34 = vld [vmem:[#allocation155_spill] sm:$0xff] }
 0x7d1   :  { %3344 = vmatpush2.bf16.msra.mxu0 %v7890_v4  ;;  %3385 = vmatpush2.bf16.msra.mxu1 %v7891_v38 }
 0x7d2   :  { %3345 = vmatprep.subr.bf16.mxu0 %v7892_v8  ;;  %3386 = vmatprep.subr.bf16.mxu1 %v7893_v33  ;;  %v7903_v8 = vld [vmem:[#allocation142_spill] sm:$0xff]  ;;  %v7904_v33 = vld [vmem:[#allocation15_spill] sm:$0xff] }
 0x7d5   :  { %3346 = vmatpush2.bf16.msra.mxu0 %v7894_v43  ;;  %3387 = vmatpush2.bf16.msra.mxu1 %v7895_v59  ;;  %v7905_v43 = vld [vmem:[#allocation16_spill] sm:$0xff] }
 0x7d6   :  { %3347 = vmatprep.subr.bf16.mxu0 %v7896_v25  ;;  %3388 = vmatprep.subr.bf16.mxu1 %v7897_v19  ;;  %v7906_v19 = vld [vmem:[#allocation17_spill] sm:$0xff]  ;;  %v7915_v25 = vld [vmem:[#allocation26_spill] sm:$0xff] }
 0x7d9   :  { %3348 = vmatpush2.bf16.msra.mxu0 %v7898_v11  ;;  %3389 = vmatpush2.bf16.msra.mxu1 %v7899_v53  ;;  %v7907_v11 = vld [vmem:[#allocation18_spill] sm:$0xff]  ;;  %v7908_v53 = vld [vmem:[#allocation19_spill] sm:$0xff] }
 0x7da   :  { %3349 = vmatprep.subr.bf16.mxu0 %v7900_v24  ;;  %3390 = vmatprep.subr.bf16.mxu1 %v7901_v20  ;;  %v7909_v24 = vld [vmem:[#allocation20_spill] sm:$0xff]  ;;  %v7910_v20 = vld [vmem:[#allocation21_spill] sm:$0xff] }
 0x7dd   :  { %3350 = vmatpush2.bf16.msra.mxu0 %v7902_v44  ;;  %3391 = vmatpush2.bf16.msra.mxu1 %v7903_v8  ;;  %v7911_v44 = vld [vmem:[#allocation22_spill] sm:$0xff]  ;;  %v7912_v8 = vld [vmem:[#allocation23_spill] sm:$0xff] }
 0x7de   :  { %3497 = vmatprep.subr.bf16.mxu0 %v7904_v33  ;;  %3538 = vmatprep.subr.bf16.mxu1 %v7905_v43  ;;  %v7913_v33 = vld [vmem:[#allocation24_spill] sm:$0xff]  ;;  %v7914_v43 = vld [vmem:[#allocation25_spill] sm:$0xff] }
 0x7e0   :  { %3352 = vmatmul.mubr.bf16.vlgmr.msra.gmra.mxu0 %v6447_v0  ;;  %3393 = vmatmul.mubr.bf16.vlgmr.msra.gmra.mxu1 %v6447_v0  ;;  %v7916_v0 = vld [vmem:[#allocation27_spill] sm:$0xff] }
 0x7e1   :  { %3498 = vmatpush1.bf16.msra.mxu0 %v7906_v19  ;;  %3539 = vmatpush1.bf16.msra.mxu1 %v7907_v11  ;;  %v7917_v19 = vld [vmem:[#allocation28_spill] sm:$0xff]  ;;  %v7918_v11 = vld [vmem:[#allocation29_spill] sm:$0xff] }
 0x7e2   :  { %3499 = vmatprep.subr.bf16.mxu0 %v7908_v53  ;;  %3540 = vmatprep.subr.bf16.mxu1 %v7909_v24  ;;  %v7919_v53 = vld [vmem:[#allocation30_spill] sm:$0xff]  ;;  %v7920_v24 = vld [vmem:[#allocation31_spill] sm:$0xff] }
 0x7e5   :  { %3500 = vmatpush1.bf16.msra.mxu0 %v7910_v20  ;;  %3541 = vmatpush1.bf16.msra.mxu1 %v7911_v44  ;;  %v7921_v20 = vld [vmem:[#allocation32_spill] sm:$0xff]  ;;  %v7922_v44 = vld [vmem:[#allocation33_spill] sm:$0xff] }
 0x7e6   :  { %3501 = vmatprep.subr.bf16.mxu0 %v7912_v8  ;;  %3542 = vmatprep.subr.bf16.mxu1 %v7913_v33  ;;  %v7923_v8 = vld [vmem:[#allocation34_spill] sm:$0xff]  ;;  %v7924_v33 = vld [vmem:[#allocation35_spill] sm:$0xff] }
 0x7e9   :  { %3502 = vmatpush1.bf16.msra.mxu0 %v7914_v43  ;;  %3543 = vmatpush1.bf16.msra.mxu1 %v7915_v25  ;;  %v7925_v43 = vld [vmem:[#allocation36_spill] sm:$0xff]  ;;  %v7926_v25 = vld [vmem:[#allocation37_spill] sm:$0xff] }
 0x7ea   :  { %3503 = vmatprep.subr.bf16.mxu0 %v7916_v0  ;;  %3544 = vmatprep.subr.bf16.mxu1 %v7917_v19  ;;  %v7927_v0 = vld [vmem:[#allocation38_spill] sm:$0xff]  ;;  %v7928_v19 = vld [vmem:[#allocation39_spill] sm:$0xff] }
 0x7ed   :  { %3504 = vmatpush1.bf16.msra.mxu0 %v7918_v11  ;;  %3545 = vmatpush1.bf16.msra.mxu1 %v7919_v53  ;;  %v7929_v11 = vld [vmem:[#allocation40_spill] sm:$0xff]  ;;  %v7930_v53 = vld [vmem:[#allocation41_spill] sm:$0xff] }
 0x7ee   :  { %3505 = vmatprep.subr.bf16.mxu0 %v7920_v24  ;;  %3546 = vmatprep.subr.bf16.mxu1 %v7921_v20  ;;  %v7931_v24 = vld [vmem:[#allocation42_spill] sm:$0xff]  ;;  %v7932_v20 = vld [vmem:[#allocation43_spill] sm:$0xff] }
 0x7f1   :  { %3506 = vmatpush1.bf16.msra.mxu0 %v7922_v44  ;;  %3547 = vmatpush1.bf16.msra.mxu1 %v7923_v8  ;;  %v7933_v44 = vld [vmem:[#allocation44_spill] sm:$0xff]  ;;  %v7934_v8 = vld [vmem:[#allocation45_spill] sm:$0xff] }
 0x7f2   :  { %3507 = vmatprep.subr.bf16.mxu0 %v7924_v33  ;;  %3548 = vmatprep.subr.bf16.mxu1 %v7925_v43  ;;  %v7935_v33 = vld [vmem:[#allocation46_spill] sm:$0xff]  ;;  %v7936_v43 = vld [vmem:[#allocation47_spill] sm:$0xff] }
 0x7f5   :  { %3508 = vmatpush1.bf16.msra.mxu0 %v7926_v25  ;;  %3549 = vmatpush1.bf16.msra.mxu1 %v7927_v0  ;;  %v7937_v25 = vld [vmem:[#allocation48_spill] sm:$0xff]  ;;  %v7938_v0 = vld [vmem:[#allocation49_spill] sm:$0xff] }
 0x7f6   :  { %3509 = vmatprep.subr.bf16.mxu0 %v7928_v19  ;;  %3550 = vmatprep.subr.bf16.mxu1 %v7929_v11  ;;  %v7939_v19 = vld [vmem:[#allocation50_spill] sm:$0xff]  ;;  %v7940_v11 = vld [vmem:[#allocation51_spill] sm:$0xff] }
 0x7f9   :  { %3510 = vmatpush1.bf16.msra.mxu0 %v7930_v53  ;;  %3551 = vmatpush1.bf16.msra.mxu1 %v7931_v24  ;;  %v7941_v53 = vld [vmem:[#allocation52_spill] sm:$0xff]  ;;  %v7942_v24 = vld [vmem:[#allocation53_spill] sm:$0xff] }
 0x7fa   :  { %3511 = vmatprep.subr.bf16.mxu0 %v7932_v20  ;;  %3552 = vmatprep.subr.bf16.mxu1 %v7933_v44  ;;  %v7943_v20 = vld [vmem:[#allocation54_spill] sm:$0xff]  ;;  %v7944_v44 = vld [vmem:[#allocation55_spill] sm:$0xff] }
 0x7fd   :  { %3512 = vmatpush1.bf16.msra.mxu0 %v7934_v8  ;;  %3553 = vmatpush1.bf16.msra.mxu1 %v7935_v33  ;;  %v7945_v8 = vld [vmem:[#allocation56_spill] sm:$0xff]  ;;  %v7946_v33 = vld [vmem:[#allocation57_spill] sm:$0xff] }
 0x7fe   :  { %3513 = vmatprep.subr.bf16.mxu0 %v7936_v43  ;;  %3554 = vmatprep.subr.bf16.mxu1 %v7937_v25  ;;  %v7947_v43 = vld [vmem:[#allocation58_spill] sm:$0xff]  ;;  %v7948_v25 = vld [vmem:[#allocation59_spill] sm:$0xff] }
 0x801   :  { %3514 = vmatpush2.bf16.msra.mxu0 %v7938_v0  ;;  %3555 = vmatpush2.bf16.msra.mxu1 %v7939_v19  ;;  %v7949_v0 = vld [vmem:[#allocation60_spill] sm:$0xff]  ;;  %v7950_v19 = vld [vmem:[#allocation61_spill] sm:$0xff] }
 0x802   :  { %3515 = vmatprep.subr.bf16.mxu0 %v7940_v11  ;;  %3556 = vmatprep.subr.bf16.mxu1 %v7941_v53  ;;  %v7951_v11 = vld [vmem:[#allocation62_spill] sm:$0xff]  ;;  %v7952_v53 = vld [vmem:[#allocation63_spill] sm:$0xff] }
 0x805   :  { %3516 = vmatpush2.bf16.msra.mxu0 %v7942_v24  ;;  %3557 = vmatpush2.bf16.msra.mxu1 %v7943_v20  ;;  %v7953_v24 = vld [vmem:[#allocation64_spill] sm:$0xff]  ;;  %v7954_v20 = vld [vmem:[#allocation65_spill] sm:$0xff] }
 0x806   :  { %3517 = vmatprep.subr.bf16.mxu0 %v7944_v44  ;;  %3558 = vmatprep.subr.bf16.mxu1 %v7945_v8  ;;  %v7955_v44 = vld [vmem:[#allocation66_spill] sm:$0xff]  ;;  %v7956_v8 = vld [vmem:[#allocation67_spill] sm:$0xff] }
 0x809   :  { %3518 = vmatpush2.bf16.msra.mxu0 %v7946_v33  ;;  %3559 = vmatpush2.bf16.msra.mxu1 %v7947_v43  ;;  %v7957_v33 = vld [vmem:[#allocation68_spill] sm:$0xff]  ;;  %v7958_v43 = vld [vmem:[#allocation69_spill] sm:$0xff] }
 0x80a   :  { %3519 = vmatprep.subr.bf16.mxu0 %v7948_v25  ;;  %3560 = vmatprep.subr.bf16.mxu1 %v7949_v0  ;;  %v7959_v25 = vld [vmem:[#allocation70_spill] sm:$0xff]  ;;  %v7960_v0 = vld [vmem:[#allocation71_spill] sm:$0xff] }
 0x80d   :  { %3520 = vmatpush2.bf16.msra.mxu0 %v7950_v19  ;;  %3561 = vmatpush2.bf16.msra.mxu1 %v7951_v11  ;;  %v7961_v19 = vld [vmem:[#allocation72_spill] sm:$0xff]  ;;  %v7962_v11 = vld [vmem:[#allocation73_spill] sm:$0xff] }
 0x80e   :  { %3521 = vmatprep.subr.bf16.mxu0 %v7952_v53  ;;  %3562 = vmatprep.subr.bf16.mxu1 %v7953_v24  ;;  %v7963_v53 = vld [vmem:[#allocation74_spill] sm:$0xff]  ;;  %v7964_v24 = vld [vmem:[#allocation75_spill] sm:$0xff] }
 0x811   :  { %3522 = vmatpush2.bf16.msra.mxu0 %v7954_v20  ;;  %3563 = vmatpush2.bf16.msra.mxu1 %v7955_v44  ;;  %v7965_v20 = vld [vmem:[#allocation76_spill] sm:$0xff]  ;;  %v7966_v44 = vld [vmem:[#allocation77_spill] sm:$0xff] }
 0x812   :  { %3523 = vmatprep.subr.bf16.mxu0 %v7956_v8  ;;  %3564 = vmatprep.subr.bf16.mxu1 %v7957_v33  ;;  %v7967_v8 = vld [vmem:[#allocation78_spill] sm:$0xff]  ;;  %v7968_v33 = vld [vmem:[#allocation79_spill] sm:$0xff] }
 0x815   :  { %3524 = vmatpush2.bf16.msra.mxu0 %v7958_v43  ;;  %3565 = vmatpush2.bf16.msra.mxu1 %v7959_v25  ;;  %v7969_v43 = vld [vmem:[#allocation80_spill] sm:$0xff] }
 0x816   :  { %3525 = vmatprep.subr.bf16.mxu0 %v7960_v0  ;;  %3566 = vmatprep.subr.bf16.mxu1 %v7961_v19 }
 0x819   :  { %3526 = vmatpush2.bf16.msra.mxu0 %v7962_v11  ;;  %3567 = vmatpush2.bf16.msra.mxu1 %v7963_v53 }
 0x81a   :  { %3527 = vmatprep.subr.bf16.mxu0 %v7964_v24  ;;  %3568 = vmatprep.subr.bf16.mxu1 %v7965_v20  ;;  %v3210_v20 = vcombine.high %v7970_v34, %v7970_v34 }
 0x81d   :  { %3528 = vmatpush2.bf16.msra.mxu0 %v7966_v44  ;;  %3569 = vmatpush2.bf16.msra.mxu1 %v7967_v8  ;;  %v7971_v44 = vld [vmem:[#allocation156_spill] sm:$0xff] }
 0x81e   :  { %3579 = vmatprep.subr.bf16.mxu0 %v7968_v33  ;;  %3620 = vmatprep.subr.bf16.mxu1 %v7969_v43  ;;  %v3211_v33 = vcombine.high %v7971_v44, %v7971_v44 }
 0x860   :  { %v3271_v25 = vpop.f32.mrf.mxu0  ;;  %v3312_v0 = vpop.f32.mrf.mxu1 }
 0x861   :  { %v3272_v24 = vadd.f32 %v3271_v25, %v7970_v34  ;;  %v3313_v14 = vadd.f32 %v3312_v0, %v7971_v44 }
 0x862   :  { %v3273_v59 = vpop.f32.mrf.mxu0  ;;  %v3314_v19 = vpop.f32.mrf.mxu1 }
 0x863   :  { %v3274_v8 = vadd.f32 %v3273_v59, %v3210_v20  ;;  %v4424_v43 = vmul.f32 -1.442695, %v3272_v24  ;;  %v3315_v21 = vadd.f32 %v3314_v19, %v3211_v33  ;;  %v4426_v5 = vmul.f32 -1.442695, %v3313_v14  ;;  %v7972_v24 = vld [vmem:[#allocation169_spill] sm:$0xff] }
 0x864   :  { %v3275_v38 = vpop.f32.mrf.mxu0  ;;  %v3316_v11 = vpop.f32.mrf.mxu1  ;;  %v3227_v14 = vcombine.high %v7972_v24, %v7972_v24 }
 0x865   :  { %v4425_v13 = vmul.f32 -1.442695, %v3274_v8  ;;  %4735 = vpow2.f32 %v4424_v43  ;;  %v4427_v38 = vmul.f32 -1.442695, %v3315_v21 }
 0x866   :  { %v3276_v4 = vpop.f32.mrf.mxu0  ;;  %v3317_v53 = vpop.f32.mrf.mxu1  ;;  %4737 = vpow2.f32 %v4426_v5  ;;  %v7973_v5 = vld [vmem:[#allocation170_spill] sm:$0xff] }
 0x867   :  { %4739 = vpow2.f32 %v4425_v13  ;;  %v3228_v8 = vcombine.high %v7973_v5, %v7973_v5 }
 0x868   :  { %4741 = vpow2.f32 %v4427_v38 }
 0x872   :  { %v4736_v4 = vpop.eup %4735 }
 0x873   :  { %v4738_v25 = vpop.eup %4737  ;;  %v3407_v53 = vadd.f32 1.0, %v4736_v4 }
 0x874   :  { %v4740_v11 = vpop.eup %4739  ;;  %v3419_v7 = vadd.f32 1.0, %v4738_v25 }
 0x875   :  { %v4742_v34 = vpop.eup %4741  ;;  %v3408_v0 = vadd.f32 1.0, %v4740_v11  ;;  %4743 = vrcp.f32 %v3407_v53 }
 0x876   :  { %v3420_v59 = vadd.f32 1.0, %v4742_v34  ;;  %4745 = vrcp.f32 %v3419_v7 }
 0x877   :  { %4747 = vrcp.f32 %v3408_v0 }
 0x8a0   :  { %v3353_v20 = vpop.f32.mrf.mxu0  ;;  %v3394_v44 = vpop.f32.mrf.mxu1 }
 0x8a1   :  { %v3354_v21 = vadd.f32 %v3353_v20, %v7972_v24  ;;  %v3395_v13 = vadd.f32 %v3394_v44, %v7973_v5  ;;  %v4744_v20 = vpop.eup %4743 }
 0x8a2   :  { %v3355_v33 = vpop.f32.mrf.mxu0  ;;  %v3396_v43 = vpop.f32.mrf.mxu1 }
 0x8a3   :  { %4749 = vtanh.f32 %v3354_v21  ;;  %v4428_v19 = vmul.f32 -1.442695, %v3395_v13  ;;  %v3356_v38 = vadd.f32 %v3355_v33, %v3227_v14  ;;  %v3397_v4 = vadd.f32 %v3396_v43, %v3228_v8  ;;  %v4746_v44 = vpop.eup %4745 }
 0x8a4   :  { %4751 = vrcp.f32 %v3420_v59  ;;  %v3357_v25 = vpop.f32.mrf.mxu0  ;;  %v3398_v11 = vpop.f32.mrf.mxu1  ;;  %v3439_v51 = vmul.f32 %v4746_v44, %v6436_v55  ;;  %v7975_v44 = vld [vmem:[#allocation123_spill] sm:$0xff] }
 0x8a5   :  { %4753 = vpow2.f32 %v4428_v19  ;;  %v4429_v53 = vmul.f32 -1.442695, %v3397_v4  ;;  %v4748_v24 = vpop.eup %4747 }
 0x8a6   :  { %4755 = vtanh.f32 %v3356_v38  ;;  %v3358_v7 = vpop.f32.mrf.mxu0  ;;  %v3399_v34 = vpop.f32.mrf.mxu1 }
 0x8a7   :  { %4757 = vpow2.f32 %v4429_v53 }
 0x8b0   :  { %v4750_v5 = vpop.eup %4749 }
 0x8b1   :  { %v4752_v0 = vpop.eup %4751  ;;  %v3441_v21 = vmul.f32 %v4750_v5, %v4744_v20  ;;  %v7974_v20 = vld [vmem:[#allocation122_spill] sm:$0xff]  ;;  %v7977_v5 = vld [vmem:[#allocation125_spill] sm:$0xff] }
 0x8b2   :  { %v4754_v13 = vpop.eup %4753  ;;  %v3440_v43 = vmul.f32 %v4752_v0, %v6440_v37  ;;  %v7978_v0 = vld [vmem:[#allocation126_spill] sm:$0xff] }
 0x8b3   :  { %v4756_v14 = vpop.eup %4755  ;;  %v6594_v8 = vadd.f32 %v3441_v21, %v3439_v51  ;;  %v3433_v59 = vadd.f32 1.0, %v4754_v13  ;;  %v7979_v21 = vld [vmem:[#allocation127_spill] sm:$0xff]  ;;  %v7980_v13 = vld [vmem:[#allocation128_spill] sm:$0xff] }
 0x8b4   :  { %v4758_v33 = vpop.eup %4757  ;;  %v3442_v19 = vmul.f32 %v4756_v14, %v4748_v24  ;;  %v7976_v24 = vld [vmem:[#allocation124_spill] sm:$0xff]  ;;  %v7981_v14 = vld [vmem:[#allocation129_spill] sm:$0xff] }
 0x8b5   :  { %4759 = vtanh.f32 %v6594_v8  ;;  %v3434_v38 = vadd.f32 1.0, %v4758_v33  ;;  %v7983_v33 = vld [vmem:[#allocation131_spill] sm:$0xff] }
 0x8b6   :  { %4761 = vrcp.f32 %v3433_v59  ;;  %v6598_v4 = vadd.f32 %v3442_v19, %v3440_v43  ;;  %v7982_v59 = vld [vmem:[#allocation130_spill] sm:$0xff]  ;;  %v7984_v43 = vld [vmem:[#allocation132_spill] sm:$0xff]  ;;  %v7985_v19 = vld [vmem:[#allocation133_spill] sm:$0xff] }
 0x8b7   :  { %4763 = vrcp.f32 %v3434_v38  ;;  %v7986_v38 = vld [vmem:[#allocation134_spill] sm:$0xff] }
 0x8b8   :  { %4765 = vtanh.f32 %v6598_v4 }
 0x8c2   :  { %v4760_v55 = vpop.eup %4759 }
 0x8c3   :  { %v4762_v25 = vpop.eup %4761 }
 0x8c4   :  { %v4764_v11 = vpop.eup %4763  ;;  %v3447_v51 = vmul.f32 %v4762_v25, %v4760_v55  ;;  %v7987_v55 = vld [vmem:[#allocation135_spill] sm:$0xff]  ;;  %v7988_v25 = vld [vmem:[#allocation136_spill] sm:$0xff] }
 0x8c5   :  { %v4766_v53 = vpop.eup %4765 }
 0x8c6   :  { %v6601_v7 = vmul.f32 %v4766_v53, %v4764_v11  ;;  %v6605_v34 = vpack.c.bf16 %v3447_v51, %v3447_v51  ;;  %v7989_v11 = vld [vmem:[#allocation137_spill] sm:$0xff]  ;;  %v7990_v53 = vld [vmem:[#allocation138_spill] sm:$0xff]  ;;  %v7991_v51 = vld [vmem:[#allocation139_spill] sm:$0xff] }
 0x8c8   :  { %v3452_v37 = vpack.c.bf16 %v6601_v7, %v6601_v7 }
 0x8ca   :  { %3529 = vmatprep.mubr.bf16.mxu0 %v3452_v37  ;;  %3570 = vmatprep.mubr.bf16.mxu1 %v3452_v37 }
 0x8cb   :  { %3530 = vmatmul.mubr.bf16.vlgmr.msra.gmra.mxu0 %v6605_v34  ;;  %3571 = vmatmul.mubr.bf16.vlgmr.msra.gmra.mxu1 %v6605_v34 }
 0x8cc   :  { %3580 = vmatpush1.bf16.msra.mxu0 %v7419_v56  ;;  %3621 = vmatpush1.bf16.msra.mxu1 %v7420_v30 }
 0x8cd   :  { %3611 = vmatprep.mubr.bf16.mxu0 %v3452_v37  ;;  %3652 = vmatprep.mubr.bf16.mxu1 %v3452_v37  ;;  %v7992_v37 = vld [vmem:[#allocation140_spill] sm:$0xff] }
 0x8ce   :  { %3581 = vmatprep.subr.bf16.mxu0 %v7421_v27  ;;  %3622 = vmatprep.subr.bf16.mxu1 %v7422_v52 }
 0x8d0   :  { %3582 = vmatpush1.bf16.msra.mxu0 %v7423_v18  ;;  %3623 = vmatpush1.bf16.msra.mxu1 %v7424_v58 }
 0x8d1   :  { %3583 = vmatprep.subr.bf16.mxu0 %v7425_v15  ;;  %3624 = vmatprep.subr.bf16.mxu1 %v7426_v26 }
 0x8d4   :  { %3584 = vmatpush1.bf16.msra.mxu0 %v7427_v12  ;;  %3625 = vmatpush1.bf16.msra.mxu1 %v7428_v54 }
 0x8d5   :  { %3585 = vmatprep.subr.bf16.mxu0 %v7429_v6  ;;  %3626 = vmatprep.subr.bf16.mxu1 %v7513_v57 }
 0x8d8   :  { %3586 = vmatpush1.bf16.msra.mxu0 %v7514_v32  ;;  %3627 = vmatpush1.bf16.msra.mxu1 %v7515_v45 }
 0x8d9   :  { %3587 = vmatprep.subr.bf16.mxu0 %v7516_v36  ;;  %3628 = vmatprep.subr.bf16.mxu1 %v7517_v42 }
 0x8dc   :  { %3588 = vmatpush1.bf16.msra.mxu0 %v7518_v47  ;;  %3629 = vmatpush1.bf16.msra.mxu1 %v7519_v31 }
 0x8dd   :  { %3589 = vmatprep.subr.bf16.mxu0 %v7520_v41  ;;  %3630 = vmatprep.subr.bf16.mxu1 %v7521_v29 }
 0x8e0   :  { %3590 = vmatpush1.bf16.msra.mxu0 %v7522_v28  ;;  %3631 = vmatpush1.bf16.msra.mxu1 %v7605_v62 }
 0x8e1   :  { %3591 = vmatprep.subr.bf16.mxu0 %v7606_v22  ;;  %3632 = vmatprep.subr.bf16.mxu1 %v7607_v60 }
 0x8e4   :  { %3592 = vmatpush1.bf16.msra.mxu0 %v7608_v16  ;;  %3633 = vmatpush1.bf16.msra.mxu1 %v7609_v10 }
 0x8e5   :  { %3593 = vmatprep.subr.bf16.mxu0 %v7528_v1  ;;  %3634 = vmatprep.subr.bf16.mxu1 %v7529_v40 }
 0x8e8   :  { %3594 = vmatpush1.bf16.msra.mxu0 %v7530_v35  ;;  %3635 = vmatpush1.bf16.msra.mxu1 %v7610_v9 }
 0x8e9   :  { %3595 = vmatprep.subr.bf16.mxu0 %v7532_v17  ;;  %3636 = vmatprep.subr.bf16.mxu1 %v7533_v23 }
 0x8ec   :  { %3596 = vmatpush2.bf16.msra.mxu0 %v7534_v39  ;;  %3637 = vmatpush2.bf16.msra.mxu1 %v7535_v48 }
 0x8ed   :  { %3597 = vmatprep.subr.bf16.mxu0 %v7536_v49  ;;  %3638 = vmatprep.subr.bf16.mxu1 %v7537_v50 }
 0x8f0   :  { %3598 = vmatpush2.bf16.msra.mxu0 %v7538_v46  ;;  %3639 = vmatpush2.bf16.msra.mxu1 %v7456_v63 }
 0x8f1   :  { %3599 = vmatprep.subr.bf16.mxu0 %v7457_v2  ;;  %3640 = vmatprep.subr.bf16.mxu1 %v7458_v3 }
 0x8f4   :  { %3600 = vmatpush2.bf16.msra.mxu0 %v7790_v61  ;;  %3641 = vmatpush2.bf16.msra.mxu1 %v7974_v20 }
 0x8f5   :  { %3601 = vmatprep.subr.bf16.mxu0 %v7975_v44  ;;  %3642 = vmatprep.subr.bf16.mxu1 %v7976_v24 }
 0x8f8   :  { %3602 = vmatpush2.bf16.msra.mxu0 %v7977_v5  ;;  %3643 = vmatpush2.bf16.msra.mxu1 %v7978_v0 }
 0x8f9   :  { %3603 = vmatprep.subr.bf16.mxu0 %v7979_v21  ;;  %3644 = vmatprep.subr.bf16.mxu1 %v7980_v13  ;;  %v8061_v21 = vld [vmem:[#allocation157_spill] sm:$0xff] }
 0x8fc   :  { %3604 = vmatpush2.bf16.msra.mxu0 %v7981_v14  ;;  %3645 = vmatpush2.bf16.msra.mxu1 %v7982_v59  ;;  %v7993_v59 = vld [vmem:[#allocation141_spill] sm:$0xff] }
 0x8fd   :  { %3605 = vmatprep.subr.bf16.mxu0 %v7983_v33  ;;  %3646 = vmatprep.subr.bf16.mxu1 %v7984_v43  ;;  %v7994_v33 = vld [vmem:[#allocation142_spill] sm:$0xff]  ;;  %v7995_v43 = vld [vmem:[#allocation15_spill] sm:$0xff] }
 0x900   :  { %3606 = vmatpush2.bf16.msra.mxu0 %v7985_v19  ;;  %3647 = vmatpush2.bf16.msra.mxu1 %v7986_v38  ;;  %v7996_v19 = vld [vmem:[#allocation16_spill] sm:$0xff] }
 0x901   :  { %3607 = vmatprep.subr.bf16.mxu0 %v7987_v55  ;;  %3648 = vmatprep.subr.bf16.mxu1 %v7988_v25  ;;  %v7997_v25 = vld [vmem:[#allocation17_spill] sm:$0xff]  ;;  %v8006_v55 = vld [vmem:[#allocation26_spill] sm:$0xff] }
 0x904   :  { %3608 = vmatpush2.bf16.msra.mxu0 %v7989_v11  ;;  %3649 = vmatpush2.bf16.msra.mxu1 %v7990_v53  ;;  %v7998_v11 = vld [vmem:[#allocation18_spill] sm:$0xff]  ;;  %v7999_v53 = vld [vmem:[#allocation19_spill] sm:$0xff] }
 0x905   :  { %3609 = vmatprep.subr.bf16.mxu0 %v7991_v51  ;;  %3650 = vmatprep.subr.bf16.mxu1 %v7992_v37  ;;  %v8000_v51 = vld [vmem:[#allocation20_spill] sm:$0xff]  ;;  %v8001_v37 = vld [vmem:[#allocation21_spill] sm:$0xff] }
 0x908   :  { %3610 = vmatpush2.bf16.msra.mxu0 %v7993_v59  ;;  %3651 = vmatpush2.bf16.msra.mxu1 %v7994_v33  ;;  %v8002_v59 = vld [vmem:[#allocation22_spill] sm:$0xff]  ;;  %v8003_v33 = vld [vmem:[#allocation23_spill] sm:$0xff] }
 0x909   :  { %3711 = vmatprep.subr.bf16.mxu0 %v7995_v43  ;;  %3751 = vmatprep.subr.bf16.mxu1 %v7996_v19  ;;  %v8004_v43 = vld [vmem:[#allocation24_spill] sm:$0xff]  ;;  %v8005_v19 = vld [vmem:[#allocation25_spill] sm:$0xff] }
 0x90b   :  { %3612 = vmatmul.mubr.bf16.vlgmr.msra.gmra.mxu0 %v6605_v34  ;;  %3653 = vmatmul.mubr.bf16.vlgmr.msra.gmra.mxu1 %v6605_v34  ;;  %v8007_v34 = vld [vmem:[#allocation27_spill] sm:$0xff] }
 0x90c   :  { %3712 = vmatpush1.bf16.msra.mxu0 %v7997_v25  ;;  %3752 = vmatpush1.bf16.msra.mxu1 %v7998_v11  ;;  %v8008_v25 = vld [vmem:[#allocation28_spill] sm:$0xff]  ;;  %v8009_v11 = vld [vmem:[#allocation29_spill] sm:$0xff] }
 0x90d   :  { %3713 = vmatprep.subr.bf16.mxu0 %v7999_v53  ;;  %3753 = vmatprep.subr.bf16.mxu1 %v8000_v51  ;;  %v8010_v53 = vld [vmem:[#allocation30_spill] sm:$0xff]  ;;  %v8011_v51 = vld [vmem:[#allocation31_spill] sm:$0xff] }
 0x910   :  { %3714 = vmatpush1.bf16.msra.mxu0 %v8001_v37  ;;  %3754 = vmatpush1.bf16.msra.mxu1 %v8002_v59  ;;  %v8012_v37 = vld [vmem:[#allocation32_spill] sm:$0xff]  ;;  %v8013_v59 = vld [vmem:[#allocation33_spill] sm:$0xff] }
 0x911   :  { %3715 = vmatprep.subr.bf16.mxu0 %v8003_v33  ;;  %3755 = vmatprep.subr.bf16.mxu1 %v8004_v43  ;;  %v8014_v33 = vld [vmem:[#allocation34_spill] sm:$0xff]  ;;  %v8015_v43 = vld [vmem:[#allocation35_spill] sm:$0xff] }
 0x914   :  { %3716 = vmatpush1.bf16.msra.mxu0 %v8005_v19  ;;  %3756 = vmatpush1.bf16.msra.mxu1 %v8006_v55  ;;  %v8016_v19 = vld [vmem:[#allocation36_spill] sm:$0xff]  ;;  %v8017_v55 = vld [vmem:[#allocation37_spill] sm:$0xff] }
 0x915   :  { %3717 = vmatprep.subr.bf16.mxu0 %v8007_v34  ;;  %3757 = vmatprep.subr.bf16.mxu1 %v8008_v25  ;;  %v8018_v34 = vld [vmem:[#allocation38_spill] sm:$0xff]  ;;  %v8019_v25 = vld [vmem:[#allocation39_spill] sm:$0xff] }
 0x918   :  { %3718 = vmatpush1.bf16.msra.mxu0 %v8009_v11  ;;  %3758 = vmatpush1.bf16.msra.mxu1 %v8010_v53  ;;  %v8020_v11 = vld [vmem:[#allocation40_spill] sm:$0xff]  ;;  %v8021_v53 = vld [vmem:[#allocation41_spill] sm:$0xff] }
 0x919   :  { %3719 = vmatprep.subr.bf16.mxu0 %v8011_v51  ;;  %3759 = vmatprep.subr.bf16.mxu1 %v8012_v37  ;;  %v8022_v51 = vld [vmem:[#allocation42_spill] sm:$0xff]  ;;  %v8023_v37 = vld [vmem:[#allocation43_spill] sm:$0xff] }
 0x91c   :  { %3720 = vmatpush1.bf16.msra.mxu0 %v8013_v59  ;;  %3760 = vmatpush1.bf16.msra.mxu1 %v8014_v33  ;;  %v8024_v59 = vld [vmem:[#allocation44_spill] sm:$0xff]  ;;  %v8025_v33 = vld [vmem:[#allocation45_spill] sm:$0xff] }
 0x91d   :  { %3721 = vmatprep.subr.bf16.mxu0 %v8015_v43  ;;  %3761 = vmatprep.subr.bf16.mxu1 %v8016_v19  ;;  %v8026_v43 = vld [vmem:[#allocation46_spill] sm:$0xff]  ;;  %v8027_v19 = vld [vmem:[#allocation47_spill] sm:$0xff] }
 0x920   :  { %3722 = vmatpush1.bf16.msra.mxu0 %v8017_v55  ;;  %3762 = vmatpush1.bf16.msra.mxu1 %v8018_v34  ;;  %v8028_v55 = vld [vmem:[#allocation48_spill] sm:$0xff]  ;;  %v8029_v34 = vld [vmem:[#allocation49_spill] sm:$0xff] }
 0x921   :  { %3723 = vmatprep.subr.bf16.mxu0 %v8019_v25  ;;  %3763 = vmatprep.subr.bf16.mxu1 %v8020_v11  ;;  %v8030_v25 = vld [vmem:[#allocation50_spill] sm:$0xff]  ;;  %v8031_v11 = vld [vmem:[#allocation51_spill] sm:$0xff] }
 0x924   :  { %3724 = vmatpush1.bf16.msra.mxu0 %v8021_v53  ;;  %3764 = vmatpush1.bf16.msra.mxu1 %v8022_v51  ;;  %v8032_v53 = vld [vmem:[#allocation52_spill] sm:$0xff]  ;;  %v8033_v51 = vld [vmem:[#allocation53_spill] sm:$0xff] }
 0x925   :  { %3725 = vmatprep.subr.bf16.mxu0 %v8023_v37  ;;  %3765 = vmatprep.subr.bf16.mxu1 %v8024_v59  ;;  %v8034_v37 = vld [vmem:[#allocation54_spill] sm:$0xff]  ;;  %v8035_v59 = vld [vmem:[#allocation55_spill] sm:$0xff] }
 0x928   :  { %3726 = vmatpush1.bf16.msra.mxu0 %v8025_v33  ;;  %3766 = vmatpush1.bf16.msra.mxu1 %v8026_v43  ;;  %v8036_v33 = vld [vmem:[#allocation56_spill] sm:$0xff]  ;;  %v8037_v43 = vld [vmem:[#allocation57_spill] sm:$0xff] }
 0x929   :  { %3727 = vmatprep.subr.bf16.mxu0 %v8027_v19  ;;  %3767 = vmatprep.subr.bf16.mxu1 %v8028_v55  ;;  %v8038_v19 = vld [vmem:[#allocation58_spill] sm:$0xff]  ;;  %v8039_v55 = vld [vmem:[#allocation59_spill] sm:$0xff] }
 0x92c   :  { %3728 = vmatpush2.bf16.msra.mxu0 %v8029_v34  ;;  %3768 = vmatpush2.bf16.msra.mxu1 %v8030_v25  ;;  %v8040_v34 = vld [vmem:[#allocation60_spill] sm:$0xff]  ;;  %v8041_v25 = vld [vmem:[#allocation61_spill] sm:$0xff] }
 0x92d   :  { %3729 = vmatprep.subr.bf16.mxu0 %v8031_v11  ;;  %3769 = vmatprep.subr.bf16.mxu1 %v8032_v53  ;;  %v8042_v11 = vld [vmem:[#allocation62_spill] sm:$0xff]  ;;  %v8043_v53 = vld [vmem:[#allocation63_spill] sm:$0xff] }
 0x930   :  { %3730 = vmatpush2.bf16.msra.mxu0 %v8033_v51  ;;  %3770 = vmatpush2.bf16.msra.mxu1 %v8034_v37  ;;  %v8044_v51 = vld [vmem:[#allocation64_spill] sm:$0xff]  ;;  %v8045_v37 = vld [vmem:[#allocation65_spill] sm:$0xff] }
 0x931   :  { %3731 = vmatprep.subr.bf16.mxu0 %v8035_v59  ;;  %3771 = vmatprep.subr.bf16.mxu1 %v8036_v33  ;;  %v8046_v59 = vld [vmem:[#allocation66_spill] sm:$0xff]  ;;  %v8047_v33 = vld [vmem:[#allocation67_spill] sm:$0xff] }
 0x934   :  { %3732 = vmatpush2.bf16.msra.mxu0 %v8037_v43  ;;  %3772 = vmatpush2.bf16.msra.mxu1 %v8038_v19  ;;  %v8048_v43 = vld [vmem:[#allocation68_spill] sm:$0xff]  ;;  %v8049_v19 = vld [vmem:[#allocation69_spill] sm:$0xff] }
 0x935   :  { %3733 = vmatprep.subr.bf16.mxu0 %v8039_v55  ;;  %3773 = vmatprep.subr.bf16.mxu1 %v8040_v34  ;;  %v8050_v55 = vld [vmem:[#allocation70_spill] sm:$0xff]  ;;  %v8051_v34 = vld [vmem:[#allocation71_spill] sm:$0xff] }
 0x938   :  { %3734 = vmatpush2.bf16.msra.mxu0 %v8041_v25  ;;  %3774 = vmatpush2.bf16.msra.mxu1 %v8042_v11  ;;  %v8052_v25 = vld [vmem:[#allocation72_spill] sm:$0xff]  ;;  %v8053_v11 = vld [vmem:[#allocation73_spill] sm:$0xff] }
 0x939   :  { %3735 = vmatprep.subr.bf16.mxu0 %v8043_v53  ;;  %3775 = vmatprep.subr.bf16.mxu1 %v8044_v51  ;;  %v8054_v53 = vld [vmem:[#allocation74_spill] sm:$0xff]  ;;  %v8055_v51 = vld [vmem:[#allocation75_spill] sm:$0xff] }
 0x93c   :  { %3736 = vmatpush2.bf16.msra.mxu0 %v8045_v37  ;;  %3776 = vmatpush2.bf16.msra.mxu1 %v8046_v59  ;;  %v8056_v37 = vld [vmem:[#allocation76_spill] sm:$0xff]  ;;  %v8057_v59 = vld [vmem:[#allocation77_spill] sm:$0xff] }
 0x93d   :  { %3737 = vmatprep.subr.bf16.mxu0 %v8047_v33  ;;  %3777 = vmatprep.subr.bf16.mxu1 %v8048_v43  ;;  %v8058_v33 = vld [vmem:[#allocation78_spill] sm:$0xff]  ;;  %v8059_v43 = vld [vmem:[#allocation79_spill] sm:$0xff] }
 0x940   :  { %3738 = vmatpush2.bf16.msra.mxu0 %v8049_v19  ;;  %3778 = vmatpush2.bf16.msra.mxu1 %v8050_v55  ;;  %v8060_v19 = vld [vmem:[#allocation80_spill] sm:$0xff] }
 0x941   :  { %3739 = vmatprep.subr.bf16.mxu0 %v8051_v34  ;;  %3779 = vmatprep.subr.bf16.mxu1 %v8052_v25 }
 0x944   :  { %3740 = vmatpush2.bf16.msra.mxu0 %v8053_v11  ;;  %3780 = vmatpush2.bf16.msra.mxu1 %v8054_v53 }
 0x945   :  { %3741 = vmatprep.subr.bf16.mxu0 %v8055_v51  ;;  %3781 = vmatprep.subr.bf16.mxu1 %v8056_v37  ;;  %v3470_v37 = vcombine.high %v8061_v21, %v8061_v21 }
 0x948   :  { %3742 = vmatpush2.bf16.msra.mxu0 %v8057_v59  ;;  %3782 = vmatpush2.bf16.msra.mxu1 %v8058_v33  ;;  %v8062_v59 = vld [vmem:[#allocation158_spill] sm:$0xff] }
 0x949   :  { %3791 = vmatprep.subr.bf16.mxu0 %v8059_v43  ;;  %3831 = vmatprep.subr.bf16.mxu1 %v8060_v19  ;;  %v3471_v43 = vcombine.high %v8062_v59, %v8062_v59 }
 0x98b   :  { %v3531_v55 = vpop.f32.mrf.mxu0  ;;  %v3572_v34 = vpop.f32.mrf.mxu1 }
 0x98c   :  { %v3532_v51 = vadd.f32 %v3531_v55, %v8061_v21  ;;  %v3573_v0 = vadd.f32 %v3572_v34, %v8062_v59 }
 0x98d   :  { %v3533_v38 = vpop.f32.mrf.mxu0  ;;  %v3574_v25 = vpop.f32.mrf.mxu1 }
 0x98e   :  { %v3534_v33 = vadd.f32 %v3533_v38, %v3470_v37  ;;  %v4430_v19 = vmul.f32 -1.442695, %v3532_v51  ;;  %v3575_v5 = vadd.f32 %v3574_v25, %v3471_v43  ;;  %v4432_v24 = vmul.f32 -1.442695, %v3573_v0  ;;  %v8063_v51 = vld [vmem:[#allocation171_spill] sm:$0xff] }
 0x98f   :  { %v3535_v14 = vpop.f32.mrf.mxu0  ;;  %v3576_v11 = vpop.f32.mrf.mxu1  ;;  %v3487_v0 = vcombine.high %v8063_v51, %v8063_v51 }
 0x990   :  { %v4431_v44 = vmul.f32 -1.442695, %v3534_v33  ;;  %4767 = vpow2.f32 %v4430_v19  ;;  %v4433_v14 = vmul.f32 -1.442695, %v3575_v5 }
 0x991   :  { %v3536_v13 = vpop.f32.mrf.mxu0  ;;  %v3577_v53 = vpop.f32.mrf.mxu1  ;;  %4769 = vpow2.f32 %v4432_v24  ;;  %v8064_v24 = vld [vmem:[#allocation172_spill] sm:$0xff] }
 0x992   :  { %4771 = vpow2.f32 %v4431_v44  ;;  %v3488_v25 = vcombine.high %v8064_v24, %v8064_v24 }
 0x993   :  { %4773 = vpow2.f32 %v4433_v14 }
 0x99d   :  { %v4768_v13 = vpop.eup %4767 }
 0x99e   :  { %v4770_v55 = vpop.eup %4769  ;;  %v3667_v53 = vadd.f32 1.0, %v4768_v13 }
 0x99f   :  { %v4772_v11 = vpop.eup %4771  ;;  %v3679_v20 = vadd.f32 1.0, %v4770_v55 }
 0x9a0   :  { %v4774_v21 = vpop.eup %4773  ;;  %v3668_v34 = vadd.f32 1.0, %v4772_v11  ;;  %4775 = vrcp.f32 %v3667_v53 }
 0x9a1   :  { %v3680_v38 = vadd.f32 1.0, %v4774_v21  ;;  %4777 = vrcp.f32 %v3679_v20 }
 0x9a2   :  { %4779 = vrcp.f32 %v3668_v34 }
 0x9cb   :  { %v3613_v37 = vpop.f32.mrf.mxu0  ;;  %v3654_v59 = vpop.f32.mrf.mxu1 }
 0x9cc   :  { %v3614_v5 = vadd.f32 %v3613_v37, %v8063_v51  ;;  %v3655_v44 = vadd.f32 %v3654_v59, %v8064_v24  ;;  %v4776_v37 = vpop.eup %4775 }
 0x9cd   :  { %v3615_v33 = vpop.f32.mrf.mxu0  ;;  %v3656_v43 = vpop.f32.mrf.mxu1 }
 0x9ce   :  { %4781 = vtanh.f32 %v3614_v5  ;;  %v4434_v19 = vmul.f32 -1.442695, %v3655_v44  ;;  %v3616_v14 = vadd.f32 %v3615_v33, %v3487_v0  ;;  %v3657_v13 = vadd.f32 %v3656_v43, %v3488_v25  ;;  %v4778_v59 = vpop.eup %4777 }
 0x9cf   :  { %4783 = vrcp.f32 %v3680_v38  ;;  %v3617_v55 = vpop.f32.mrf.mxu0  ;;  %v3658_v11 = vpop.f32.mrf.mxu1  ;;  %v3699_v61 = vmul.f32 %v4778_v59, %v6594_v8 }
 0x9d0   :  { %4785 = vpow2.f32 %v4434_v19  ;;  %v4435_v53 = vmul.f32 -1.442695, %v3657_v13  ;;  %v4780_v51 = vpop.eup %4779 }
 0x9d1   :  { %4787 = vtanh.f32 %v3616_v14  ;;  %v3618_v20 = vpop.f32.mrf.mxu0  ;;  %v3659_v21 = vpop.f32.mrf.mxu1 }
 0x9d2   :  { %4789 = vpow2.f32 %v4435_v53 }
 0x9db   :  { %v4782_v24 = vpop.eup %4781 }
 0x9dc   :  { %v4784_v34 = vpop.eup %4783  ;;  %v3701_v5 = vmul.f32 %v4782_v24, %v4776_v37 }
 0x9dd   :  { %v4786_v44 = vpop.eup %4785  ;;  %v3700_v43 = vmul.f32 %v4784_v34, %v6598_v4 }
 0x9de   :  { %v4788_v0 = vpop.eup %4787  ;;  %v3703_v25 = vadd.f32 %v3701_v5, %v3699_v61  ;;  %v3693_v38 = vadd.f32 1.0, %v4786_v44  ;;  %v3911_v61 = vrot.slane %v6601_v7, 6 }
 0x9df   :  { %v4790_v33 = vpop.eup %4789  ;;  %v3702_v19 = vmul.f32 %v4788_v0, %v4780_v51  ;;  %v8065_v51 = vld [vmem:[#allocation83_spill] sm:$0xff] }
 0x9e0   :  { %4791 = vtanh.f32 %v3703_v25  ;;  %3898 = vst [vmem:[#allocation9] sm:$0x3] %v3703_v25  ;;  %v3694_v14 = vadd.f32 1.0, %v4790_v33  ;;  %v3925_v24 = vsel %vm3919_vm0, %v8065_v51, %v3911_v61  ;;  %v8088_v25 = vld [vmem:[#allocation144_spill] sm:$0xff]  ;;  %v8089_v33 = vld [vmem:[#allocation143_spill] sm:$0xff] }
 0x9e1   :  { %4793 = vrcp.f32 %v3693_v38  ;;  %v6753_v13 = vadd.f32 %v3702_v19, %v3700_v43  ;;  %v8091_v51 = vld [vmem:[#allocation160_spill] sm:$0xff] }
 0x9e2   :  { %4795 = vrcp.f32 %v3694_v14 }
 0x9e3   :  { %4797 = vtanh.f32 %v6753_v13 }
 0x9ed   :  { %v4792_v55 = vpop.eup %4791 }
 0x9ee   :  { %v4794_v8 = vpop.eup %4793 }
 0x9ef   :  { %v4796_v11 = vpop.eup %4795  ;;  %v3707_v53 = vmul.f32 %v4794_v8, %v4792_v55 }
 0x9f0   :  { %v4798_v20 = vpop.eup %4797 }
 0x9f1   :  { %v3708_v21 = vmul.f32 %v4798_v20, %v4796_v11  ;;  %3895 = vst [vmem:[#allocation8] sm:$0x3] %v3707_v53  ;;  %v6757_v59 = vpack.c.bf16 %v3707_v53, %v3707_v53 }
 0x9f3   :  { %v3710_v4 = vpack.c.bf16 %v3708_v21, %v3708_v21  ;;  %v3914_v37 = vrot.slane %v3708_v21, 4 }
 0x9f5   :  { %3743 = vmatprep.mubr.bf16.mxu0 %v3710_v4  ;;  %3783 = vmatprep.mubr.bf16.mxu1 %v3710_v4  ;;  %v6762_v34 = vsel %vm3921_vm1, %v3925_v24, %v3914_v37  ;;  %v8090_v37 = vld [vmem:[#allocation159_spill] sm:$0xff] }
 0x9f6   :  { %3744 = vmatmul.mubr.bf16.vlgmr.msra.gmra.mxu0 %v6757_v59  ;;  %3784 = vmatmul.mubr.bf16.vlgmr.msra.gmra.mxu1 %v6757_v59 }
 0x9f7   :  { %3792 = vmatpush1.bf16.msra.mxu0 %v7419_v56  ;;  %3832 = vmatpush1.bf16.msra.mxu1 %v7420_v30  ;;  %v8066_v56 = vld [vmem:[#allocation121_spill] sm:$0xff]  ;;  %v8067_v30 = vld [vmem:[#allocation122_spill] sm:$0xff] }
 0x9f8   :  { %3823 = vmatprep.mubr.bf16.mxu0 %v3710_v4  ;;  %3863 = vmatprep.mubr.bf16.mxu1 %v3710_v4 }
 0x9f9   :  { %3793 = vmatprep.subr.bf16.mxu0 %v7421_v27  ;;  %3833 = vmatprep.subr.bf16.mxu1 %v7422_v52  ;;  %v8068_v27 = vld [vmem:[#allocation123_spill] sm:$0xff]  ;;  %v8069_v52 = vld [vmem:[#allocation124_spill] sm:$0xff] }
 0x9fb   :  { %3794 = vmatpush1.bf16.msra.mxu0 %v7423_v18  ;;  %3834 = vmatpush1.bf16.msra.mxu1 %v7424_v58  ;;  %v8070_v18 = vld [vmem:[#allocation125_spill] sm:$0xff]  ;;  %v8071_v58 = vld [vmem:[#allocation126_spill] sm:$0xff] }
 0x9fc   :  { %3795 = vmatprep.subr.bf16.mxu0 %v7425_v15  ;;  %3835 = vmatprep.subr.bf16.mxu1 %v7426_v26  ;;  %v8072_v15 = vld [vmem:[#allocation127_spill] sm:$0xff]  ;;  %v8073_v26 = vld [vmem:[#allocation128_spill] sm:$0xff] }
 0x9ff   :  { %3796 = vmatpush1.bf16.msra.mxu0 %v7427_v12  ;;  %3836 = vmatpush1.bf16.msra.mxu1 %v7428_v54  ;;  %v8074_v12 = vld [vmem:[#allocation129_spill] sm:$0xff]  ;;  %v8075_v54 = vld [vmem:[#allocation130_spill] sm:$0xff] }
 0xa00   :  { %3797 = vmatprep.subr.bf16.mxu0 %v7429_v6  ;;  %3837 = vmatprep.subr.bf16.mxu1 %v7513_v57  ;;  %v8076_v6 = vld [vmem:[#allocation131_spill] sm:$0xff]  ;;  %v8081_v57 = vld [vmem:[#allocation136_spill] sm:$0xff] }
 0xa03   :  { %3798 = vmatpush1.bf16.msra.mxu0 %v7514_v32  ;;  %3838 = vmatpush1.bf16.msra.mxu1 %v7515_v45  ;;  %v8082_v32 = vld [vmem:[#allocation137_spill] sm:$0xff]  ;;  %v8083_v45 = vld [vmem:[#allocation138_spill] sm:$0xff] }
 0xa04   :  { %3799 = vmatprep.subr.bf16.mxu0 %v7516_v36  ;;  %3839 = vmatprep.subr.bf16.mxu1 %v7517_v42  ;;  %v8084_v36 = vld [vmem:[#allocation139_spill] sm:$0xff]  ;;  %v8085_v42 = vld [vmem:[#allocation140_spill] sm:$0xff] }
 0xa07   :  { %3800 = vmatpush1.bf16.msra.mxu0 %v7518_v47  ;;  %3840 = vmatpush1.bf16.msra.mxu1 %v7519_v31  ;;  %v8086_v47 = vld [vmem:[#allocation141_spill] sm:$0xff]  ;;  %v8087_v31 = vld [vmem:[#allocation142_spill] sm:$0xff] }
 0xa08   :  { %3801 = vmatprep.subr.bf16.mxu0 %v7520_v41  ;;  %3841 = vmatprep.subr.bf16.mxu1 %v7521_v29  ;;  %v4543_v41 = vld [vmem:[%s6932_s6 + $0x38] sm:$0xff]   ;;  %v4909_v29 = vmov 0.0  }
 0xa0b   :  { %3802 = vmatpush1.bf16.msra.mxu0 %v7522_v28  ;;  %3842 = vmatpush1.bf16.msra.mxu1 %v7605_v62  ;;  %v4544_v28 = vld [vmem:[%s6932_s6 + $0x30] sm:$0xff]   ;;  %v4554_v62 = vld [vmem:[%s6934_s8 + $0x20] sm:$0xff]  }
 0xa0c   :  { %3803 = vmatprep.subr.bf16.mxu0 %v7606_v22  ;;  %3843 = vmatprep.subr.bf16.mxu1 %v7607_v60  ;;  %v4555_v22 = vld [vmem:[%s6934_s8 + $0x18] sm:$0xff]  }
 0xa0f   :  { %3804 = vmatpush1.bf16.msra.mxu0 %v7608_v16  ;;  %3844 = vmatpush1.bf16.msra.mxu1 %v7609_v10 }
 0xa10   :  { %3805 = vmatprep.subr.bf16.mxu0 %v7528_v1  ;;  %3845 = vmatprep.subr.bf16.mxu1 %v7529_v40  ;;  %v4550_v1 = vld [vmem:[%s6932_s6] sm:$0xff]   ;;  %v4551_v40 = vld [vmem:[%s6934_s8 + $0x38] sm:$0xff]  }
 0xa13   :  { %3806 = vmatpush1.bf16.msra.mxu0 %v7530_v35  ;;  %3846 = vmatpush1.bf16.msra.mxu1 %v7610_v9  ;;  %v4552_v35 = vld [vmem:[%s6934_s8 + $0x30] sm:$0xff]  }
 0xa14   :  { %3807 = vmatprep.subr.bf16.mxu0 %v7532_v17  ;;  %3847 = vmatprep.subr.bf16.mxu1 %v7533_v23  ;;  %v8080_v23 = vld [vmem:[#allocation135_spill] sm:$0xff] }
 0xa15   :  { %v4553_v17 = vld [vmem:[%s6934_s8 + $0x28] sm:$0xff]  }
 0xa17   :  { %3808 = vmatpush2.bf16.msra.mxu0 %v7534_v39  ;;  %3848 = vmatpush2.bf16.msra.mxu1 %v7535_v48  ;;  %v4545_v39 = vld [vmem:[%s6932_s6 + $0x28] sm:$0xff]   ;;  %v4546_v48 = vld [vmem:[%s6932_s6 + $0x20] sm:$0xff]  }
 0xa18   :  { %3809 = vmatprep.subr.bf16.mxu0 %v7536_v49  ;;  %3849 = vmatprep.subr.bf16.mxu1 %v7537_v50  ;;  %v4547_v49 = vld [vmem:[%s6932_s6 + $0x18] sm:$0xff]   ;;  %v4548_v50 = vld [vmem:[%s6932_s6 + $0x10] sm:$0xff]  }
 0xa1b   :  { %3810 = vmatpush2.bf16.msra.mxu0 %v7538_v46  ;;  %3850 = vmatpush2.bf16.msra.mxu1 %v7456_v63  ;;  %v8077_v63 = vld [vmem:[#allocation132_spill] sm:$0xff]  ;;  %v4549_v46 = vld [vmem:[%s6932_s6 + $0x8] sm:$0xff]  }
 0xa1c   :  { %3811 = vmatprep.subr.bf16.mxu0 %v7457_v2  ;;  %3851 = vmatprep.subr.bf16.mxu1 %v7458_v3  ;;  %v8078_v2 = vld [vmem:[#allocation133_spill] sm:$0xff]  ;;  %v8079_v3 = vld [vmem:[#allocation134_spill] sm:$0xff] }
 0xa1f   :  { %3812 = vmatpush2.bf16.msra.mxu0 %v8066_v56  ;;  %3852 = vmatpush2.bf16.msra.mxu1 %v8067_v30 }
 0xa20   :  { %3813 = vmatprep.subr.bf16.mxu0 %v8068_v27  ;;  %3853 = vmatprep.subr.bf16.mxu1 %v8069_v52 }
 0xa23   :  { %3814 = vmatpush2.bf16.msra.mxu0 %v8070_v18  ;;  %3854 = vmatpush2.bf16.msra.mxu1 %v8071_v58 }
 0xa24   :  { %3815 = vmatprep.subr.bf16.mxu0 %v8072_v15  ;;  %3855 = vmatprep.subr.bf16.mxu1 %v8073_v26 }
 0xa27   :  { %3816 = vmatpush2.bf16.msra.mxu0 %v8074_v12  ;;  %3856 = vmatpush2.bf16.msra.mxu1 %v8075_v54 }
 0xa28   :  { %3817 = vmatprep.subr.bf16.mxu0 %v8076_v6  ;;  %3857 = vmatprep.subr.bf16.mxu1 %v8077_v63 }
 0xa2b   :  { %3818 = vmatpush2.bf16.msra.mxu0 %v8078_v2  ;;  %3858 = vmatpush2.bf16.msra.mxu1 %v8079_v3 }
 0xa2c   :  { %3819 = vmatprep.subr.bf16.mxu0 %v8080_v23  ;;  %3859 = vmatprep.subr.bf16.mxu1 %v8081_v57 }
 0xa2f   :  { %3820 = vmatpush2.bf16.msra.mxu0 %v8082_v32  ;;  %3860 = vmatpush2.bf16.msra.mxu1 %v8083_v45 }
 0xa30   :  { %3821 = vmatprep.subr.bf16.mxu0 %v8084_v36  ;;  %3861 = vmatprep.subr.bf16.mxu1 %v8085_v42  ;;  %v8092_v36 = vld [vmem:[#allocation82_spill] sm:$0xff] }
 0xa33   :  { %3822 = vmatpush2.bf16.msra.mxu0 %v8086_v47  ;;  %3862 = vmatpush2.bf16.msra.mxu1 %v8087_v31  ;;  %v4557_v47 = vld [vmem:[%s6934_s8 + $0x8] sm:$0xff]   ;;  %v4439_v31 = vld [vmem:[%s6933_s7] ss:$0 sm:$0xff] }
 0xa34   :  { %4491 = vmatprep.subr.bf16.mxu0 %v4909_v29  ;;  %4511 = vmatprep.subr.bf16.mxu1 %v4909_v29 }
 0xa36   :  { %3824 = vmatmul.mubr.bf16.vlgmr.msra.gmra.mxu0 %v6757_v59  ;;  %3864 = vmatmul.mubr.bf16.vlgmr.msra.gmra.mxu1 %v6757_v59 }
 0xa37   :  { %4492 = vmatpush3.bf16.msra.mxu0 %v4543_v41  ;;  %4507 = vmatprep.mubr.msk.bf16.mxu0 %vm4910_vm3, %v4909_v29 }
 0xa38   :  { %4493 = vmatprep.subr.bf16.mxu0 %v4909_v29  ;;  %4527 = vmatprep.mubr.msk.bf16.mxu1 %vm4910_vm3, %v4909_v29 }
 0xa39   :  { %4512 = vmatpush3.bf16.msra.mxu1 %v4551_v40 }
 0xa3a   :  { %4513 = vmatprep.subr.bf16.mxu1 %v4909_v29 }
 0xa3b   :  { %4494 = vmatpush3.bf16.msra.mxu0 %v4544_v28 }
 0xa3c   :  { %4495 = vmatprep.subr.bf16.mxu0 %v4909_v29 }
 0xa3d   :  { %4514 = vmatpush3.bf16.msra.mxu1 %v4552_v35 }
 0xa3e   :  { %4515 = vmatprep.subr.bf16.mxu1 %v4909_v29 }
 0xa3f   :  { %4496 = vmatpush3.bf16.msra.mxu0 %v4545_v39 }
 0xa40   :  { %4497 = vmatprep.subr.bf16.mxu0 %v4909_v29 }
 0xa41   :  { %4516 = vmatpush3.bf16.msra.mxu1 %v4553_v17 }
 0xa42   :  { %4517 = vmatprep.subr.bf16.mxu1 %v4909_v29 }
 0xa43   :  { %4498 = vmatpush3.bf16.msra.mxu0 %v4546_v48 }
 0xa44   :  { %4499 = vmatprep.subr.bf16.mxu0 %v4909_v29 }
 0xa45   :  { %4518 = vmatpush3.bf16.msra.mxu1 %v4554_v62 }
 0xa46   :  { %4519 = vmatprep.subr.bf16.mxu1 %v4909_v29 }
 0xa47   :  { %4500 = vmatpush3.bf16.msra.mxu0 %v4547_v49 }
 0xa48   :  { %4501 = vmatprep.subr.bf16.mxu0 %v4909_v29 }
 0xa49   :  { %4520 = vmatpush3.bf16.msra.mxu1 %v4555_v22 }
 0xa4a   :  { %4521 = vmatprep.subr.bf16.mxu1 %v4909_v29 }
 0xa4b   :  { %4502 = vmatpush3.bf16.msra.mxu0 %v4548_v50 }
 0xa4c   :  { %4503 = vmatprep.subr.bf16.mxu0 %v4909_v29 }
 0xa4f   :  { %4504 = vmatpush3.bf16.msra.mxu0 %v4549_v46 }
 0xa50   :  { %4505 = vmatprep.subr.bf16.mxu0 %v4909_v29 }
 0xa53   :  { %4506 = vmatpush3.bf16.msra.mxu0 %v4550_v1 }
 0xab6   :  { %v3745_v60 = vpop.f32.mrf.mxu0  ;;  %v3785_v16 = vpop.f32.mrf.mxu1 }
 0xab8   :  { %v3746_v10 = vpop.f32.mrf.mxu0  ;;  %v3786_v9 = vpop.f32.mrf.mxu1 }
 0xab9   :  { %v3787_v38 = vadd.f32 %v3786_v9, %v8088_v25  ;;  %v3747_v43 = vadd.f32 %v3746_v10, %v8089_v33 }
 0xaba   :  { %v3748_v7 = vpop.f32.mrf.mxu0  ;;  %v3788_v5 = vpop.f32.mrf.mxu1 }
 0xabb   :  { %v4437_v19 = vmul.f32 -1.442695, %v3787_v38  ;;  %v4436_v14 = vmul.f32 -1.442695, %v3747_v43 }
 0xabc   :  { %v3749_v44 = vpop.f32.mrf.mxu0  ;;  %v3789_v0 = vpop.f32.mrf.mxu1 }
 0xabd   :  { %4799 = vpow2.f32 %v4437_v19 }
 0xabe   :  { %4801 = vpow2.f32 %v4436_v14 }
 0xaca   :  { %v4800_v55 = vpop.eup %4799 }
 0xacb   :  { %v4802_v8 = vpop.eup %4801  ;;  %v3880_v11 = vadd.f32 1.0, %v4800_v55 }
 0xacc   :  { %v3874_v53 = vadd.f32 1.0, %v4802_v8 }
 0xacd   :  { %4803 = vrcp.f32 %v3880_v11 }
 0xace   :  { %4805 = vrcp.f32 %v3874_v53 }
 0xada   :  { %v4804_v58 = vpop.eup %4803 }
 0xadb   :  { %v4806_v15 = vpop.eup %4805  ;;  %v3890_v12 = vmul.f32 %v4804_v58, %v6753_v13  ;;  %v4556_v13 = vld [vmem:[%s6934_s8 + $0x10] sm:$0xff]  }
 0xadc   :  { %4522 = vmatpush3.bf16.msra.mxu1 %v4556_v13 }
 0xadd   :  { %4523 = vmatprep.subr.bf16.mxu1 %v4909_v29 }
 0xae0   :  { %4524 = vmatpush3.bf16.msra.mxu1 %v4557_v47 }
 0xae1   :  { %4525 = vmatprep.subr.bf16.mxu1 %v4909_v29 }
 0xaf6   :  { %v3825_v20 = vpop.f32.mrf.mxu0  ;;  %v3865_v61 = vpop.f32.mrf.mxu1 }
 0xaf8   :  { %v3826_v21 = vpop.f32.mrf.mxu0  ;;  %v3866_v4 = vpop.f32.mrf.mxu1 }
 0xaf9   :  { %v3827_v59 = vadd.f32 %v3826_v21, %v8090_v37  ;;  %v3867_v24 = vadd.f32 %v3866_v4, %v8091_v51 }
 0xafa   :  { %v3828_v56 = vpop.f32.mrf.mxu0  ;;  %v3868_v30 = vpop.f32.mrf.mxu1 }
 0xafb   :  { %4807 = vtanh.f32 %v3827_v59  ;;  %v4438_v27 = vmul.f32 -1.442695, %v3867_v24 }
 0xafc   :  { %v3829_v52 = vpop.f32.mrf.mxu0  ;;  %v3869_v18 = vpop.f32.mrf.mxu1 }
 0xafd   :  { %4809 = vpow2.f32 %v4438_v27 }
 0xb08   :  { %v4808_v26 = vpop.eup %4807 }
 0xb09   :  { %v3891_v54 = vmul.f32 %v4808_v26, %v4806_v15 }
 0xb0a   :  { %v4810_v6 = vpop.eup %4809 }
 0xb0b   :  { %v3892_v63 = vadd.f32 %v3891_v54, %v3890_v12  ;;  %v3887_v2 = vadd.f32 1.0, %v4810_v6 }
 0xb0d   :  { %4811 = vtanh.f32 %v3892_v63  ;;  %3900 = vst [vmem:[#allocation9 + $0x2] sm:$0x3] %v3892_v63 }
 0xb0e   :  { %4813 = vrcp.f32 %v3887_v2 }
 0xb1a   :  { %v4812_v3 = vpop.eup %4811 }
 0xb1b   :  { %v4814_v23 = vpop.eup %4813 }
 0xb1c   :  { %v3894_v57 = vmul.f32 %v4814_v23, %v4812_v3 }
 0xb1e   :  { %v3917_v32 = vrot.slane %v3894_v57, 2  ;;  %3897 = vst [vmem:[#allocation8 + $0x2] sm:$0x3] %v3894_v57 }
 0xb20   :  { %v3927_v45 = vsel %vm3923_vm2, %v6762_v34, %v3917_v32  ;;  %v4558_v34 = vld [vmem:[%s6934_s8] sm:$0xff]   ;;  %s4855_s8 = scalar_lea.vmem %s4166_s29, 64 }
 0xb21   :  { %v3928_v42 = vpack.c.bf16 %v3927_v45, %v8092_v36  ;;  %4526 = vmatpush3.bf16.msra.mxu1 %v4558_v34  ;;  %p4856_p10 = scmp.ne.s32.totalorder %s4166_s29, %s4855_s8  ;;  %p4861_p12 = scmp.lt.s32.totalorder %s4855_s8, %s4855_s8 }
 0xb23   :  { %4508 = vmatmul.mubr.bf16.vlgmr.msra.gmra.mxu0 %v3928_v42  ;;  %p4862_p13 = por %p4861_p12, %p4860_p11 }
 0xb25   :  { %p4863_p0 = pnand %p4862_p13, %p4856_p10 }
 0xbe3   :  { %v4034_v41 = vpop.f32.mrf.mxu0 }
 0xbe4   :  { %v4035_v39 = vadd.f32 %v4439_v31, %v4034_v41 }
 0xbe5   :  { %v4509_v28 = vpop.f32.mrf.mxu0 }
 0xbe6   :  { %v4041_v46 = vmax.f32 %v4035_v39, 0.0 }
 0xbe7   :  { %v4037_v48 = vpop.f32.mrf.mxu0 }
 0xbe8   :  { %v4038_v49 = vadd.f32 %v4439_v31, %v4037_v48 }
 0xbe9   :  { %v4510_v50 = vpop.f32.mrf.mxu0 }
 0xbea   :  { %v4042_v1 = vmax.f32 %v4038_v49, 0.0 }
 0xbec   :  { %v4043_v40 = vpack.c.bf16 %v4042_v1, %v4041_v46 }
 0xbee   :  { %4528 = vmatmul.mubr.bf16.vlgmr.msra.gmra.mxu1 %v4043_v40 }
 0xbef   :  { %4866 = shalt.err (!%p4863_p0)
}
 0xbf0   :  { %s4913_s7 = smov 2   ;;  %s4875_s2 = scalar_lea.vmem %s4178_s13, 64 }
 0xbf1   :  { %4171 = dma.vmem_to_hbm [thread:$0]  %s4166_s29, 64, %s6937_s11, [#allocation5], %s4905_s25, %s4905_s25, %s4913_s7  }
 0xbf2   :  { %p4876_p1 = scmp.ne.s32.totalorder %s4178_s13, %s4875_s2  ;;  %p4880_p2 = scmp.lt.s32.totalorder %s4178_s13, %s4178_s13 }
 0xbf3   :  { %p4881_p3 = scmp.lt.s32.totalorder %s4875_s2, %s4875_s2 }
 0xbf5   :  { %p4882_p4 = por %p4881_p3, %p4880_p2 }
 0xbf7   :  { %p4883_p5 = pnand %p4882_p4, %p4876_p1 }
 0xbf9   :  { %4886 = shalt.err (!%p4883_p5)
}
 0xbfa   :  { %4183 = dma.vmem_to_hbm [thread:$0]  %s4178_s13, 64, %s6938_s12, [#allocation10], %s4905_s25, %s4905_s25, %s4913_s7  }
 0xbfb   :  { %v4448_v29 = vld [vmem:[%s6935_s9] ss:$0 sm:$0xff] }
 0xcae   :  { %v4149_v35 = vpop.f32.mrf.mxu1 }
 0xcaf   :  { %v4150_v17 = vadd.f32 %v4448_v29, %v4149_v35 }
 0xcb0   :  { %v4529_v62 = vpop.f32.mrf.mxu1 }
 0xcb1   :  { %4156 = vst [vmem:[%s6936_s10] sm:$0xff] %v4150_v17 }
 0xcb2   :  { %v4152_v22 = vpop.f32.mrf.mxu1 }
 0xcb3   :  { %v4153_v60 = vadd.f32 %v4448_v29, %v4152_v22 }
 0xcb4   :  { %v4530_v16 = vpop.f32.mrf.mxu1 }
 0xcb5   :  { %4157 = vst [vmem:[%s6936_s10 + $0x8] sm:$0xff] %v4153_v60 }
 0xcb6   :  { %4899 = dma.done.wait [#allocation5], 64  }
 0xcb7   :  { %4900 = vsyncadd [#allocation5], 4294967232 }
 0xcb8   :  { %4901 = dma.done.wait [#allocation10], 64  }
 0xcb9   :  { %4902 = vsyncadd [#allocation10], 4294967232 }
 0xcba   :  { %4192 = vsyncpa [#allocation4], 1 }
 0xcbb   :  { %4193 = vsyncpa [#allocation7], 1 }
 0xcbc   :  { %4194 = vsyncpa [#allocation5], 1 }
 0xcbd   :  { %4195 = vsyncpa [#allocation10], 1 }

</bundles_post_ra>
